<compile_context>
chip_gen: v6e
topology: v6e:2x2x1
jax: 0.10.0
libtpu: 0.0.40
codegen_flags: <defaults>
</compile_context>

<pallas_src>
import jax
import jax.numpy as jnp
from jax.experimental import pallas as pl
from jax.experimental.pallas import tpu as pltpu


def _round_up(x, m):
    return (x + m - 1) // m * m


def _make_residual_kernel(NB, H, W, Cin, Crh, Chid, WPa, MARGIN, R,
                          compute_dtype, out_dtype):
    """Kernel over one block of NB batch elements.

    xr_ref : (NB, Ls, Cin)   compute_dtype  ReLU'd, zero-padded, flat slab
                                            (row stride WPa, front/back margin MARGIN)
    res_ref: (NB, H*W, Cin)  f32            dense original x (exact residual)
    w3_ref : (9, Cin, Crh)   compute_dtype  3x3 weights, tap-major (ky*3+kx)
    w1_ref : (Crh, Chid)     compute_dtype  1x1 weights
    o_ref  : (NB, H*W, Chid) out_dtype      x + block(x), dense / unpadded
    """
    CH = R * WPa                      # flat rows per compute chunk (multiple of 8)
    n_chunks = H // R
    # tap flat offsets (cross-correlation, matches torch.nn.Conv2d orientation)
    taps = [((ky - 1) * WPa + (kx - 1), ky * 3 + kx)
            for ky in range(3) for kx in range(3)]

    def kernel(xr_ref, res_ref, w3_ref, w1_ref, o_ref):
        w1 = w1_ref[...]                                    # (Crh, Chid), tiny; load once
        for b in range(NB):                                 # static, NB small
            for c in range(n_chunks):                       # static
                base = MARGIN + c * CH                      # 8-aligned chunk start
                # 3x3 conv: 9 shifted (CH, Cin) x (Cin, Crh) MXU matmuls,
                # accumulated in vregs (f32).  Slab is already ReLU'd and padded,
                # so taps are plain static slices; kx=0 taps are sublane-aligned.
                acc = None
                for d, t in taps:
                    patch = xr_ref[b, pl.ds(base + d, CH), :]          # (CH, Cin)
                    tap = jnp.dot(patch, w3_ref[t],
                                  preferred_element_type=jnp.float32)  # (CH, Crh) f32
                    acc = tap if acc is None else acc + tap
                # second ReLU + 1x1 conv, still in vregs
                hmid = jnp.maximum(acc, 0.0).astype(compute_dtype)     # (CH, Crh)
                y = jnp.dot(hmid, w1,
                            preferred_element_type=jnp.float32)        # (CH, Chid) f32
                # residual add (exact f32 x) + dense store of the W valid columns
                # of each of the R image rows in this chunk.
                for r in range(R):
                    row = c * R + r
                    res = res_ref[b, pl.ds(row * W, W), :]             # (W, Chid) f32
                    o_ref[b, pl.ds(row * W, W), :] = (
                        res + y[r * WPa:r * WPa + W, :]).astype(out_dtype)

    return kernel


def residual_forward_nhwc(x_nhwc, w3_k, w1_k, *,
                          compute_dtype=jnp.bfloat16,
                          out_dtype=jnp.bfloat16,
                          batch_block=None,
                          rows_per_chunk=None):
    """NHWC-native entry point.

    x_nhwc: (N, H, W, Cin) f32; w3_k: (9, Cin, Crh); w1_k: (Crh, Chid).
    Returns (N, H, W, Chid) in out_dtype.
    """
    N, H, W, Cin = x_nhwc.shape
    Crh = w3_k.shape[2]
    Chid = w1_k.shape[1]
    assert Chid == Cin, "residual add requires num_hiddens == in_channels"

    # 8-aligned padded row stride and flat-slab layout:
    #   [ MARGIN zeros | H rows of (W image cols + (WPa-W) zero cols) | MARGIN zeros ]
    WPa = _round_up(W + 2, 8)
    MARGIN = WPa + 8                          # multiple of 8, >= WPa + 1 (max |tap shift|)
    Ls = MARGIN + H * WPa + MARGIN

    # Batch blocking: amortize per-step overhead when N is large; keep 1 for small N
    # so both TensorCores get work on v7x.
    if batch_block is None:
        batch_block = 1
        if N > 8:
            for cand in (8, 4, 2):
                if N % cand == 0:
                    batch_block = cand
                    break
    NB = batch_block
    assert N % NB == 0, "batch_block must divide N"

    # Rows per compute chunk: largest divisor of H with R*WPa <= ~128 flat rows so
    # the f32 tap accumulator stays comfortably in vregs (no spills).
    if rows_per_chunk is None:
        rows_per_chunk = 1
        for cand in range(max(1, min(H, 128 // max(WPa, 1))), 0, -1):
            if H % cand == 0:
                rows_per_chunk = cand
                break
    R = rows_per_chunk
    assert H % R == 0, "rows_per_chunk must divide H"

    # ---- wrapper-side layout prep (pure XLA; fuses with the caller's transpose) ----
    # ReLU'd, zero-padded, flattened bf16 slab for the 3x3 taps.
    xr = jnp.maximum(x_nhwc, 0.0).astype(compute_dtype)             # (N, H, W, Cin)
    xr = jnp.pad(xr, ((0, 0), (0, 0), (0, WPa - W), (0, 0)))        # (N, H, WPa, Cin)
    xr = xr.reshape(N, H * WPa, Cin)
    xr = jnp.pad(xr, ((0, 0), (MARGIN, MARGIN), (0, 0)))            # (N, Ls, Cin)
    # Dense f32 original activation for the exact skip connection.
    xres = x_nhwc.reshape(N, H * W, Cin).astype(jnp.float32)        # (N, H*W, Cin)

    kernel = _make_residual_kernel(NB, H, W, Cin, Crh, Chid, WPa, MARGIN, R,
                                   compute_dtype, out_dtype)

    out_flat = pl.pallas_call(
        kernel,
        out_shape=jax.ShapeDtypeStruct((N, H * W, Chid), out_dtype),
        grid_spec=pltpu.PrefetchScalarGridSpec(
            num_scalar_prefetch=0,
            grid=(N // NB,),
            in_specs=[
                pl.BlockSpec((NB, Ls, Cin), lambda g: (g, 0, 0)),
                pl.BlockSpec((NB, H * W, Cin), lambda g: (g, 0, 0)),
                pl.BlockSpec((9, Cin, Crh), lambda g: (0, 0, 0)),
                pl.BlockSpec((Crh, Chid), lambda g: (0, 0)),
            ],
            out_specs=pl.BlockSpec((NB, H * W, Chid), lambda g: (g, 0, 0)),
        ),
        compiler_params=pltpu.CompilerParams(
            dimension_semantics=("parallel",),       # batch blocks -> both TCs on v7x
            vmem_limit_bytes=32 * 1024 * 1024,       # safe on v5e/v6e/v7x
        ),
    )(xr, xres, w3_k.astype(compute_dtype), w1_k.astype(compute_dtype))

    # Free metadata reshape (output is already dense & unpadded).
    return out_flat.reshape(N, H, W, Chid)


def residual_forward(x_nchw, w3, w1, *, compute_dtype=jnp.bfloat16,
                     out_dtype=jnp.bfloat16):
    """PyTorch-layout entry point.

    x_nchw: (N, Cin, H, W) f32; w3: (Crh, Cin, 3, 3) OIHW; w1: (Chid, Crh, 1, 1).
    The NCHW<->NHWC transposes exist only to match the PyTorch API; inside a full
    NHWC model call residual_forward_nhwc directly and skip them.
    """
    N, Cin, H, W = x_nchw.shape
    Crh = w3.shape[0]
    x = jnp.transpose(x_nchw, (0, 2, 3, 1))                           # NHWC
    w3_k = jnp.transpose(w3, (2, 3, 1, 0)).reshape(9, Cin, Crh)       # (9, Cin, Crh)
    w1_k = jnp.transpose(w1[:, :, 0, 0], (1, 0))                      # (Crh, Chid)
    out = residual_forward_nhwc(x, w3_k, w1_k,
                                compute_dtype=compute_dtype, out_dtype=out_dtype)
    return jnp.transpose(out, (0, 3, 1, 2))                           # NCHW


# ----------------------------- reference (plain JAX) -----------------------------

def _conv2d_nchw(x, w, pad):
    return jax.lax.conv_general_dilated(
        x, w, window_strides=(1, 1), padding=((pad, pad), (pad, pad)),
        dimension_numbers=("NCHW", "OIHW", "NCHW"),
        precision=jax.lax.Precision.HIGHEST)


def residual_reference(x_nchw, w3, w1):
    """Pure-f32 reference matching the PyTorch Residual module exactly (NCHW)."""
    h = jax.nn.relu(x_nchw)
    h = _conv2d_nchw(h, w3, 1)
    h = jax.nn.relu(h)
    h = _conv2d_nchw(h, w1, 0)
    return x_nchw + h


if __name__ == "__main__":
    # Module-default residual sizes: VQ_VAE(num_hiddens=64, num_residual_hiddens=32);
    # the residual block sees num_hiddens channels in and out.
    N, H, W = 2, 16, 16
    num_hiddens = 64
    num_residual_hiddens = 32

    key = jax.random.PRNGKey(0)
    kx_, kw3, kw1 = jax.random.split(key, 3)

    x = jax.random.normal(kx_, (N, num_hiddens, H, W), dtype=jnp.float32)
    w3 = jax.random.normal(kw3, (num_residual_hiddens, num_hiddens, 3, 3),
                           dtype=jnp.float32) * (2.0 / (num_hiddens * 9)) ** 0.5
    w1 = jax.random.normal(kw1, (num_hiddens, num_residual_hiddens, 1, 1),
                           dtype=jnp.float32) * (2.0 / num_residual_hiddens) ** 0.5

    out = residual_forward(x, w3, w1)
    out = jax.block_until_ready(out)
    assert out.shape == (N, num_hiddens, H, W)

    # Numerics-matched target: conv path on bf16-rounded operands (f32 accumulation,
    # bf16 intermediate activation — same as the kernel), residual added from the
    # original f32 x (same as the kernel's exact-f32 skip connection).
    rt = lambda a: a.astype(jnp.bfloat16).astype(jnp.float32)
    h = jax.nn.relu(rt(x))
    h = _conv2d_nchw(h, rt(w3), 1)
    h = rt(jax.nn.relu(h))
    h = _conv2d_nchw(h, rt(w1), 0)
    ref = x + h

    assert jnp.allclose(out.astype(jnp.float32), ref, atol=3e-2, rtol=3e-2), \
        "mismatch vs reference"
    print("KERNEL_OK")
</pallas_src>

<mosaic_0001>
module attributes {stable_mosaic.version = 11 : i64} {
  func.func @kernel(%arg0: i32, %arg1: memref<1x448x64xbf16, #tpu.memory_space<vmem>>, %arg2: memref<1x256x64xf32, #tpu.memory_space<vmem>>, %arg3: memref<9x64x32xbf16, #tpu.memory_space<vmem>>, %arg4: memref<32x64xbf16, #tpu.memory_space<vmem>>, %arg5: memref<1x256x64xbf16, #tpu.memory_space<vmem>>) attributes {dimension_semantics = [#tpu.dimension_semantics<parallel>], iteration_bounds = array<i64: 2>, scalar_prefetch = 0 : i64, scratch_operands = 0 : i64, tpu.core_type = #tpu.core_type<tc>, window_params = [{transform_indices = @transform_0, window_bounds = array<i64: 1, 448, 64>}, {transform_indices = @transform_1, window_bounds = array<i64: 1, 256, 64>}, {pipeline_mode = #tpu.pipeline_mode<synchronous>, transform_indices = @transform_2, window_bounds = array<i64: 9, 64, 32>}, {pipeline_mode = #tpu.pipeline_mode<synchronous>, transform_indices = @transform_3, window_bounds = array<i64: 32, 64>}, {transform_indices = @transform_4, window_bounds = array<i64: 1, 256, 64>}]} {
    %c0 = arith.constant 0 : index
    %c0_0 = arith.constant 0 : index
    %0 = vector.load %arg4[%c0, %c0_0] : memref<32x64xbf16, #tpu.memory_space<vmem>>, vector<32x64xbf16>
    %c0_1 = arith.constant 0 : index
    %c7 = arith.constant 7 : index
    %c0_2 = arith.constant 0 : index
    %1 = vector.load %arg1[%c0_1, %c7, %c0_2] : memref<1x448x64xbf16, #tpu.memory_space<vmem>>, vector<1x96x64xbf16>
    %2 = vector.shape_cast %1 : vector<1x96x64xbf16> to vector<96x64xbf16>
    %c0_3 = arith.constant 0 : index
    %c0_4 = arith.constant 0 : index
    %c0_5 = arith.constant 0 : index
    %3 = vector.load %arg3[%c0_3, %c0_4, %c0_5] : memref<9x64x32xbf16, #tpu.memory_space<vmem>>, vector<1x64x32xbf16>
    %4 = vector.shape_cast %3 : vector<1x64x32xbf16> to vector<64x32xbf16>
    %cst = arith.constant dense<0.000000e+00> : vector<96x32xf32>
    %5 = tpu.matmul %2, %4, %cst {dimension_numbers = #tpu.dot_dimension_numbers<[1], [0], [0], [1], [0, 0, 1, 1], [], []>} : vector<96x64xbf16>, vector<64x32xbf16>, vector<96x32xf32> -> vector<96x32xf32>
    %c0_6 = arith.constant 0 : index
    %c8 = arith.constant 8 : index
    %c0_7 = arith.constant 0 : index
    %6 = vector.load %arg1[%c0_6, %c8, %c0_7] : memref<1x448x64xbf16, #tpu.memory_space<vmem>>, vector<1x96x64xbf16>
    %7 = vector.shape_cast %6 : vector<1x96x64xbf16> to vector<96x64xbf16>
    %c1 = arith.constant 1 : index
    %c0_8 = arith.constant 0 : index
    %c0_9 = arith.constant 0 : index
    %8 = vector.load %arg3[%c1, %c0_8, %c0_9] : memref<9x64x32xbf16, #tpu.memory_space<vmem>>, vector<1x64x32xbf16>
    %9 = vector.shape_cast %8 : vector<1x64x32xbf16> to vector<64x32xbf16>
    %cst_10 = arith.constant dense<0.000000e+00> : vector<96x32xf32>
    %10 = tpu.matmul %7, %9, %cst_10 {dimension_numbers = #tpu.dot_dimension_numbers<[1], [0], [0], [1], [0, 0, 1, 1], [], []>} : vector<96x64xbf16>, vector<64x32xbf16>, vector<96x32xf32> -> vector<96x32xf32>
    %11 = arith.addf %5, %10 : vector<96x32xf32>
    %c0_11 = arith.constant 0 : index
    %c9 = arith.constant 9 : index
    %c0_12 = arith.constant 0 : index
    %12 = vector.load %arg1[%c0_11, %c9, %c0_12] : memref<1x448x64xbf16, #tpu.memory_space<vmem>>, vector<1x96x64xbf16>
    %13 = vector.shape_cast %12 : vector<1x96x64xbf16> to vector<96x64xbf16>
    %c2 = arith.constant 2 : index
    %c0_13 = arith.constant 0 : index
    %c0_14 = arith.constant 0 : index
    %14 = vector.load %arg3[%c2, %c0_13, %c0_14] : memref<9x64x32xbf16, #tpu.memory_space<vmem>>, vector<1x64x32xbf16>
    %15 = vector.shape_cast %14 : vector<1x64x32xbf16> to vector<64x32xbf16>
    %cst_15 = arith.constant dense<0.000000e+00> : vector<96x32xf32>
    %16 = tpu.matmul %13, %15, %cst_15 {dimension_numbers = #tpu.dot_dimension_numbers<[1], [0], [0], [1], [0, 0, 1, 1], [], []>} : vector<96x64xbf16>, vector<64x32xbf16>, vector<96x32xf32> -> vector<96x32xf32>
    %17 = arith.addf %11, %16 : vector<96x32xf32>
    %c0_16 = arith.constant 0 : index
    %c31 = arith.constant 31 : index
    %c0_17 = arith.constant 0 : index
    %18 = vector.load %arg1[%c0_16, %c31, %c0_17] : memref<1x448x64xbf16, #tpu.memory_space<vmem>>, vector<1x96x64xbf16>
    %19 = vector.shape_cast %18 : vector<1x96x64xbf16> to vector<96x64xbf16>
    %c3 = arith.constant 3 : index
    %c0_18 = arith.constant 0 : index
    %c0_19 = arith.constant 0 : index
    %20 = vector.load %arg3[%c3, %c0_18, %c0_19] : memref<9x64x32xbf16, #tpu.memory_space<vmem>>, vector<1x64x32xbf16>
    %21 = vector.shape_cast %20 : vector<1x64x32xbf16> to vector<64x32xbf16>
    %cst_20 = arith.constant dense<0.000000e+00> : vector<96x32xf32>
    %22 = tpu.matmul %19, %21, %cst_20 {dimension_numbers = #tpu.dot_dimension_numbers<[1], [0], [0], [1], [0, 0, 1, 1], [], []>} : vector<96x64xbf16>, vector<64x32xbf16>, vector<96x32xf32> -> vector<96x32xf32>
    %23 = arith.addf %17, %22 : vector<96x32xf32>
    %c0_21 = arith.constant 0 : index
    %c32 = arith.constant 32 : index
    %c0_22 = arith.constant 0 : index
    %24 = vector.load %arg1[%c0_21, %c32, %c0_22] : memref<1x448x64xbf16, #tpu.memory_space<vmem>>, vector<1x96x64xbf16>
    %25 = vector.shape_cast %24 : vector<1x96x64xbf16> to vector<96x64xbf16>
    %c4 = arith.constant 4 : index
    %c0_23 = arith.constant 0 : index
    %c0_24 = arith.constant 0 : index
    %26 = vector.load %arg3[%c4, %c0_23, %c0_24] : memref<9x64x32xbf16, #tpu.memory_space<vmem>>, vector<1x64x32xbf16>
    %27 = vector.shape_cast %26 : vector<1x64x32xbf16> to vector<64x32xbf16>
    %cst_25 = arith.constant dense<0.000000e+00> : vector<96x32xf32>
    %28 = tpu.matmul %25, %27, %cst_25 {dimension_numbers = #tpu.dot_dimension_numbers<[1], [0], [0], [1], [0, 0, 1, 1], [], []>} : vector<96x64xbf16>, vector<64x32xbf16>, vector<96x32xf32> -> vector<96x32xf32>
    %29 = arith.addf %23, %28 : vector<96x32xf32>
    %c0_26 = arith.constant 0 : index
    %c33 = arith.constant 33 : index
    %c0_27 = arith.constant 0 : index
    %30 = vector.load %arg1[%c0_26, %c33, %c0_27] : memref<1x448x64xbf16, #tpu.memory_space<vmem>>, vector<1x96x64xbf16>
    %31 = vector.shape_cast %30 : vector<1x96x64xbf16> to vector<96x64xbf16>
    %c5 = arith.constant 5 : index
    %c0_28 = arith.constant 0 : index
    %c0_29 = arith.constant 0 : index
    %32 = vector.load %arg3[%c5, %c0_28, %c0_29] : memref<9x64x32xbf16, #tpu.memory_space<vmem>>, vector<1x64x32xbf16>
    %33 = vector.shape_cast %32 : vector<1x64x32xbf16> to vector<64x32xbf16>
    %cst_30 = arith.constant dense<0.000000e+00> : vector<96x32xf32>
    %34 = tpu.matmul %31, %33, %cst_30 {dimension_numbers = #tpu.dot_dimension_numbers<[1], [0], [0], [1], [0, 0, 1, 1], [], []>} : vector<96x64xbf16>, vector<64x32xbf16>, vector<96x32xf32> -> vector<96x32xf32>
    %35 = arith.addf %29, %34 : vector<96x32xf32>
    %c0_31 = arith.constant 0 : index
    %c55 = arith.constant 55 : index
    %c0_32 = arith.constant 0 : index
    %36 = vector.load %arg1[%c0_31, %c55, %c0_32] : memref<1x448x64xbf16, #tpu.memory_space<vmem>>, vector<1x96x64xbf16>
    %37 = vector.shape_cast %36 : vector<1x96x64xbf16> to vector<96x64xbf16>
    %c6 = arith.constant 6 : index
    %c0_33 = arith.constant 0 : index
    %c0_34 = arith.constant 0 : index
    %38 = vector.load %arg3[%c6, %c0_33, %c0_34] : memref<9x64x32xbf16, #tpu.memory_space<vmem>>, vector<1x64x32xbf16>
    %39 = vector.shape_cast %38 : vector<1x64x32xbf16> to vector<64x32xbf16>
    %cst_35 = arith.constant dense<0.000000e+00> : vector<96x32xf32>
    %40 = tpu.matmul %37, %39, %cst_35 {dimension_numbers = #tpu.dot_dimension_numbers<[1], [0], [0], [1], [0, 0, 1, 1], [], []>} : vector<96x64xbf16>, vector<64x32xbf16>, vector<96x32xf32> -> vector<96x32xf32>
    %41 = arith.addf %35, %40 : vector<96x32xf32>
    %c0_36 = arith.constant 0 : index
    %c56 = arith.constant 56 : index
    %c0_37 = arith.constant 0 : index
    %42 = vector.load %arg1[%c0_36, %c56, %c0_37] : memref<1x448x64xbf16, #tpu.memory_space<vmem>>, vector<1x96x64xbf16>
    %43 = vector.shape_cast %42 : vector<1x96x64xbf16> to vector<96x64xbf16>
    %c7_38 = arith.constant 7 : index
    %c0_39 = arith.constant 0 : index
    %c0_40 = arith.constant 0 : index
    %44 = vector.load %arg3[%c7_38, %c0_39, %c0_40] : memref<9x64x32xbf16, #tpu.memory_space<vmem>>, vector<1x64x32xbf16>
    %45 = vector.shape_cast %44 : vector<1x64x32xbf16> to vector<64x32xbf16>
    %cst_41 = arith.constant dense<0.000000e+00> : vector<96x32xf32>
    %46 = tpu.matmul %43, %45, %cst_41 {dimension_numbers = #tpu.dot_dimension_numbers<[1], [0], [0], [1], [0, 0, 1, 1], [], []>} : vector<96x64xbf16>, vector<64x32xbf16>, vector<96x32xf32> -> vector<96x32xf32>
    %47 = arith.addf %41, %46 : vector<96x32xf32>
    %c0_42 = arith.constant 0 : index
    %c57 = arith.constant 57 : index
    %c0_43 = arith.constant 0 : index
    %48 = vector.load %arg1[%c0_42, %c57, %c0_43] : memref<1x448x64xbf16, #tpu.memory_space<vmem>>, vector<1x96x64xbf16>
    %49 = vector.shape_cast %48 : vector<1x96x64xbf16> to vector<96x64xbf16>
    %c8_44 = arith.constant 8 : index
    %c0_45 = arith.constant 0 : index
    %c0_46 = arith.constant 0 : index
    %50 = vector.load %arg3[%c8_44, %c0_45, %c0_46] : memref<9x64x32xbf16, #tpu.memory_space<vmem>>, vector<1x64x32xbf16>
    %51 = vector.shape_cast %50 : vector<1x64x32xbf16> to vector<64x32xbf16>
    %cst_47 = arith.constant dense<0.000000e+00> : vector<96x32xf32>
    %52 = tpu.matmul %49, %51, %cst_47 {dimension_numbers = #tpu.dot_dimension_numbers<[1], [0], [0], [1], [0, 0, 1, 1], [], []>} : vector<96x64xbf16>, vector<64x32xbf16>, vector<96x32xf32> -> vector<96x32xf32>
    %53 = arith.addf %47, %52 : vector<96x32xf32>
    %cst_48 = arith.constant 0.000000e+00 : f32
    %54 = vector.broadcast %cst_48 : f32 to vector<96x32xf32>
    %55 = arith.maximumf %53, %54 : vector<96x32xf32>
    %56 = arith.truncf %55 : vector<96x32xf32> to vector<96x32xbf16>
    %cst_49 = arith.constant dense<0.000000e+00> : vector<96x64xf32>
    %57 = tpu.matmul %56, %0, %cst_49 {dimension_numbers = #tpu.dot_dimension_numbers<[1], [0], [0], [1], [0, 0, 1, 1], [], []>} : vector<96x32xbf16>, vector<32x64xbf16>, vector<96x64xf32> -> vector<96x64xf32>
    %c0_50 = arith.constant 0 : index
    %c0_51 = arith.constant 0 : index
    %c0_52 = arith.constant 0 : index
    %58 = vector.load %arg2[%c0_50, %c0_51, %c0_52] : memref<1x256x64xf32, #tpu.memory_space<vmem>>, vector<1x16x64xf32>
    %59 = vector.shape_cast %58 : vector<1x16x64xf32> to vector<16x64xf32>
    %60 = vector.extract_strided_slice %57 {offsets = [0, 0], sizes = [16, 64], strides = [1, 1]} : vector<96x64xf32> to vector<16x64xf32>
    %61 = arith.addf %59, %60 : vector<16x64xf32>
    %62 = arith.truncf %61 : vector<16x64xf32> to vector<16x64xbf16>
    %c0_53 = arith.constant 0 : index
    %c0_54 = arith.constant 0 : index
    %c0_55 = arith.constant 0 : index
    %63 = vector.load %arg5[%c0_53, %c0_54, %c0_55] : memref<1x256x64xbf16, #tpu.memory_space<vmem>>, vector<1x16x64xbf16>
    %64 = vector.shape_cast %63 : vector<1x16x64xbf16> to vector<16x64xbf16>
    %65 = vector.shape_cast %62 : vector<16x64xbf16> to vector<1x16x64xbf16>
    tpu.vector_store %arg5[%c0_53, %c0_54, %c0_55], %65 {strides = array<i32>} : memref<1x256x64xbf16, #tpu.memory_space<vmem>>, vector<1x16x64xbf16>,
    %c0_56 = arith.constant 0 : index
    %c16 = arith.constant 16 : index
    %c0_57 = arith.constant 0 : index
    %66 = vector.load %arg2[%c0_56, %c16, %c0_57] : memref<1x256x64xf32, #tpu.memory_space<vmem>>, vector<1x16x64xf32>
    %67 = vector.shape_cast %66 : vector<1x16x64xf32> to vector<16x64xf32>
    %68 = vector.extract_strided_slice %57 {offsets = [24, 0], sizes = [16, 64], strides = [1, 1]} : vector<96x64xf32> to vector<16x64xf32>
    %69 = arith.addf %67, %68 : vector<16x64xf32>
    %70 = arith.truncf %69 : vector<16x64xf32> to vector<16x64xbf16>
    %c0_58 = arith.constant 0 : index
    %c16_59 = arith.constant 16 : index
    %c0_60 = arith.constant 0 : index
    %71 = vector.load %arg5[%c0_58, %c16_59, %c0_60] : memref<1x256x64xbf16, #tpu.memory_space<vmem>>, vector<1x16x64xbf16>
    %72 = vector.shape_cast %71 : vector<1x16x64xbf16> to vector<16x64xbf16>
    %73 = vector.shape_cast %70 : vector<16x64xbf16> to vector<1x16x64xbf16>
    tpu.vector_store %arg5[%c0_58, %c16_59, %c0_60], %73 {strides = array<i32>} : memref<1x256x64xbf16, #tpu.memory_space<vmem>>, vector<1x16x64xbf16>,
    %c0_61 = arith.constant 0 : index
    %c32_62 = arith.constant 32 : index
    %c0_63 = arith.constant 0 : index
    %74 = vector.load %arg2[%c0_61, %c32_62, %c0_63] : memref<1x256x64xf32, #tpu.memory_space<vmem>>, vector<1x16x64xf32>
    %75 = vector.shape_cast %74 : vector<1x16x64xf32> to vector<16x64xf32>
    %76 = vector.extract_strided_slice %57 {offsets = [48, 0], sizes = [16, 64], strides = [1, 1]} : vector<96x64xf32> to vector<16x64xf32>
    %77 = arith.addf %75, %76 : vector<16x64xf32>
    %78 = arith.truncf %77 : vector<16x64xf32> to vector<16x64xbf16>
    %c0_64 = arith.constant 0 : index
    %c32_65 = arith.constant 32 : index
    %c0_66 = arith.constant 0 : index
    %79 = vector.load %arg5[%c0_64, %c32_65, %c0_66] : memref<1x256x64xbf16, #tpu.memory_space<vmem>>, vector<1x16x64xbf16>
    %80 = vector.shape_cast %79 : vector<1x16x64xbf16> to vector<16x64xbf16>
    %81 = vector.shape_cast %78 : vector<16x64xbf16> to vector<1x16x64xbf16>
    tpu.vector_store %arg5[%c0_64, %c32_65, %c0_66], %81 {strides = array<i32>} : memref<1x256x64xbf16, #tpu.memory_space<vmem>>, vector<1x16x64xbf16>,
    %c0_67 = arith.constant 0 : index
    %c48 = arith.constant 48 : index
    %c0_68 = arith.constant 0 : index
    %82 = vector.load %arg2[%c0_67, %c48, %c0_68] : memref<1x256x64xf32, #tpu.memory_space<vmem>>, vector<1x16x64xf32>
    %83 = vector.shape_cast %82 : vector<1x16x64xf32> to vector<16x64xf32>
    %84 = vector.extract_strided_slice %57 {offsets = [72, 0], sizes = [16, 64], strides = [1, 1]} : vector<96x64xf32> to vector<16x64xf32>
    %85 = arith.addf %83, %84 : vector<16x64xf32>
    %86 = arith.truncf %85 : vector<16x64xf32> to vector<16x64xbf16>
    %c0_69 = arith.constant 0 : index
    %c48_70 = arith.constant 48 : index
    %c0_71 = arith.constant 0 : index
    %87 = vector.load %arg5[%c0_69, %c48_70, %c0_71] : memref<1x256x64xbf16, #tpu.memory_space<vmem>>, vector<1x16x64xbf16>
    %88 = vector.shape_cast %87 : vector<1x16x64xbf16> to vector<16x64xbf16>
    %89 = vector.shape_cast %86 : vector<16x64xbf16> to vector<1x16x64xbf16>
    tpu.vector_store %arg5[%c0_69, %c48_70, %c0_71], %89 {strides = array<i32>} : memref<1x256x64xbf16, #tpu.memory_space<vmem>>, vector<1x16x64xbf16>,
    %c0_72 = arith.constant 0 : index
    %c103 = arith.constant 103 : index
    %c0_73 = arith.constant 0 : index
    %90 = vector.load %arg1[%c0_72, %c103, %c0_73] : memref<1x448x64xbf16, #tpu.memory_space<vmem>>, vector<1x96x64xbf16>
    %91 = vector.shape_cast %90 : vector<1x96x64xbf16> to vector<96x64xbf16>
    %c0_74 = arith.constant 0 : index
    %c0_75 = arith.constant 0 : index
    %c0_76 = arith.constant 0 : index
    %92 = vector.load %arg3[%c0_74, %c0_75, %c0_76] : memref<9x64x32xbf16, #tpu.memory_space<vmem>>, vector<1x64x32xbf16>
    %93 = vector.shape_cast %92 : vector<1x64x32xbf16> to vector<64x32xbf16>
    %cst_77 = arith.constant dense<0.000000e+00> : vector<96x32xf32>
    %94 = tpu.matmul %91, %93, %cst_77 {dimension_numbers = #tpu.dot_dimension_numbers<[1], [0], [0], [1], [0, 0, 1, 1], [], []>} : vector<96x64xbf16>, vector<64x32xbf16>, vector<96x32xf32> -> vector<96x32xf32>
    %c0_78 = arith.constant 0 : index
    %c104 = arith.constant 104 : index
    %c0_79 = arith.constant 0 : index
    %95 = vector.load %arg1[%c0_78, %c104, %c0_79] : memref<1x448x64xbf16, #tpu.memory_space<vmem>>, vector<1x96x64xbf16>
    %96 = vector.shape_cast %95 : vector<1x96x64xbf16> to vector<96x64xbf16>
    %c1_80 = arith.constant 1 : index
    %c0_81 = arith.constant 0 : index
    %c0_82 = arith.constant 0 : index
    %97 = vector.load %arg3[%c1_80, %c0_81, %c0_82] : memref<9x64x32xbf16, #tpu.memory_space<vmem>>, vector<1x64x32xbf16>
    %98 = vector.shape_cast %97 : vector<1x64x32xbf16> to vector<64x32xbf16>
    %cst_83 = arith.constant dense<0.000000e+00> : vector<96x32xf32>
    %99 = tpu.matmul %96, %98, %cst_83 {dimension_numbers = #tpu.dot_dimension_numbers<[1], [0], [0], [1], [0, 0, 1, 1], [], []>} : vector<96x64xbf16>, vector<64x32xbf16>, vector<96x32xf32> -> vector<96x32xf32>
    %100 = arith.addf %94, %99 : vector<96x32xf32>
    %c0_84 = arith.constant 0 : index
    %c105 = arith.constant 105 : index
    %c0_85 = arith.constant 0 : index
    %101 = vector.load %arg1[%c0_84, %c105, %c0_85] : memref<1x448x64xbf16, #tpu.memory_space<vmem>>, vector<1x96x64xbf16>
    %102 = vector.shape_cast %101 : vector<1x96x64xbf16> to vector<96x64xbf16>
    %c2_86 = arith.constant 2 : index
    %c0_87 = arith.constant 0 : index
    %c0_88 = arith.constant 0 : index
    %103 = vector.load %arg3[%c2_86, %c0_87, %c0_88] : memref<9x64x32xbf16, #tpu.memory_space<vmem>>, vector<1x64x32xbf16>
    %104 = vector.shape_cast %103 : vector<1x64x32xbf16> to vector<64x32xbf16>
    %cst_89 = arith.constant dense<0.000000e+00> : vector<96x32xf32>
    %105 = tpu.matmul %102, %104, %cst_89 {dimension_numbers = #tpu.dot_dimension_numbers<[1], [0], [0], [1], [0, 0, 1, 1], [], []>} : vector<96x64xbf16>, vector<64x32xbf16>, vector<96x32xf32> -> vector<96x32xf32>
    %106 = arith.addf %100, %105 : vector<96x32xf32>
    %c0_90 = arith.constant 0 : index
    %c127 = arith.constant 127 : index
    %c0_91 = arith.constant 0 : index
    %107 = vector.load %arg1[%c0_90, %c127, %c0_91] : memref<1x448x64xbf16, #tpu.memory_space<vmem>>, vector<1x96x64xbf16>
    %108 = vector.shape_cast %107 : vector<1x96x64xbf16> to vector<96x64xbf16>
    %c3_92 = arith.constant 3 : index
    %c0_93 = arith.constant 0 : index
    %c0_94 = arith.constant 0 : index
    %109 = vector.load %arg3[%c3_92, %c0_93, %c0_94] : memref<9x64x32xbf16, #tpu.memory_space<vmem>>, vector<1x64x32xbf16>
    %110 = vector.shape_cast %109 : vector<1x64x32xbf16> to vector<64x32xbf16>
    %cst_95 = arith.constant dense<0.000000e+00> : vector<96x32xf32>
    %111 = tpu.matmul %108, %110, %cst_95 {dimension_numbers = #tpu.dot_dimension_numbers<[1], [0], [0], [1], [0, 0, 1, 1], [], []>} : vector<96x64xbf16>, vector<64x32xbf16>, vector<96x32xf32> -> vector<96x32xf32>
    %112 = arith.addf %106, %111 : vector<96x32xf32>
    %c0_96 = arith.constant 0 : index
    %c128 = arith.constant 128 : index
    %c0_97 = arith.constant 0 : index
    %113 = vector.load %arg1[%c0_96, %c128, %c0_97] : memref<1x448x64xbf16, #tpu.memory_space<vmem>>, vector<1x96x64xbf16>
    %114 = vector.shape_cast %113 : vector<1x96x64xbf16> to vector<96x64xbf16>
    %c4_98 = arith.constant 4 : index
    %c0_99 = arith.constant 0 : index
    %c0_100 = arith.constant 0 : index
    %115 = vector.load %arg3[%c4_98, %c0_99, %c0_100] : memref<9x64x32xbf16, #tpu.memory_space<vmem>>, vector<1x64x32xbf16>
    %116 = vector.shape_cast %115 : vector<1x64x32xbf16> to vector<64x32xbf16>
    %cst_101 = arith.constant dense<0.000000e+00> : vector<96x32xf32>
    %117 = tpu.matmul %114, %116, %cst_101 {dimension_numbers = #tpu.dot_dimension_numbers<[1], [0], [0], [1], [0, 0, 1, 1], [], []>} : vector<96x64xbf16>, vector<64x32xbf16>, vector<96x32xf32> -> vector<96x32xf32>
    %118 = arith.addf %112, %117 : vector<96x32xf32>
    %c0_102 = arith.constant 0 : index
    %c129 = arith.constant 129 : index
    %c0_103 = arith.constant 0 : index
    %119 = vector.load %arg1[%c0_102, %c129, %c0_103] : memref<1x448x64xbf16, #tpu.memory_space<vmem>>, vector<1x96x64xbf16>
    %120 = vector.shape_cast %119 : vector<1x96x64xbf16> to vector<96x64xbf16>
    %c5_104 = arith.constant 5 : index
    %c0_105 = arith.constant 0 : index
    %c0_106 = arith.constant 0 : index
    %121 = vector.load %arg3[%c5_104, %c0_105, %c0_106] : memref<9x64x32xbf16, #tpu.memory_space<vmem>>, vector<1x64x32xbf16>
    %122 = vector.shape_cast %121 : vector<1x64x32xbf16> to vector<64x32xbf16>
    %cst_107 = arith.constant dense<0.000000e+00> : vector<96x32xf32>
    %123 = tpu.matmul %120, %122, %cst_107 {dimension_numbers = #tpu.dot_dimension_numbers<[1], [0], [0], [1], [0, 0, 1, 1], [], []>} : vector<96x64xbf16>, vector<64x32xbf16>, vector<96x32xf32> -> vector<96x32xf32>
    %124 = arith.addf %118, %123 : vector<96x32xf32>
    %c0_108 = arith.constant 0 : index
    %c151 = arith.constant 151 : index
    %c0_109 = arith.constant 0 : index
    %125 = vector.load %arg1[%c0_108, %c151, %c0_109] : memref<1x448x64xbf16, #tpu.memory_space<vmem>>, vector<1x96x64xbf16>
    %126 = vector.shape_cast %125 : vector<1x96x64xbf16> to vector<96x64xbf16>
    %c6_110 = arith.constant 6 : index
    %c0_111 = arith.constant 0 : index
    %c0_112 = arith.constant 0 : index
    %127 = vector.load %arg3[%c6_110, %c0_111, %c0_112] : memref<9x64x32xbf16, #tpu.memory_space<vmem>>, vector<1x64x32xbf16>
    %128 = vector.shape_cast %127 : vector<1x64x32xbf16> to vector<64x32xbf16>
    %cst_113 = arith.constant dense<0.000000e+00> : vector<96x32xf32>
    %129 = tpu.matmul %126, %128, %cst_113 {dimension_numbers = #tpu.dot_dimension_numbers<[1], [0], [0], [1], [0, 0, 1, 1], [], []>} : vector<96x64xbf16>, vector<64x32xbf16>, vector<96x32xf32> -> vector<96x32xf32>
    %130 = arith.addf %124, %129 : vector<96x32xf32>
    %c0_114 = arith.constant 0 : index
    %c152 = arith.constant 152 : index
    %c0_115 = arith.constant 0 : index
    %131 = vector.load %arg1[%c0_114, %c152, %c0_115] : memref<1x448x64xbf16, #tpu.memory_space<vmem>>, vector<1x96x64xbf16>
    %132 = vector.shape_cast %131 : vector<1x96x64xbf16> to vector<96x64xbf16>
    %c7_116 = arith.constant 7 : index
    %c0_117 = arith.constant 0 : index
    %c0_118 = arith.constant 0 : index
    %133 = vector.load %arg3[%c7_116, %c0_117, %c0_118] : memref<9x64x32xbf16, #tpu.memory_space<vmem>>, vector<1x64x32xbf16>
    %134 = vector.shape_cast %133 : vector<1x64x32xbf16> to vector<64x32xbf16>
    %cst_119 = arith.constant dense<0.000000e+00> : vector<96x32xf32>
    %135 = tpu.matmul %132, %134, %cst_119 {dimension_numbers = #tpu.dot_dimension_numbers<[1], [0], [0], [1], [0, 0, 1, 1], [], []>} : vector<96x64xbf16>, vector<64x32xbf16>, vector<96x32xf32> -> vector<96x32xf32>
    %136 = arith.addf %130, %135 : vector<96x32xf32>
    %c0_120 = arith.constant 0 : index
    %c153 = arith.constant 153 : index
    %c0_121 = arith.constant 0 : index
    %137 = vector.load %arg1[%c0_120, %c153, %c0_121] : memref<1x448x64xbf16, #tpu.memory_space<vmem>>, vector<1x96x64xbf16>
    %138 = vector.shape_cast %137 : vector<1x96x64xbf16> to vector<96x64xbf16>
    %c8_122 = arith.constant 8 : index
    %c0_123 = arith.constant 0 : index
    %c0_124 = arith.constant 0 : index
    %139 = vector.load %arg3[%c8_122, %c0_123, %c0_124] : memref<9x64x32xbf16, #tpu.memory_space<vmem>>, vector<1x64x32xbf16>
    %140 = vector.shape_cast %139 : vector<1x64x32xbf16> to vector<64x32xbf16>
    %cst_125 = arith.constant dense<0.000000e+00> : vector<96x32xf32>
    %141 = tpu.matmul %138, %140, %cst_125 {dimension_numbers = #tpu.dot_dimension_numbers<[1], [0], [0], [1], [0, 0, 1, 1], [], []>} : vector<96x64xbf16>, vector<64x32xbf16>, vector<96x32xf32> -> vector<96x32xf32>
    %142 = arith.addf %136, %141 : vector<96x32xf32>
    %cst_126 = arith.constant 0.000000e+00 : f32
    %143 = vector.broadcast %cst_126 : f32 to vector<96x32xf32>
    %144 = arith.maximumf %142, %143 : vector<96x32xf32>
    %145 = arith.truncf %144 : vector<96x32xf32> to vector<96x32xbf16>
    %cst_127 = arith.constant dense<0.000000e+00> : vector<96x64xf32>
    %146 = tpu.matmul %145, %0, %cst_127 {dimension_numbers = #tpu.dot_dimension_numbers<[1], [0], [0], [1], [0, 0, 1, 1], [], []>} : vector<96x32xbf16>, vector<32x64xbf16>, vector<96x64xf32> -> vector<96x64xf32>
    %c0_128 = arith.constant 0 : index
    %c64 = arith.constant 64 : index
    %c0_129 = arith.constant 0 : index
    %147 = vector.load %arg2[%c0_128, %c64, %c0_129] : memref<1x256x64xf32, #tpu.memory_space<vmem>>, vector<1x16x64xf32>
    %148 = vector.shape_cast %147 : vector<1x16x64xf32> to vector<16x64xf32>
    %149 = vector.extract_strided_slice %146 {offsets = [0, 0], sizes = [16, 64], strides = [1, 1]} : vector<96x64xf32> to vector<16x64xf32>
    %150 = arith.addf %148, %149 : vector<16x64xf32>
    %151 = arith.truncf %150 : vector<16x64xf32> to vector<16x64xbf16>
    %c0_130 = arith.constant 0 : index
    %c64_131 = arith.constant 64 : index
    %c0_132 = arith.constant 0 : index
    %152 = vector.load %arg5[%c0_130, %c64_131, %c0_132] : memref<1x256x64xbf16, #tpu.memory_space<vmem>>, vector<1x16x64xbf16>
    %153 = vector.shape_cast %152 : vector<1x16x64xbf16> to vector<16x64xbf16>
    %154 = vector.shape_cast %151 : vector<16x64xbf16> to vector<1x16x64xbf16>
    tpu.vector_store %arg5[%c0_130, %c64_131, %c0_132], %154 {strides = array<i32>} : memref<1x256x64xbf16, #tpu.memory_space<vmem>>, vector<1x16x64xbf16>,
    %c0_133 = arith.constant 0 : index
    %c80 = arith.constant 80 : index
    %c0_134 = arith.constant 0 : index
    %155 = vector.load %arg2[%c0_133, %c80, %c0_134] : memref<1x256x64xf32, #tpu.memory_space<vmem>>, vector<1x16x64xf32>
    %156 = vector.shape_cast %155 : vector<1x16x64xf32> to vector<16x64xf32>
    %157 = vector.extract_strided_slice %146 {offsets = [24, 0], sizes = [16, 64], strides = [1, 1]} : vector<96x64xf32> to vector<16x64xf32>
    %158 = arith.addf %156, %157 : vector<16x64xf32>
    %159 = arith.truncf %158 : vector<16x64xf32> to vector<16x64xbf16>
    %c0_135 = arith.constant 0 : index
    %c80_136 = arith.constant 80 : index
    %c0_137 = arith.constant 0 : index
    %160 = vector.load %arg5[%c0_135, %c80_136, %c0_137] : memref<1x256x64xbf16, #tpu.memory_space<vmem>>, vector<1x16x64xbf16>
    %161 = vector.shape_cast %160 : vector<1x16x64xbf16> to vector<16x64xbf16>
    %162 = vector.shape_cast %159 : vector<16x64xbf16> to vector<1x16x64xbf16>
    tpu.vector_store %arg5[%c0_135, %c80_136, %c0_137], %162 {strides = array<i32>} : memref<1x256x64xbf16, #tpu.memory_space<vmem>>, vector<1x16x64xbf16>,
    %c0_138 = arith.constant 0 : index
    %c96 = arith.constant 96 : index
    %c0_139 = arith.constant 0 : index
    %163 = vector.load %arg2[%c0_138, %c96, %c0_139] : memref<1x256x64xf32, #tpu.memory_space<vmem>>, vector<1x16x64xf32>
    %164 = vector.shape_cast %163 : vector<1x16x64xf32> to vector<16x64xf32>
    %165 = vector.extract_strided_slice %146 {offsets = [48, 0], sizes = [16, 64], strides = [1, 1]} : vector<96x64xf32> to vector<16x64xf32>
    %166 = arith.addf %164, %165 : vector<16x64xf32>
    %167 = arith.truncf %166 : vector<16x64xf32> to vector<16x64xbf16>
    %c0_140 = arith.constant 0 : index
    %c96_141 = arith.constant 96 : index
    %c0_142 = arith.constant 0 : index
    %168 = vector.load %arg5[%c0_140, %c96_141, %c0_142] : memref<1x256x64xbf16, #tpu.memory_space<vmem>>, vector<1x16x64xbf16>
    %169 = vector.shape_cast %168 : vector<1x16x64xbf16> to vector<16x64xbf16>
    %170 = vector.shape_cast %167 : vector<16x64xbf16> to vector<1x16x64xbf16>
    tpu.vector_store %arg5[%c0_140, %c96_141, %c0_142], %170 {strides = array<i32>} : memref<1x256x64xbf16, #tpu.memory_space<vmem>>, vector<1x16x64xbf16>,
    %c0_143 = arith.constant 0 : index
    %c112 = arith.constant 112 : index
    %c0_144 = arith.constant 0 : index
    %171 = vector.load %arg2[%c0_143, %c112, %c0_144] : memref<1x256x64xf32, #tpu.memory_space<vmem>>, vector<1x16x64xf32>
    %172 = vector.shape_cast %171 : vector<1x16x64xf32> to vector<16x64xf32>
    %173 = vector.extract_strided_slice %146 {offsets = [72, 0], sizes = [16, 64], strides = [1, 1]} : vector<96x64xf32> to vector<16x64xf32>
    %174 = arith.addf %172, %173 : vector<16x64xf32>
    %175 = arith.truncf %174 : vector<16x64xf32> to vector<16x64xbf16>
    %c0_145 = arith.constant 0 : index
    %c112_146 = arith.constant 112 : index
    %c0_147 = arith.constant 0 : index
    %176 = vector.load %arg5[%c0_145, %c112_146, %c0_147] : memref<1x256x64xbf16, #tpu.memory_space<vmem>>, vector<1x16x64xbf16>
    %177 = vector.shape_cast %176 : vector<1x16x64xbf16> to vector<16x64xbf16>
    %178 = vector.shape_cast %175 : vector<16x64xbf16> to vector<1x16x64xbf16>
    tpu.vector_store %arg5[%c0_145, %c112_146, %c0_147], %178 {strides = array<i32>} : memref<1x256x64xbf16, #tpu.memory_space<vmem>>, vector<1x16x64xbf16>,
    %c0_148 = arith.constant 0 : index
    %c199 = arith.constant 199 : index
    %c0_149 = arith.constant 0 : index
    %179 = vector.load %arg1[%c0_148, %c199, %c0_149] : memref<1x448x64xbf16, #tpu.memory_space<vmem>>, vector<1x96x64xbf16>
    %180 = vector.shape_cast %179 : vector<1x96x64xbf16> to vector<96x64xbf16>
    %c0_150 = arith.constant 0 : index
    %c0_151 = arith.constant 0 : index
    %c0_152 = arith.constant 0 : index
    %181 = vector.load %arg3[%c0_150, %c0_151, %c0_152] : memref<9x64x32xbf16, #tpu.memory_space<vmem>>, vector<1x64x32xbf16>
    %182 = vector.shape_cast %181 : vector<1x64x32xbf16> to vector<64x32xbf16>
    %cst_153 = arith.constant dense<0.000000e+00> : vector<96x32xf32>
    %183 = tpu.matmul %180, %182, %cst_153 {dimension_numbers = #tpu.dot_dimension_numbers<[1], [0], [0], [1], [0, 0, 1, 1], [], []>} : vector<96x64xbf16>, vector<64x32xbf16>, vector<96x32xf32> -> vector<96x32xf32>
    %c0_154 = arith.constant 0 : index
    %c200 = arith.constant 200 : index
    %c0_155 = arith.constant 0 : index
    %184 = vector.load %arg1[%c0_154, %c200, %c0_155] : memref<1x448x64xbf16, #tpu.memory_space<vmem>>, vector<1x96x64xbf16>
    %185 = vector.shape_cast %184 : vector<1x96x64xbf16> to vector<96x64xbf16>
    %c1_156 = arith.constant 1 : index
    %c0_157 = arith.constant 0 : index
    %c0_158 = arith.constant 0 : index
    %186 = vector.load %arg3[%c1_156, %c0_157, %c0_158] : memref<9x64x32xbf16, #tpu.memory_space<vmem>>, vector<1x64x32xbf16>
    %187 = vector.shape_cast %186 : vector<1x64x32xbf16> to vector<64x32xbf16>
    %cst_159 = arith.constant dense<0.000000e+00> : vector<96x32xf32>
    %188 = tpu.matmul %185, %187, %cst_159 {dimension_numbers = #tpu.dot_dimension_numbers<[1], [0], [0], [1], [0, 0, 1, 1], [], []>} : vector<96x64xbf16>, vector<64x32xbf16>, vector<96x32xf32> -> vector<96x32xf32>
    %189 = arith.addf %183, %188 : vector<96x32xf32>
    %c0_160 = arith.constant 0 : index
    %c201 = arith.constant 201 : index
    %c0_161 = arith.constant 0 : index
    %190 = vector.load %arg1[%c0_160, %c201, %c0_161] : memref<1x448x64xbf16, #tpu.memory_space<vmem>>, vector<1x96x64xbf16>
    %191 = vector.shape_cast %190 : vector<1x96x64xbf16> to vector<96x64xbf16>
    %c2_162 = arith.constant 2 : index
    %c0_163 = arith.constant 0 : index
    %c0_164 = arith.constant 0 : index
    %192 = vector.load %arg3[%c2_162, %c0_163, %c0_164] : memref<9x64x32xbf16, #tpu.memory_space<vmem>>, vector<1x64x32xbf16>
    %193 = vector.shape_cast %192 : vector<1x64x32xbf16> to vector<64x32xbf16>
    %cst_165 = arith.constant dense<0.000000e+00> : vector<96x32xf32>
    %194 = tpu.matmul %191, %193, %cst_165 {dimension_numbers = #tpu.dot_dimension_numbers<[1], [0], [0], [1], [0, 0, 1, 1], [], []>} : vector<96x64xbf16>, vector<64x32xbf16>, vector<96x32xf32> -> vector<96x32xf32>
    %195 = arith.addf %189, %194 : vector<96x32xf32>
    %c0_166 = arith.constant 0 : index
    %c223 = arith.constant 223 : index
    %c0_167 = arith.constant 0 : index
    %196 = vector.load %arg1[%c0_166, %c223, %c0_167] : memref<1x448x64xbf16, #tpu.memory_space<vmem>>, vector<1x96x64xbf16>
    %197 = vector.shape_cast %196 : vector<1x96x64xbf16> to vector<96x64xbf16>
    %c3_168 = arith.constant 3 : index
    %c0_169 = arith.constant 0 : index
    %c0_170 = arith.constant 0 : index
    %198 = vector.load %arg3[%c3_168, %c0_169, %c0_170] : memref<9x64x32xbf16, #tpu.memory_space<vmem>>, vector<1x64x32xbf16>
    %199 = vector.shape_cast %198 : vector<1x64x32xbf16> to vector<64x32xbf16>
    %cst_171 = arith.constant dense<0.000000e+00> : vector<96x32xf32>
    %200 = tpu.matmul %197, %199, %cst_171 {dimension_numbers = #tpu.dot_dimension_numbers<[1], [0], [0], [1], [0, 0, 1, 1], [], []>} : vector<96x64xbf16>, vector<64x32xbf16>, vector<96x32xf32> -> vector<96x32xf32>
    %201 = arith.addf %195, %200 : vector<96x32xf32>
    %c0_172 = arith.constant 0 : index
    %c224 = arith.constant 224 : index
    %c0_173 = arith.constant 0 : index
    %202 = vector.load %arg1[%c0_172, %c224, %c0_173] : memref<1x448x64xbf16, #tpu.memory_space<vmem>>, vector<1x96x64xbf16>
    %203 = vector.shape_cast %202 : vector<1x96x64xbf16> to vector<96x64xbf16>
    %c4_174 = arith.constant 4 : index
    %c0_175 = arith.constant 0 : index
    %c0_176 = arith.constant 0 : index
    %204 = vector.load %arg3[%c4_174, %c0_175, %c0_176] : memref<9x64x32xbf16, #tpu.memory_space<vmem>>, vector<1x64x32xbf16>
    %205 = vector.shape_cast %204 : vector<1x64x32xbf16> to vector<64x32xbf16>
    %cst_177 = arith.constant dense<0.000000e+00> : vector<96x32xf32>
    %206 = tpu.matmul %203, %205, %cst_177 {dimension_numbers = #tpu.dot_dimension_numbers<[1], [0], [0], [1], [0, 0, 1, 1], [], []>} : vector<96x64xbf16>, vector<64x32xbf16>, vector<96x32xf32> -> vector<96x32xf32>
    %207 = arith.addf %201, %206 : vector<96x32xf32>
    %c0_178 = arith.constant 0 : index
    %c225 = arith.constant 225 : index
    %c0_179 = arith.constant 0 : index
    %208 = vector.load %arg1[%c0_178, %c225, %c0_179] : memref<1x448x64xbf16, #tpu.memory_space<vmem>>, vector<1x96x64xbf16>
    %209 = vector.shape_cast %208 : vector<1x96x64xbf16> to vector<96x64xbf16>
    %c5_180 = arith.constant 5 : index
    %c0_181 = arith.constant 0 : index
    %c0_182 = arith.constant 0 : index
    %210 = vector.load %arg3[%c5_180, %c0_181, %c0_182] : memref<9x64x32xbf16, #tpu.memory_space<vmem>>, vector<1x64x32xbf16>
    %211 = vector.shape_cast %210 : vector<1x64x32xbf16> to vector<64x32xbf16>
    %cst_183 = arith.constant dense<0.000000e+00> : vector<96x32xf32>
    %212 = tpu.matmul %209, %211, %cst_183 {dimension_numbers = #tpu.dot_dimension_numbers<[1], [0], [0], [1], [0, 0, 1, 1], [], []>} : vector<96x64xbf16>, vector<64x32xbf16>, vector<96x32xf32> -> vector<96x32xf32>
    %213 = arith.addf %207, %212 : vector<96x32xf32>
    %c0_184 = arith.constant 0 : index
    %c247 = arith.constant 247 : index
    %c0_185 = arith.constant 0 : index
    %214 = vector.load %arg1[%c0_184, %c247, %c0_185] : memref<1x448x64xbf16, #tpu.memory_space<vmem>>, vector<1x96x64xbf16>
    %215 = vector.shape_cast %214 : vector<1x96x64xbf16> to vector<96x64xbf16>
    %c6_186 = arith.constant 6 : index
    %c0_187 = arith.constant 0 : index
    %c0_188 = arith.constant 0 : index
    %216 = vector.load %arg3[%c6_186, %c0_187, %c0_188] : memref<9x64x32xbf16, #tpu.memory_space<vmem>>, vector<1x64x32xbf16>
    %217 = vector.shape_cast %216 : vector<1x64x32xbf16> to vector<64x32xbf16>
    %cst_189 = arith.constant dense<0.000000e+00> : vector<96x32xf32>
    %218 = tpu.matmul %215, %217, %cst_189 {dimension_numbers = #tpu.dot_dimension_numbers<[1], [0], [0], [1], [0, 0, 1, 1], [], []>} : vector<96x64xbf16>, vector<64x32xbf16>, vector<96x32xf32> -> vector<96x32xf32>
    %219 = arith.addf %213, %218 : vector<96x32xf32>
    %c0_190 = arith.constant 0 : index
    %c248 = arith.constant 248 : index
    %c0_191 = arith.constant 0 : index
    %220 = vector.load %arg1[%c0_190, %c248, %c0_191] : memref<1x448x64xbf16, #tpu.memory_space<vmem>>, vector<1x96x64xbf16>
    %221 = vector.shape_cast %220 : vector<1x96x64xbf16> to vector<96x64xbf16>
    %c7_192 = arith.constant 7 : index
    %c0_193 = arith.constant 0 : index
    %c0_194 = arith.constant 0 : index
    %222 = vector.load %arg3[%c7_192, %c0_193, %c0_194] : memref<9x64x32xbf16, #tpu.memory_space<vmem>>, vector<1x64x32xbf16>
    %223 = vector.shape_cast %222 : vector<1x64x32xbf16> to vector<64x32xbf16>
    %cst_195 = arith.constant dense<0.000000e+00> : vector<96x32xf32>
    %224 = tpu.matmul %221, %223, %cst_195 {dimension_numbers = #tpu.dot_dimension_numbers<[1], [0], [0], [1], [0, 0, 1, 1], [], []>} : vector<96x64xbf16>, vector<64x32xbf16>, vector<96x32xf32> -> vector<96x32xf32>
    %225 = arith.addf %219, %224 : vector<96x32xf32>
    %c0_196 = arith.constant 0 : index
    %c249 = arith.constant 249 : index
    %c0_197 = arith.constant 0 : index
    %226 = vector.load %arg1[%c0_196, %c249, %c0_197] : memref<1x448x64xbf16, #tpu.memory_space<vmem>>, vector<1x96x64xbf16>
    %227 = vector.shape_cast %226 : vector<1x96x64xbf16> to vector<96x64xbf16>
    %c8_198 = arith.constant 8 : index
    %c0_199 = arith.constant 0 : index
    %c0_200 = arith.constant 0 : index
    %228 = vector.load %arg3[%c8_198, %c0_199, %c0_200] : memref<9x64x32xbf16, #tpu.memory_space<vmem>>, vector<1x64x32xbf16>
    %229 = vector.shape_cast %228 : vector<1x64x32xbf16> to vector<64x32xbf16>
    %cst_201 = arith.constant dense<0.000000e+00> : vector<96x32xf32>
    %230 = tpu.matmul %227, %229, %cst_201 {dimension_numbers = #tpu.dot_dimension_numbers<[1], [0], [0], [1], [0, 0, 1, 1], [], []>} : vector<96x64xbf16>, vector<64x32xbf16>, vector<96x32xf32> -> vector<96x32xf32>
    %231 = arith.addf %225, %230 : vector<96x32xf32>
    %cst_202 = arith.constant 0.000000e+00 : f32
    %232 = vector.broadcast %cst_202 : f32 to vector<96x32xf32>
    %233 = arith.maximumf %231, %232 : vector<96x32xf32>
    %234 = arith.truncf %233 : vector<96x32xf32> to vector<96x32xbf16>
    %cst_203 = arith.constant dense<0.000000e+00> : vector<96x64xf32>
    %235 = tpu.matmul %234, %0, %cst_203 {dimension_numbers = #tpu.dot_dimension_numbers<[1], [0], [0], [1], [0, 0, 1, 1], [], []>} : vector<96x32xbf16>, vector<32x64xbf16>, vector<96x64xf32> -> vector<96x64xf32>
    %c0_204 = arith.constant 0 : index
    %c128_205 = arith.constant 128 : index
    %c0_206 = arith.constant 0 : index
    %236 = vector.load %arg2[%c0_204, %c128_205, %c0_206] : memref<1x256x64xf32, #tpu.memory_space<vmem>>, vector<1x16x64xf32>
    %237 = vector.shape_cast %236 : vector<1x16x64xf32> to vector<16x64xf32>
    %238 = vector.extract_strided_slice %235 {offsets = [0, 0], sizes = [16, 64], strides = [1, 1]} : vector<96x64xf32> to vector<16x64xf32>
    %239 = arith.addf %237, %238 : vector<16x64xf32>
    %240 = arith.truncf %239 : vector<16x64xf32> to vector<16x64xbf16>
    %c0_207 = arith.constant 0 : index
    %c128_208 = arith.constant 128 : index
    %c0_209 = arith.constant 0 : index
    %241 = vector.load %arg5[%c0_207, %c128_208, %c0_209] : memref<1x256x64xbf16, #tpu.memory_space<vmem>>, vector<1x16x64xbf16>
    %242 = vector.shape_cast %241 : vector<1x16x64xbf16> to vector<16x64xbf16>
    %243 = vector.shape_cast %240 : vector<16x64xbf16> to vector<1x16x64xbf16>
    tpu.vector_store %arg5[%c0_207, %c128_208, %c0_209], %243 {strides = array<i32>} : memref<1x256x64xbf16, #tpu.memory_space<vmem>>, vector<1x16x64xbf16>,
    %c0_210 = arith.constant 0 : index
    %c144 = arith.constant 144 : index
    %c0_211 = arith.constant 0 : index
    %244 = vector.load %arg2[%c0_210, %c144, %c0_211] : memref<1x256x64xf32, #tpu.memory_space<vmem>>, vector<1x16x64xf32>
    %245 = vector.shape_cast %244 : vector<1x16x64xf32> to vector<16x64xf32>
    %246 = vector.extract_strided_slice %235 {offsets = [24, 0], sizes = [16, 64], strides = [1, 1]} : vector<96x64xf32> to vector<16x64xf32>
    %247 = arith.addf %245, %246 : vector<16x64xf32>
    %248 = arith.truncf %247 : vector<16x64xf32> to vector<16x64xbf16>
    %c0_212 = arith.constant 0 : index
    %c144_213 = arith.constant 144 : index
    %c0_214 = arith.constant 0 : index
    %249 = vector.load %arg5[%c0_212, %c144_213, %c0_214] : memref<1x256x64xbf16, #tpu.memory_space<vmem>>, vector<1x16x64xbf16>
    %250 = vector.shape_cast %249 : vector<1x16x64xbf16> to vector<16x64xbf16>
    %251 = vector.shape_cast %248 : vector<16x64xbf16> to vector<1x16x64xbf16>
    tpu.vector_store %arg5[%c0_212, %c144_213, %c0_214], %251 {strides = array<i32>} : memref<1x256x64xbf16, #tpu.memory_space<vmem>>, vector<1x16x64xbf16>,
    %c0_215 = arith.constant 0 : index
    %c160 = arith.constant 160 : index
    %c0_216 = arith.constant 0 : index
    %252 = vector.load %arg2[%c0_215, %c160, %c0_216] : memref<1x256x64xf32, #tpu.memory_space<vmem>>, vector<1x16x64xf32>
    %253 = vector.shape_cast %252 : vector<1x16x64xf32> to vector<16x64xf32>
    %254 = vector.extract_strided_slice %235 {offsets = [48, 0], sizes = [16, 64], strides = [1, 1]} : vector<96x64xf32> to vector<16x64xf32>
    %255 = arith.addf %253, %254 : vector<16x64xf32>
    %256 = arith.truncf %255 : vector<16x64xf32> to vector<16x64xbf16>
    %c0_217 = arith.constant 0 : index
    %c160_218 = arith.constant 160 : index
    %c0_219 = arith.constant 0 : index
    %257 = vector.load %arg5[%c0_217, %c160_218, %c0_219] : memref<1x256x64xbf16, #tpu.memory_space<vmem>>, vector<1x16x64xbf16>
    %258 = vector.shape_cast %257 : vector<1x16x64xbf16> to vector<16x64xbf16>
    %259 = vector.shape_cast %256 : vector<16x64xbf16> to vector<1x16x64xbf16>
    tpu.vector_store %arg5[%c0_217, %c160_218, %c0_219], %259 {strides = array<i32>} : memref<1x256x64xbf16, #tpu.memory_space<vmem>>, vector<1x16x64xbf16>,
    %c0_220 = arith.constant 0 : index
    %c176 = arith.constant 176 : index
    %c0_221 = arith.constant 0 : index
    %260 = vector.load %arg2[%c0_220, %c176, %c0_221] : memref<1x256x64xf32, #tpu.memory_space<vmem>>, vector<1x16x64xf32>
    %261 = vector.shape_cast %260 : vector<1x16x64xf32> to vector<16x64xf32>
    %262 = vector.extract_strided_slice %235 {offsets = [72, 0], sizes = [16, 64], strides = [1, 1]} : vector<96x64xf32> to vector<16x64xf32>
    %263 = arith.addf %261, %262 : vector<16x64xf32>
    %264 = arith.truncf %263 : vector<16x64xf32> to vector<16x64xbf16>
    %c0_222 = arith.constant 0 : index
    %c176_223 = arith.constant 176 : index
    %c0_224 = arith.constant 0 : index
    %265 = vector.load %arg5[%c0_222, %c176_223, %c0_224] : memref<1x256x64xbf16, #tpu.memory_space<vmem>>, vector<1x16x64xbf16>
    %266 = vector.shape_cast %265 : vector<1x16x64xbf16> to vector<16x64xbf16>
    %267 = vector.shape_cast %264 : vector<16x64xbf16> to vector<1x16x64xbf16>
    tpu.vector_store %arg5[%c0_222, %c176_223, %c0_224], %267 {strides = array<i32>} : memref<1x256x64xbf16, #tpu.memory_space<vmem>>, vector<1x16x64xbf16>,
    %c0_225 = arith.constant 0 : index
    %c295 = arith.constant 295 : index
    %c0_226 = arith.constant 0 : index
    %268 = vector.load %arg1[%c0_225, %c295, %c0_226] : memref<1x448x64xbf16, #tpu.memory_space<vmem>>, vector<1x96x64xbf16>
    %269 = vector.shape_cast %268 : vector<1x96x64xbf16> to vector<96x64xbf16>
    %c0_227 = arith.constant 0 : index
    %c0_228 = arith.constant 0 : index
    %c0_229 = arith.constant 0 : index
    %270 = vector.load %arg3[%c0_227, %c0_228, %c0_229] : memref<9x64x32xbf16, #tpu.memory_space<vmem>>, vector<1x64x32xbf16>
    %271 = vector.shape_cast %270 : vector<1x64x32xbf16> to vector<64x32xbf16>
    %cst_230 = arith.constant dense<0.000000e+00> : vector<96x32xf32>
    %272 = tpu.matmul %269, %271, %cst_230 {dimension_numbers = #tpu.dot_dimension_numbers<[1], [0], [0], [1], [0, 0, 1, 1], [], []>} : vector<96x64xbf16>, vector<64x32xbf16>, vector<96x32xf32> -> vector<96x32xf32>
    %c0_231 = arith.constant 0 : index
    %c296 = arith.constant 296 : index
    %c0_232 = arith.constant 0 : index
    %273 = vector.load %arg1[%c0_231, %c296, %c0_232] : memref<1x448x64xbf16, #tpu.memory_space<vmem>>, vector<1x96x64xbf16>
    %274 = vector.shape_cast %273 : vector<1x96x64xbf16> to vector<96x64xbf16>
    %c1_233 = arith.constant 1 : index
    %c0_234 = arith.constant 0 : index
    %c0_235 = arith.constant 0 : index
    %275 = vector.load %arg3[%c1_233, %c0_234, %c0_235] : memref<9x64x32xbf16, #tpu.memory_space<vmem>>, vector<1x64x32xbf16>
    %276 = vector.shape_cast %275 : vector<1x64x32xbf16> to vector<64x32xbf16>
    %cst_236 = arith.constant dense<0.000000e+00> : vector<96x32xf32>
    %277 = tpu.matmul %274, %276, %cst_236 {dimension_numbers = #tpu.dot_dimension_numbers<[1], [0], [0], [1], [0, 0, 1, 1], [], []>} : vector<96x64xbf16>, vector<64x32xbf16>, vector<96x32xf32> -> vector<96x32xf32>
    %278 = arith.addf %272, %277 : vector<96x32xf32>
    %c0_237 = arith.constant 0 : index
    %c297 = arith.constant 297 : index
    %c0_238 = arith.constant 0 : index
    %279 = vector.load %arg1[%c0_237, %c297, %c0_238] : memref<1x448x64xbf16, #tpu.memory_space<vmem>>, vector<1x96x64xbf16>
    %280 = vector.shape_cast %279 : vector<1x96x64xbf16> to vector<96x64xbf16>
    %c2_239 = arith.constant 2 : index
    %c0_240 = arith.constant 0 : index
    %c0_241 = arith.constant 0 : index
    %281 = vector.load %arg3[%c2_239, %c0_240, %c0_241] : memref<9x64x32xbf16, #tpu.memory_space<vmem>>, vector<1x64x32xbf16>
    %282 = vector.shape_cast %281 : vector<1x64x32xbf16> to vector<64x32xbf16>
    %cst_242 = arith.constant dense<0.000000e+00> : vector<96x32xf32>
    %283 = tpu.matmul %280, %282, %cst_242 {dimension_numbers = #tpu.dot_dimension_numbers<[1], [0], [0], [1], [0, 0, 1, 1], [], []>} : vector<96x64xbf16>, vector<64x32xbf16>, vector<96x32xf32> -> vector<96x32xf32>
    %284 = arith.addf %278, %283 : vector<96x32xf32>
    %c0_243 = arith.constant 0 : index
    %c319 = arith.constant 319 : index
    %c0_244 = arith.constant 0 : index
    %285 = vector.load %arg1[%c0_243, %c319, %c0_244] : memref<1x448x64xbf16, #tpu.memory_space<vmem>>, vector<1x96x64xbf16>
    %286 = vector.shape_cast %285 : vector<1x96x64xbf16> to vector<96x64xbf16>
    %c3_245 = arith.constant 3 : index
    %c0_246 = arith.constant 0 : index
    %c0_247 = arith.constant 0 : index
    %287 = vector.load %arg3[%c3_245, %c0_246, %c0_247] : memref<9x64x32xbf16, #tpu.memory_space<vmem>>, vector<1x64x32xbf16>
    %288 = vector.shape_cast %287 : vector<1x64x32xbf16> to vector<64x32xbf16>
    %cst_248 = arith.constant dense<0.000000e+00> : vector<96x32xf32>
    %289 = tpu.matmul %286, %288, %cst_248 {dimension_numbers = #tpu.dot_dimension_numbers<[1], [0], [0], [1], [0, 0, 1, 1], [], []>} : vector<96x64xbf16>, vector<64x32xbf16>, vector<96x32xf32> -> vector<96x32xf32>
    %290 = arith.addf %284, %289 : vector<96x32xf32>
    %c0_249 = arith.constant 0 : index
    %c320 = arith.constant 320 : index
    %c0_250 = arith.constant 0 : index
    %291 = vector.load %arg1[%c0_249, %c320, %c0_250] : memref<1x448x64xbf16, #tpu.memory_space<vmem>>, vector<1x96x64xbf16>
    %292 = vector.shape_cast %291 : vector<1x96x64xbf16> to vector<96x64xbf16>
    %c4_251 = arith.constant 4 : index
    %c0_252 = arith.constant 0 : index
    %c0_253 = arith.constant 0 : index
    %293 = vector.load %arg3[%c4_251, %c0_252, %c0_253] : memref<9x64x32xbf16, #tpu.memory_space<vmem>>, vector<1x64x32xbf16>
    %294 = vector.shape_cast %293 : vector<1x64x32xbf16> to vector<64x32xbf16>
    %cst_254 = arith.constant dense<0.000000e+00> : vector<96x32xf32>
    %295 = tpu.matmul %292, %294, %cst_254 {dimension_numbers = #tpu.dot_dimension_numbers<[1], [0], [0], [1], [0, 0, 1, 1], [], []>} : vector<96x64xbf16>, vector<64x32xbf16>, vector<96x32xf32> -> vector<96x32xf32>
    %296 = arith.addf %290, %295 : vector<96x32xf32>
    %c0_255 = arith.constant 0 : index
    %c321 = arith.constant 321 : index
    %c0_256 = arith.constant 0 : index
    %297 = vector.load %arg1[%c0_255, %c321, %c0_256] : memref<1x448x64xbf16, #tpu.memory_space<vmem>>, vector<1x96x64xbf16>
    %298 = vector.shape_cast %297 : vector<1x96x64xbf16> to vector<96x64xbf16>
    %c5_257 = arith.constant 5 : index
    %c0_258 = arith.constant 0 : index
    %c0_259 = arith.constant 0 : index
    %299 = vector.load %arg3[%c5_257, %c0_258, %c0_259] : memref<9x64x32xbf16, #tpu.memory_space<vmem>>, vector<1x64x32xbf16>
    %300 = vector.shape_cast %299 : vector<1x64x32xbf16> to vector<64x32xbf16>
    %cst_260 = arith.constant dense<0.000000e+00> : vector<96x32xf32>
    %301 = tpu.matmul %298, %300, %cst_260 {dimension_numbers = #tpu.dot_dimension_numbers<[1], [0], [0], [1], [0, 0, 1, 1], [], []>} : vector<96x64xbf16>, vector<64x32xbf16>, vector<96x32xf32> -> vector<96x32xf32>
    %302 = arith.addf %296, %301 : vector<96x32xf32>
    %c0_261 = arith.constant 0 : index
    %c343 = arith.constant 343 : index
    %c0_262 = arith.constant 0 : index
    %303 = vector.load %arg1[%c0_261, %c343, %c0_262] : memref<1x448x64xbf16, #tpu.memory_space<vmem>>, vector<1x96x64xbf16>
    %304 = vector.shape_cast %303 : vector<1x96x64xbf16> to vector<96x64xbf16>
    %c6_263 = arith.constant 6 : index
    %c0_264 = arith.constant 0 : index
    %c0_265 = arith.constant 0 : index
    %305 = vector.load %arg3[%c6_263, %c0_264, %c0_265] : memref<9x64x32xbf16, #tpu.memory_space<vmem>>, vector<1x64x32xbf16>
    %306 = vector.shape_cast %305 : vector<1x64x32xbf16> to vector<64x32xbf16>
    %cst_266 = arith.constant dense<0.000000e+00> : vector<96x32xf32>
    %307 = tpu.matmul %304, %306, %cst_266 {dimension_numbers = #tpu.dot_dimension_numbers<[1], [0], [0], [1], [0, 0, 1, 1], [], []>} : vector<96x64xbf16>, vector<64x32xbf16>, vector<96x32xf32> -> vector<96x32xf32>
    %308 = arith.addf %302, %307 : vector<96x32xf32>
    %c0_267 = arith.constant 0 : index
    %c344 = arith.constant 344 : index
    %c0_268 = arith.constant 0 : index
    %309 = vector.load %arg1[%c0_267, %c344, %c0_268] : memref<1x448x64xbf16, #tpu.memory_space<vmem>>, vector<1x96x64xbf16>
    %310 = vector.shape_cast %309 : vector<1x96x64xbf16> to vector<96x64xbf16>
    %c7_269 = arith.constant 7 : index
    %c0_270 = arith.constant 0 : index
    %c0_271 = arith.constant 0 : index
    %311 = vector.load %arg3[%c7_269, %c0_270, %c0_271] : memref<9x64x32xbf16, #tpu.memory_space<vmem>>, vector<1x64x32xbf16>
    %312 = vector.shape_cast %311 : vector<1x64x32xbf16> to vector<64x32xbf16>
    %cst_272 = arith.constant dense<0.000000e+00> : vector<96x32xf32>
    %313 = tpu.matmul %310, %312, %cst_272 {dimension_numbers = #tpu.dot_dimension_numbers<[1], [0], [0], [1], [0, 0, 1, 1], [], []>} : vector<96x64xbf16>, vector<64x32xbf16>, vector<96x32xf32> -> vector<96x32xf32>
    %314 = arith.addf %308, %313 : vector<96x32xf32>
    %c0_273 = arith.constant 0 : index
    %c345 = arith.constant 345 : index
    %c0_274 = arith.constant 0 : index
    %315 = vector.load %arg1[%c0_273, %c345, %c0_274] : memref<1x448x64xbf16, #tpu.memory_space<vmem>>, vector<1x96x64xbf16>
    %316 = vector.shape_cast %315 : vector<1x96x64xbf16> to vector<96x64xbf16>
    %c8_275 = arith.constant 8 : index
    %c0_276 = arith.constant 0 : index
    %c0_277 = arith.constant 0 : index
    %317 = vector.load %arg3[%c8_275, %c0_276, %c0_277] : memref<9x64x32xbf16, #tpu.memory_space<vmem>>, vector<1x64x32xbf16>
    %318 = vector.shape_cast %317 : vector<1x64x32xbf16> to vector<64x32xbf16>
    %cst_278 = arith.constant dense<0.000000e+00> : vector<96x32xf32>
    %319 = tpu.matmul %316, %318, %cst_278 {dimension_numbers = #tpu.dot_dimension_numbers<[1], [0], [0], [1], [0, 0, 1, 1], [], []>} : vector<96x64xbf16>, vector<64x32xbf16>, vector<96x32xf32> -> vector<96x32xf32>
    %320 = arith.addf %314, %319 : vector<96x32xf32>
    %cst_279 = arith.constant 0.000000e+00 : f32
    %321 = vector.broadcast %cst_279 : f32 to vector<96x32xf32>
    %322 = arith.maximumf %320, %321 : vector<96x32xf32>
    %323 = arith.truncf %322 : vector<96x32xf32> to vector<96x32xbf16>
    %cst_280 = arith.constant dense<0.000000e+00> : vector<96x64xf32>
    %324 = tpu.matmul %323, %0, %cst_280 {dimension_numbers = #tpu.dot_dimension_numbers<[1], [0], [0], [1], [0, 0, 1, 1], [], []>} : vector<96x32xbf16>, vector<32x64xbf16>, vector<96x64xf32> -> vector<96x64xf32>
    %c0_281 = arith.constant 0 : index
    %c192 = arith.constant 192 : index
    %c0_282 = arith.constant 0 : index
    %325 = vector.load %arg2[%c0_281, %c192, %c0_282] : memref<1x256x64xf32, #tpu.memory_space<vmem>>, vector<1x16x64xf32>
    %326 = vector.shape_cast %325 : vector<1x16x64xf32> to vector<16x64xf32>
    %327 = vector.extract_strided_slice %324 {offsets = [0, 0], sizes = [16, 64], strides = [1, 1]} : vector<96x64xf32> to vector<16x64xf32>
    %328 = arith.addf %326, %327 : vector<16x64xf32>
    %329 = arith.truncf %328 : vector<16x64xf32> to vector<16x64xbf16>
    %c0_283 = arith.constant 0 : index
    %c192_284 = arith.constant 192 : index
    %c0_285 = arith.constant 0 : index
    %330 = vector.load %arg5[%c0_283, %c192_284, %c0_285] : memref<1x256x64xbf16, #tpu.memory_space<vmem>>, vector<1x16x64xbf16>
    %331 = vector.shape_cast %330 : vector<1x16x64xbf16> to vector<16x64xbf16>
    %332 = vector.shape_cast %329 : vector<16x64xbf16> to vector<1x16x64xbf16>
    tpu.vector_store %arg5[%c0_283, %c192_284, %c0_285], %332 {strides = array<i32>} : memref<1x256x64xbf16, #tpu.memory_space<vmem>>, vector<1x16x64xbf16>,
    %c0_286 = arith.constant 0 : index
    %c208 = arith.constant 208 : index
    %c0_287 = arith.constant 0 : index
    %333 = vector.load %arg2[%c0_286, %c208, %c0_287] : memref<1x256x64xf32, #tpu.memory_space<vmem>>, vector<1x16x64xf32>
    %334 = vector.shape_cast %333 : vector<1x16x64xf32> to vector<16x64xf32>
    %335 = vector.extract_strided_slice %324 {offsets = [24, 0], sizes = [16, 64], strides = [1, 1]} : vector<96x64xf32> to vector<16x64xf32>
    %336 = arith.addf %334, %335 : vector<16x64xf32>
    %337 = arith.truncf %336 : vector<16x64xf32> to vector<16x64xbf16>
    %c0_288 = arith.constant 0 : index
    %c208_289 = arith.constant 208 : index
    %c0_290 = arith.constant 0 : index
    %338 = vector.load %arg5[%c0_288, %c208_289, %c0_290] : memref<1x256x64xbf16, #tpu.memory_space<vmem>>, vector<1x16x64xbf16>
    %339 = vector.shape_cast %338 : vector<1x16x64xbf16> to vector<16x64xbf16>
    %340 = vector.shape_cast %337 : vector<16x64xbf16> to vector<1x16x64xbf16>
    tpu.vector_store %arg5[%c0_288, %c208_289, %c0_290], %340 {strides = array<i32>} : memref<1x256x64xbf16, #tpu.memory_space<vmem>>, vector<1x16x64xbf16>,
    %c0_291 = arith.constant 0 : index
    %c224_292 = arith.constant 224 : index
    %c0_293 = arith.constant 0 : index
    %341 = vector.load %arg2[%c0_291, %c224_292, %c0_293] : memref<1x256x64xf32, #tpu.memory_space<vmem>>, vector<1x16x64xf32>
    %342 = vector.shape_cast %341 : vector<1x16x64xf32> to vector<16x64xf32>
    %343 = vector.extract_strided_slice %324 {offsets = [48, 0], sizes = [16, 64], strides = [1, 1]} : vector<96x64xf32> to vector<16x64xf32>
    %344 = arith.addf %342, %343 : vector<16x64xf32>
    %345 = arith.truncf %344 : vector<16x64xf32> to vector<16x64xbf16>
    %c0_294 = arith.constant 0 : index
    %c224_295 = arith.constant 224 : index
    %c0_296 = arith.constant 0 : index
    %346 = vector.load %arg5[%c0_294, %c224_295, %c0_296] : memref<1x256x64xbf16, #tpu.memory_space<vmem>>, vector<1x16x64xbf16>
    %347 = vector.shape_cast %346 : vector<1x16x64xbf16> to vector<16x64xbf16>
    %348 = vector.shape_cast %345 : vector<16x64xbf16> to vector<1x16x64xbf16>
    tpu.vector_store %arg5[%c0_294, %c224_295, %c0_296], %348 {strides = array<i32>} : memref<1x256x64xbf16, #tpu.memory_space<vmem>>, vector<1x16x64xbf16>,
    %c0_297 = arith.constant 0 : index
    %c240 = arith.constant 240 : index
    %c0_298 = arith.constant 0 : index
    %349 = vector.load %arg2[%c0_297, %c240, %c0_298] : memref<1x256x64xf32, #tpu.memory_space<vmem>>, vector<1x16x64xf32>
    %350 = vector.shape_cast %349 : vector<1x16x64xf32> to vector<16x64xf32>
    %351 = vector.extract_strided_slice %324 {offsets = [72, 0], sizes = [16, 64], strides = [1, 1]} : vector<96x64xf32> to vector<16x64xf32>
    %352 = arith.addf %350, %351 : vector<16x64xf32>
    %353 = arith.truncf %352 : vector<16x64xf32> to vector<16x64xbf16>
    %c0_299 = arith.constant 0 : index
    %c240_300 = arith.constant 240 : index
    %c0_301 = arith.constant 0 : index
    %354 = vector.load %arg5[%c0_299, %c240_300, %c0_301] : memref<1x256x64xbf16, #tpu.memory_space<vmem>>, vector<1x16x64xbf16>
    %355 = vector.shape_cast %354 : vector<1x16x64xbf16> to vector<16x64xbf16>
    %356 = vector.shape_cast %353 : vector<16x64xbf16> to vector<1x16x64xbf16>
    tpu.vector_store %arg5[%c0_299, %c240_300, %c0_301], %356 {strides = array<i32>} : memref<1x256x64xbf16, #tpu.memory_space<vmem>>, vector<1x16x64xbf16>,
    return
  }
  func.func @transform_0(%arg0: i32) -> (i32, i32, i32) {
    %c0_i32 = arith.constant 0 : i32
    %c0_i32_0 = arith.constant 0 : i32
    %c0_i32_1 = arith.constant 0 : i32
    return %arg0, %c0_i32, %c0_i32_0 : i32, i32, i32
  }
  func.func @transform_1(%arg0: i32) -> (i32, i32, i32) {
    %c0_i32 = arith.constant 0 : i32
    %c0_i32_0 = arith.constant 0 : i32
    %c0_i32_1 = arith.constant 0 : i32
    return %arg0, %c0_i32, %c0_i32_0 : i32, i32, i32
  }
  func.func @transform_2(%arg0: i32) -> (i32, i32, i32) {
    %c0_i32 = arith.constant 0 : i32
    %c0_i32_0 = arith.constant 0 : i32
    %c0_i32_1 = arith.constant 0 : i32
    %c0_i32_2 = arith.constant 0 : i32
    return %c0_i32, %c0_i32_0, %c0_i32_1 : i32, i32, i32
  }
  func.func @transform_3(%arg0: i32) -> (i32, i32) {
    %c0_i32 = arith.constant 0 : i32
    %c0_i32_0 = arith.constant 0 : i32
    %c0_i32_1 = arith.constant 0 : i32
    return %c0_i32, %c0_i32_0 : i32, i32
  }
  func.func @transform_4(%arg0: i32) -> (i32, i32, i32) {
    %c0_i32 = arith.constant 0 : i32
    %c0_i32_0 = arith.constant 0 : i32
    %c0_i32_1 = arith.constant 0 : i32
    return %arg0, %c0_i32, %c0_i32_0 : i32, i32, i32
  }
}

</mosaic_0001>

<bundles_post_ra>
// kernel: tpu_custom_call.1
= control target key start
LH: loop header
LB: loop body
LE: loop exit
PB: predicated region body
PF: predicated region fallthrough
CT: control target
= control target key end

     0   :  { %s11160_s15 = smov 0   ;;  %s13921_s0 = inlined_call_operand.vmem [shape: bf16[2,448,64], index: 0, kind: input, shape index: {}]   ;;  %s13922_s1 = inlined_call_operand.vmem [shape: f32[2,256,64], index: 1, kind: input, shape index: {}]   ;;  %s13923_s2 = inlined_call_operand.vmem [shape: bf16[9,64,32], index: 2, kind: input, shape index: {}]   ;;  %s13924_s3 = inlined_call_operand.vmem [shape: bf16[32,64], index: 3, kind: input, shape index: {}]   ;;  %s13925_s4 = inlined_call_operand.vmem [shape: bf16[2,256,64], index: 4, kind: output, shape index: {}]  }
   0x1 LB: > { %s8587_s16 = sadd.s32 4294967295, %s11133_s15   ;;  %p8591_p0 = scmp.ge.s32.totalorder %s11133_s15, 1  ;;  %s11133_s15 = sphi %s11160_s15, %s14_s15  }
   0x2   : > { %p172_p1 = scmp.lt.s32.totalorder %s11133_s15, 3 }
   0x4   : > { %p173_p2 = pnand %p8591_p0, %p172_p1 }
   0x6   : > { %176 = sbr.rel (%p173_p2) target bundleno = 1462 (0x5b6), region = 36 }
   0xb   : > { %v10732_v0 = vld [vmem:[%s13923_s2 + $0x38] sm:$0xff]   ;;  %p203_p3 = scmp.lt.s32.totalorder %s8587_s16, 1  ;;  %v10734_v2 = vld [vmem:[%s13923_s2 + $0x30] sm:$0xff]   ;;  %v10736_v4 = vld [vmem:[%s13923_s2 + $0x28] sm:$0xff]   ;;  %vm307_vm0 = vcmask 523264   ;;  %vm2163_vm3 = vcmask 261120  }
   0xc   : > { %v10733_v1 = vld [vmem:[%s13923_s2 + $0x18] sm:$0xff]   ;;  %9939 = vmatprep.subr.bf16.mxu0 %v10732_v0  ;;  %v10735_v3 = vld [vmem:[%s13923_s2 + $0x10] sm:$0xff]   ;;  %v10737_v5 = vld [vmem:[%s13923_s2 + $0x8] sm:$0xff]   ;;  %vm416_vm1 = vsmask.f32 4352  ;;  %vm2271_vm4 = vcmask 519168  }
   0xd   : > { %s14282_s16 = smov (!%p203_p3, %s8587_s16), 1  ;;  %9959 = vmatprep.subr.bf16.mxu1 %v10733_v1  ;;  %9940 = vmatpush3.bf16.msra.mxu0 %v10732_v0  ;;  %v10738_v6 = vld [vmem:[%s13923_s2 + $0x20] sm:$0xff]   ;;  %v10745_v20 = vld [vmem:[%s13923_s2 + $0x58] sm:$0xff]   ;;  %v10746_v34 = vld [vmem:[%s13923_s2 + $0x50] sm:$0xff]   ;;  %vm657_vm2 = vsmask.f32 7424 }
   0xe   : > { %9960 = vmatpush3.bf16.msra.mxu1 %v10733_v1  ;;  %9941 = vmatprep.subr.bf16.mxu0 %v10734_v2  ;;  %s10723_s27 = smul.u32 224, %s14282_s16  ;;  %v10739_v7 = vld [vmem:[%s13923_s2] sm:$0xff]   ;;  %v10751_v42 = vld [vmem:[%s13923_s2 + $0x78] sm:$0xff]   ;;  %v10753_v46 = vld [vmem:[%s13923_s2 + $0x70] sm:$0xff]   ;;  %s9514_s10 = sshll.u32 %s14282_s16, 7 }
   0xf   : > { %9961 = vmatprep.subr.bf16.mxu1 %v10735_v3  ;;  %v10752_v51 = vld [vmem:[%s13923_s2 + $0x48] sm:$0xff]   ;;  %s12389_s12 = scalar_lea.vmem %s13925_s4, %s9514_s10 }
  0x10   : > { %s11195_s8 = scalar_lea.vmem %s13921_s0, %s10723_s27  ;;  %s9513_s27 = sshll.u32 %s14282_s16, 8 }
  0x11   : > { %9942 = vmatpush3.bf16.msra.mxu0 %v10734_v2  ;;  %v223_v8 = vld [vmem:[%s11195_s8] sm:$0x8]  ;;  %v224_v9 = vld [vmem:[%s11195_s8 + $0x4] sm:$0xf]  ;;  %v225_v10 = vld [vmem:[%s11195_s8 + $0x8] sm:$0xf]  ;;  %s12359_s6 = scalar_lea.vmem %s13922_s1, %s9513_s27 }
  0x12   : > { %9962 = vmatpush3.bf16.msra.mxu1 %v10735_v3  ;;  %9943 = vmatprep.subr.bf16.mxu0 %v10736_v4  ;;  %v226_v11 = vld [vmem:[%s11195_s8 + $0xc] sm:$0xf]  ;;  %v227_v12 = vld [vmem:[%s11195_s8 + $0x10] sm:$0xf]  ;;  %v11206_v13 = vld [vmem:[%s11195_s8 + $0x14] sm:$0xf]  ;;  %v8605_v14 = vcombine.low %v224_v9, %v225_v10  ;;  %v8621_v15 = vcombine.low %v223_v8, %v224_v9 }
  0x13   : > { %9963 = vmatprep.subr.bf16.mxu1 %v10737_v5  ;;  %v8622_v16 = vcombine.low %v225_v10, %v226_v11  ;;  %v8623_v17 = vcombine.low %v227_v12, %v11206_v13  ;;  %v8606_v25 = vcombine.low %v226_v11, %v227_v12  ;;  %v229_v28 = vld [vmem:[%s11195_s8 + $0x18] sm:$0xf]  ;;  %v11215_v29 = vld [vmem:[%s11195_s8 + $0x1c] sm:$0xf]  ;;  %v231_v35 = vld [vmem:[%s11195_s8 + $0x20] sm:$0xf] }
  0x14   : > { %9947 = vmatprep.mubr.msk.bf16.mxu0 %vm307_vm0, %v8605_v14  ;;  %v418_v18 = vshrl.u32 %v8621_v15, 16  ;;  %v421_v19 = vshll.u32 %v8621_v15, 16  ;;  %v8624_v37 = vcombine.low %v229_v28, %v11215_v29  ;;  %v11223_v38 = vld [vmem:[%s11195_s8 + $0x24] sm:$0xf]  ;;  %v8607_v43 = vcombine.low %v11206_v13, %v229_v28  ;;  %v233_v52 = vld [vmem:[%s11195_s8 + $0x28] sm:$0xf] }
  0x15   : > { %9944 = vmatpush3.bf16.msra.mxu0 %v10736_v4  ;;  %v426_v21 = vshrl.u32 %v8622_v16, 16  ;;  %v429_v22 = vshll.u32 %v8622_v16, 16  ;;  %v435_v23 = vshrl.u32 %v8623_v17, 16  ;;  %v438_v24 = vshll.u32 %v8623_v17, 16  ;;  %v11242_v55 = vld [vmem:[%s11195_s8 + $0x2c] sm:$0xf] }
  0x16   : > { %9964 = vmatpush3.bf16.msra.mxu1 %v10737_v5  ;;  %9945 = vmatprep.subr.bf16.mxu0 %v10738_v6  ;;  %v420_v26 = vrot.slane %v418_v18, 3  ;;  %v423_v27 = vrot.slane %v421_v19, 4  ;;  %v8625_v41 = vcombine.low %v231_v35, %v11223_v38  ;;  %v444_v44 = vshrl.u32 %v8624_v37, 16  ;;  %v11245_v56 = vld [vmem:[%s11195_s8 + $0x30] sm:$0xf]  ;;  %v10758_v2 = vld [vmem:[%s13923_s2 + $0x40] sm:$0xff]  }
  0x17   : > { %9965 = vmatprep.subr.bf16.mxu1 %v10739_v7  ;;  %v428_v30 = vrot.slane %v426_v21, 3  ;;  %v431_v31 = vrot.slane %v429_v22, 4  ;;  %v437_v32 = vrot.slane %v435_v23, 3  ;;  %v440_v33 = vrot.slane %v438_v24, 4  ;;  %v10759_v3 = vld [vmem:[%s13923_s2 + $0x68] sm:$0xff]   ;;  %v10760_v10 = vld [vmem:[%s13923_s2 + $0x60] sm:$0xff]  }
  0x18   : > { %v424_v36 = vor.u32 %v423_v27, %v420_v26  ;;  %v447_v45 = vshll.u32 %v8624_v37, 16  ;;  %v453_v49 = vshrl.u32 %v8625_v41, 16  ;;  %v456_v50 = vshll.u32 %v8625_v41, 16  ;;  %v10761_v14 = vld [vmem:[%s11195_s8 + $0x4] sm:$0xff]   ;;  %v10762_v15 = vld [vmem:[%s11195_s8 + $0xc] sm:$0xff]   ;;  %v11276_v23 = vld [vmem:[%s13923_s2 + $0x98] sm:$0xff]  }
  0x19   : > { %9946 = vmatpush3.bf16.msra.mxu0 %v10738_v6  ;;  %v432_v39 = vor.u32 %v431_v31, %v428_v30  ;;  %v441_v40 = vor.u32 %v440_v33, %v437_v32  ;;  %v446_v53 = vrot.slane %v444_v44, 3  ;;  %v8626_v59 = vcombine.low %v233_v52, %v11242_v55  ;;  %v845_v24 = vld [vmem:[%s11195_s8 + $0xc] sm:$0x8]  ;;  %v11286_v31 = vld [vmem:[%s11195_s8 + $0x14] sm:$0xf] }
  0x1a   : > { %9966 = vmatpush3.bf16.msra.mxu1 %v10739_v7  ;;  %9979 = vmatprep.subr.bf16.mxu0 %v10745_v20  ;;  %v449_v54 = vrot.slane %v447_v45, 4  ;;  %v455_v57 = vrot.slane %v453_v49, 3  ;;  %v458_v58 = vrot.slane %v456_v50, 4  ;;  %v8627_v61 = vcombine.low %v11245_v56, %v11245_v56  ;;  %v11289_v32 = vld [vmem:[%s11195_s8 + $0x18] sm:$0xf] }
  0x1b   : > { %v433_v47 = vsel %vm416_vm1, %v424_v36, %v432_v39  ;;  %v442_v48 = vsel %vm416_vm1, %v432_v39, %v441_v40  ;;  %9999 = vmatprep.subr.bf16.mxu1 %v10751_v42  ;;  %v8608_v62 = vcombine.low %v11215_v29, %v231_v35  ;;  %v462_v0 = vshrl.u32 %v8626_v59, 16  ;;  %v11281_v29 = vld [vmem:[%s11195_s8 + $0x10] sm:$0xf]  ;;  %v11292_v33 = vld [vmem:[%s11195_s8 + $0x1c] sm:$0xf] }
  0x1c   : > { %9948 = vmatmul.mubr.msk.bf16.vlgmr.msra.gmra.mxu0 %vm307_vm0, %v8606_v25  ;;  %9967 = vmatprep.mubr.msk.bf16.mxu1 %vm307_vm0, %v433_v47  ;;  %v450_v60 = vor.u32 %v449_v54, %v446_v53  ;;  %v459_v63 = vor.u32 %v458_v58, %v455_v57  ;;  %v465_v1 = vshll.u32 %v8626_v59, 16  ;;  %v8609_v5 = vcombine.low %v11223_v38, %v233_v52  ;;  %v11296_v37 = vld [vmem:[%s11195_s8 + $0x20] sm:$0xf]  ;;  %v10774_v57 = vld [vmem:[%s13923_s2 + $0xb8] sm:$0xff]  }
  0x1d   : > { %9980 = vmatpush3.bf16.msra.mxu0 %v10745_v20  ;;  %9968 = vmatmul.mubr.msk.bf16.vlgmr.msra.gmra.mxu1 %vm307_vm0, %v442_v48  ;;  %v471_v6 = vshrl.u32 %v8627_v61, 16  ;;  %v474_v7 = vshll.u32 %v8627_v61, 16  ;;  %v464_v8 = vrot.slane %v462_v0, 3  ;;  %v659_v17 = vshrl.u32 %v10761_v14, 16  ;;  %v10763_v20 = vld [vmem:[%s11195_s8 + $0x14] sm:$0xff]   ;;  %v10770_v39 = vld [vmem:[%s11195_s8 + $0x1c] sm:$0xff]  }
  0x1e   : > { %9981 = vmatprep.subr.bf16.mxu0 %v10746_v34  ;;  %9951 = vmatprep.mubr.msk.bf16.mxu0 %vm307_vm0, %v8607_v43  ;;  %v451_v4 = vsel %vm416_vm1, %v441_v40, %v450_v60  ;;  %v467_v9 = vrot.slane %v465_v1, 4  ;;  %v460_v11 = vsel %vm416_vm1, %v450_v60, %v459_v63  ;;  %v661_v18 = vshll.u32 %v10761_v14, 16  ;;  %v11314_v61 = vld [vmem:[%s11195_s8 + $0x24] sm:$0xf] }
  0x1f   : > { %10000 = vmatpush3.bf16.msra.mxu1 %v10751_v42  ;;  %9971 = vmatprep.mubr.msk.bf16.mxu1 %vm307_vm0, %v451_v4  ;;  %v473_v12 = vrot.slane %v471_v6, 3  ;;  %v476_v13 = vrot.slane %v474_v7, 4  ;;  %v666_v19 = vshll.u32 %v10762_v15, 16  ;;  %v670_v27 = vshrl.u32 %v10762_v15, 16  ;;  %v11328_v7 = vld [vmem:[%s11195_s8 + $0x30] sm:$0xf] }
  0x20   : > { %10001 = vmatprep.subr.bf16.mxu1 %v10753_v46  ;;  %v468_v16 = vor.u32 %v467_v9, %v464_v8  ;;  %v663_v25 = vrot.slane %v661_v18, 1  ;;  %v674_v28 = vshll.u32 %v10763_v20, 16  ;;  %v8610_v30 = vcombine.low %v11242_v55, %v11245_v56  ;;  %v10771_v56 = vld [vmem:[%s11195_s8 + $0x24] sm:$0xff]   ;;  %v10777_v18 = vld [vmem:[%s11195_s8 + $0x2c] sm:$0xff]  }
  0x21   : > { %9982 = vmatpush3.bf16.msra.mxu0 %v10746_v34  ;;  %v477_v22 = vor.u32 %v476_v13, %v473_v12  ;;  %v668_v26 = vrot.slane %v666_v19, 1  ;;  %v8671_v34 = vcombine.low %v845_v24, %v11281_v29  ;;  %v8672_v38 = vcombine.low %v11286_v31, %v11289_v32 }
  0x22   : > { %9983 = vmatprep.subr.bf16.mxu0 %v10752_v51  ;;  %v469_v21 = vsel %vm416_vm1, %v459_v63, %v468_v16  ;;  %v664_v35 = vor.u32 %v663_v25, %v659_v17  ;;  %v676_v36 = vrot.slane %v674_v28, 1  ;;  %v8673_v41 = vcombine.low %v11292_v33, %v11296_v37  ;;  %v10778_v28 = vld [vmem:[%s11195_s8 + $0x34] ss:$0 sps:$4 sm:$0x11]  }
  0x23   : > { %10002 = vmatpush3.bf16.msra.mxu1 %v10753_v46  ;;  %v478_v40 = vsel %vm416_vm1, %v468_v16, %v477_v22  ;;  %v901_v42 = vshrl.u32 %v8671_v34, 16  ;;  %v904_v43 = vshll.u32 %v8671_v34, 16  ;;  %v672_v45 = vor.u32 %v670_v27, %v668_v26  ;;  %v10776_v16 = vld [vmem:[%s13923_s2 + $0xb0] sm:$0xff]  }
  0x24   : > { %9952 = vmatmul.mubr.msk.bf16.gmra.mxu0 %vm307_vm0, %v8608_v62  ;;  %10003 = vmatprep.subr.bf16.mxu1 %v10759_v3  ;;  %v669_v44 = vsel %vm657_vm2, %v664_v35, %v668_v26  ;;  %v909_v46 = vshrl.u32 %v8672_v38, 16  ;;  %v912_v47 = vshll.u32 %v8672_v38, 16  ;;  %v918_v50 = vshrl.u32 %v8673_v41, 16  ;;  %v10775_v26 = vld [vmem:[%s13923_s2 + $0x88] sm:$0xff]  }
  0x25   : > { %9984 = vmatpush3.bf16.msra.mxu0 %v10752_v51  ;;  %9955 = vmatprep.mubr.msk.bf16.mxu0 %vm307_vm0, %v8609_v5  ;;  %v903_v48 = vrot.slane %v901_v42, 3  ;;  %v906_v49 = vrot.slane %v904_v43, 4  ;;  %v921_v51 = vshll.u32 %v8673_v41, 16  ;;  %v678_v54 = vshrl.u32 %v10763_v20, 16  ;;  %v10769_v5 = vld [vmem:[%s13923_s2 + $0x90] sm:$0xff]  }
  0x26   : > { %9972 = vmatmul.mubr.msk.bf16.gmra.mxu1 %vm307_vm0, %v460_v11  ;;  %9985 = vmatprep.subr.bf16.mxu0 %v10758_v2  ;;  %v911_v52 = vrot.slane %v909_v46, 3  ;;  %v914_v53 = vrot.slane %v912_v47, 4  ;;  %v682_v55 = vshll.u32 %v10770_v39, 16  ;;  %v920_v59 = vrot.slane %v918_v50, 3  ;;  %v11358_v43 = vld [vmem:[%s11195_s8 + $0x3c] sm:$0xf] }
  0x27   : > { %9975 = vmatprep.mubr.msk.bf16.mxu1 %vm307_vm0, %v469_v21  ;;  %10004 = vmatpush3.bf16.msra.mxu1 %v10759_v3  ;;  %v907_v58 = vor.u32 %v906_v49, %v903_v48  ;;  %v923_v60 = vrot.slane %v921_v51, 4  ;;  %v680_v63 = vor.u32 %v678_v54, %v676_v36  ;;  %v690_v1 = vshll.u32 %v10771_v56, 16  ;;  %v11320_v3 = vld [vmem:[%s11195_s8 + $0x2c] sm:$0xf]  ;;  %v10781_v50 = vld [vmem:[%s13923_s2 + $0x80] sm:$0xff]  }
  0x28   : > { %10005 = vmatprep.subr.bf16.mxu1 %v10760_v10  ;;  %v915_v62 = vor.u32 %v914_v53, %v911_v52  ;;  %v684_v0 = vrot.slane %v682_v55, 1  ;;  %v677_v8 = vsel %vm657_vm2, %v672_v45, %v676_v36  ;;  %v8675_v15 = vcombine.low %v11320_v3, %v11328_v7  ;;  %v10782_v51 = vld [vmem:[%s13923_s2 + $0xa8] sm:$0xff]  }
  0x29   : > { %9986 = vmatpush3.bf16.msra.mxu0 %v10758_v2  ;;  %v11317_v2 = vld [vmem:[%s11195_s8 + $0x28] sm:$0xf]  ;;  %v924_v4 = vor.u32 %v923_v60, %v920_v59  ;;  %v692_v11 = vrot.slane %v690_v1, 1  ;;  %v694_v19 = vshrl.u32 %v10771_v56, 16  ;;  %v698_v27 = vshll.u32 %v10777_v18, 16  ;;  %v10783_v56 = vld [vmem:[%s13923_s2 + $0xa0] sm:$0xff]  }
  0x2a   : > { %10019 = vmatprep.subr.bf16.mxu0 %v11276_v23  ;;  %v8674_v6 = vcombine.low %v11314_v61, %v11317_v2  ;;  %v916_v9 = vsel %vm416_vm1, %v907_v58, %v915_v62  ;;  %v685_v12 = vsel %vm657_vm2, %v680_v63, %v684_v0  ;;  %v936_v22 = vshrl.u32 %v8675_v15, 16  ;;  %v10786_v59 = vld [vmem:[%s11195_s8 + $0x10] sm:$0xff]   ;;  %v10787_v1 = vld [vmem:[%s11195_s8 + $0x18] sm:$0xff]  }
  0x2b   : > { %10006 = vmatpush3.bf16.msra.mxu1 %v10760_v10  ;;  %v686_v10 = vshrl.u32 %v10770_v39, 16  ;;  %v925_v17 = vsel %vm416_vm1, %v915_v62, %v924_v4  ;;  %v939_v24 = vshll.u32 %v8675_v15, 16  ;;  %v696_v38 = vor.u32 %v694_v19, %v692_v11  ;;  %v11350_v39 = vld [vmem:[%s11195_s8 + $0x34] sm:$0xf] }
  0x2c   : > { %9956 = vmatmul.mubr.msk.bf16.gmra.mxu0 %vm307_vm0, %v8610_v30  ;;  %10039 = vmatprep.subr.bf16.mxu1 %v10774_v57  ;;  %v927_v13 = vshrl.u32 %v8674_v6, 16  ;;  %v930_v14 = vshll.u32 %v8674_v6, 16  ;;  %v702_v30 = vshrl.u32 %v10777_v18, 16  ;;  %v938_v35 = vrot.slane %v936_v22, 3  ;;  %v10793_v18 = vld [vmem:[%s11195_s8 + $0x30] sm:$0xff]  }
  0x2d   : > { %9987 = vmatprep.mubr.msk.bf16.mxu0 %vm307_vm0, %v669_v44  ;;  %v688_v25 = vor.u32 %v686_v10, %v684_v0  ;;  %v941_v36 = vrot.slane %v939_v24, 4  ;;  %v706_v41 = vshll.u32 %v10778_v28, 16  ;;  %v8677_v46 = vcombine.low %v11358_v43, %v11358_v43  ;;  %v11381_v0 = vld [vmem:[%s13923_s2 + $0xd8] sm:$0xff]  }
  0x2e   : > { %9976 = vmatmul.mubr.msk.bf16.gmra.mxu1 %vm307_vm0, %v478_v40  ;;  %v929_v20 = vrot.slane %v927_v13, 3  ;;  %v932_v21 = vrot.slane %v930_v14, 4  ;;  %v700_v40 = vrot.slane %v698_v27, 1  ;;  %v1303_v6 = vshrl.u32 %v10786_v59, 16  ;;  %v10792_v14 = vld [vmem:[%s11195_s8 + $0x28] sm:$0xff]  }
  0x2f   : > { %10007 = vmatprep.mubr.msk.bf16.mxu1 %vm307_vm0, %v916_v9  ;;  %v942_v45 = vor.u32 %v941_v36, %v938_v35  ;;  %v693_v47 = vsel %vm657_vm2, %v688_v25, %v692_v11  ;;  %v708_v48 = vrot.slane %v706_v41, 1  ;;  %v954_v54 = vshrl.u32 %v8677_v46, 16  ;;  %v10788_v11 = vld [vmem:[%s11195_s8 + $0x20] sm:$0xff]  }
  0x30   : > { %v933_v34 = vor.u32 %v932_v21, %v929_v20  ;;  %v701_v52 = vsel %vm657_vm2, %v696_v38, %v700_v40  ;;  %v957_v55 = vshll.u32 %v8677_v46, 16  ;;  %v1310_v10 = vshll.u32 %v10787_v1, 16 }
  0x31   : > { %v956_v62 = vrot.slane %v954_v54, 3  ;;  %v1314_v20 = vshrl.u32 %v10787_v1, 16  ;;  %v1318_v21 = vshll.u32 %v10788_v11, 16  ;;  %v1322_v24 = vshrl.u32 %v10788_v11, 16  ;;  %v11441_v54 = vld [vmem:[%s11195_s8 + $0x28] sm:$0xf] }
  0x32   : > { %v934_v44 = vsel %vm416_vm1, %v924_v4, %v933_v34  ;;  %v959_v63 = vrot.slane %v957_v55, 4  ;;  %v704_v4 = vor.u32 %v702_v30, %v700_v40  ;;  %v11405_v30 = vld [vmem:[%s11195_s8 + $0x38] sm:$0xff]   ;;  %v8697_v35 = vcombine.low %v11289_v32, %v11292_v33  ;;  %v10789_v40 = vld [vmem:[%s13923_s2 + $0xd0] sm:$0xff]   ;;  %v11444_v55 = vld [vmem:[%s11195_s8 + $0x2c] sm:$0xf] }
  0x33   : > { %v1320_v28 = vrot.slane %v1318_v21, 1  ;;  %v8698_v41 = vcombine.low %v11296_v37, %v11314_v61  ;;  %v10796_v32 = vld [vmem:[%s13923_s2 + $0xf0] sm:$0xff]   ;;  %v1338_v33 = vshrl.u32 %v10793_v18, 16  ;;  %v1342_v46 = vshll.u32 %v11405_v30, 16  ;;  %v10795_v61 = vld [vmem:[%s13923_s2 + $0xc8] sm:$0xff]   ;;  %v10801_v1 = vld [vmem:[%s13923_s2 + $0xc0] sm:$0xff]  }
  0x34   : > { %9988 = vmatmul.mubr.msk.bf16.vlgmr.msra.gmra.mxu0 %vm307_vm0, %v677_v8  ;;  %v1305_v8 = vshll.u32 %v10786_v59, 16  ;;  %v960_v9 = vor.u32 %v959_v63, %v956_v62  ;;  %v709_v15 = vsel %vm657_vm2, %v704_v4, %v708_v48  ;;  %v8747_v59 = vcombine.low %v11441_v54, %v11444_v55 }
  0x35   : > { %10020 = vmatpush3.bf16.msra.mxu0 %v11276_v23  ;;  %9991 = vmatprep.mubr.msk.bf16.mxu0 %vm307_vm0, %v685_v12  ;;  %v11353_v23 = vld [vmem:[%s11195_s8 + $0x38] sm:$0xf]  ;;  %v1324_v36 = vor.u32 %v1322_v24, %v1320_v28 }
  0x36   : > { %10008 = vmatmul.mubr.msk.bf16.vlgmr.msra.gmra.mxu1 %vm307_vm0, %v925_v17  ;;  %10021 = vmatprep.subr.bf16.mxu0 %v10769_v5  ;;  %v8676_v42 = vcombine.low %v11350_v39, %v11353_v23  ;;  %v1307_v13 = vrot.slane %v1305_v8, 1  ;;  %v1312_v17 = vrot.slane %v1310_v10, 1  ;;  %v1565_v8 = vshll.u32 %v8747_v59, 16 }
  0x37   : > { %10040 = vmatpush3.bf16.msra.mxu1 %v10774_v57  ;;  %10011 = vmatprep.mubr.msk.bf16.mxu1 %vm307_vm0, %v934_v44  ;;  %v943_v57 = vsel %vm416_vm1, %v933_v34, %v942_v45  ;;  %v10800_v34 = vld [vmem:[%s11195_s8 + $0x40] ss:$0 sps:$4 sm:$0x11]   ;;  %v8700_v10 = vcombine.low %v11328_v7, %v11350_v39 }
  0x38   : > { %10041 = vmatprep.subr.bf16.mxu1 %v10776_v16  ;;  %v945_v49 = vshrl.u32 %v8676_v42, 16  ;;  %v948_v53 = vshll.u32 %v8676_v42, 16  ;;  %v1308_v19 = vor.u32 %v1307_v13, %v1303_v6  ;;  %v1316_v27 = vor.u32 %v1314_v20, %v1312_v17 }
  0x39   : > { %10022 = vmatpush3.bf16.msra.mxu0 %v10769_v5  ;;  %v1330_v42 = vshrl.u32 %v10792_v14, 16  ;;  %v1350_v48 = vshll.u32 %v10800_v34, 16  ;;  %v1562_v6 = vshrl.u32 %v8747_v59, 16 }
  0x3a   : > { %10023 = vmatprep.subr.bf16.mxu0 %v10775_v26  ;;  %v947_v58 = vrot.slane %v945_v49, 3  ;;  %v950_v60 = vrot.slane %v948_v53, 4  ;;  %v1313_v25 = vsel %vm657_vm2, %v1308_v19, %v1312_v17  ;;  %v1489_v49 = vld [vmem:[%s11195_s8 + $0x18] sm:$0x8]  ;;  %v8699_v53 = vcombine.low %v11317_v2, %v11320_v3  ;;  %v10803_v17 = vld [vmem:[%s13923_s2 + $0xe0] sm:$0xff]  }
  0x3b   : > { %10042 = vmatpush3.bf16.msra.mxu1 %v10776_v16  ;;  %v8696_v16 = vcombine.low %v11281_v29, %v11286_v31  ;;  %v10794_v29 = vld [vmem:[%s13923_s2 + $0xf8] sm:$0xff]   ;;  %v1334_v31 = vshll.u32 %v10793_v18, 16  ;;  %v1344_v3 = vrot.slane %v1342_v46, 1  ;;  %v11510_v46 = vld [vmem:[%s11195_s8 + $0x24] sm:$0xff]  }
  0x3c   : > { %9992 = vmatmul.mubr.msk.bf16.gmra.mxu0 %vm307_vm0, %v693_v47  ;;  %10043 = vmatprep.subr.bf16.mxu1 %v10782_v51  ;;  %v951_v5 = vor.u32 %v950_v60, %v947_v58  ;;  %v1346_v47 = vshrl.u32 %v11405_v30, 16  ;;  %v10802_v60 = vld [vmem:[%s13923_s2 + $0xe8] sm:$0xff]   ;;  %v11496_v30 = vld [vmem:[%s13923_s2 + $0x118] sm:$0xff]  }
  0x3d   : > { %10024 = vmatpush3.bf16.msra.mxu0 %v10775_v26  ;;  %9995 = vmatprep.mubr.msk.bf16.mxu0 %vm307_vm0, %v701_v52  ;;  %v1326_v26 = vshll.u32 %v10792_v14, 16  ;;  %v1336_v44 = vrot.slane %v1334_v31, 1  ;;  %v11434_v52 = vld [vmem:[%s11195_s8 + $0x24] sm:$0xf]  ;;  %v11470_v14 = vld [vmem:[%s11195_s8 + $0x38] sm:$0xf] }
  0x3e   : > { %10012 = vmatmul.mubr.msk.bf16.gmra.mxu1 %vm307_vm0, %v943_v57  ;;  %10025 = vmatprep.subr.bf16.mxu0 %v10781_v50  ;;  %v952_v12 = vsel %vm416_vm1, %v942_v45, %v951_v5  ;;  %v961_v22 = vsel %vm416_vm1, %v951_v5, %v960_v9  ;;  %v1321_v45 = vsel %vm657_vm2, %v1316_v27, %v1320_v28  ;;  %v11463_v9 = vld [vmem:[%s11195_s8 + $0x34] sm:$0xf]  ;;  %v1564_v27 = vrot.slane %v1562_v6, 3 }
  0x3f   : > { %10044 = vmatpush3.bf16.msra.mxu1 %v10782_v51  ;;  %10015 = vmatprep.mubr.msk.bf16.mxu1 %vm307_vm0, %v952_v12  ;;  %v1328_v38 = vrot.slane %v1326_v26, 1  ;;  %v11431_v51 = vld [vmem:[%s11195_s8 + $0x20] sm:$0xf]  ;;  %v1340_v2 = vor.u32 %v1338_v33, %v1336_v44  ;;  %v11490_v26 = vld [vmem:[%s11195_s8 + $0x48] sm:$0xf]  ;;  %v1567_v28 = vrot.slane %v1565_v8, 4 }
  0x40   : > { %10045 = vmatprep.subr.bf16.mxu1 %v10783_v56  ;;  %v8746_v58 = vcombine.low %v11431_v51, %v11434_v52  ;;  %v11507_v33 = vld [vmem:[%s11195_s8 + $0x1c] sm:$0xff]  }
  0x41   : > { %10026 = vmatpush3.bf16.msra.mxu0 %v10781_v50  ;;  %v1329_v37 = vsel %vm657_vm2, %v1324_v36, %v1328_v38  ;;  %v11428_v50 = vld [vmem:[%s11195_s8 + $0x1c] sm:$0xf]  ;;  %v1332_v57 = vor.u32 %v1330_v42, %v1328_v38  ;;  %v1345_v24 = vsel %vm657_vm2, %v1340_v2, %v1344_v3  ;;  %v8751_v42 = vcombine.low %v11490_v26, %v11490_v26 }
  0x42   : > { %10059 = vmatprep.subr.bf16.mxu0 %v11381_v0  ;;  %v1553_v4 = vshrl.u32 %v8746_v58, 16  ;;  %v1556_v5 = vshll.u32 %v8746_v58, 16  ;;  %v1954_v2 = vshll.u32 %v11510_v46, 16 }
  0x43   : > { %10046 = vmatpush3.bf16.msra.mxu1 %v10783_v56  ;;  %v8745_v56 = vcombine.low %v1489_v49, %v11428_v50  ;;  %v1337_v39 = vsel %vm657_vm2, %v1332_v57, %v1336_v44  ;;  %v8701_v44 = vcombine.low %v11353_v23, %v11358_v43  ;;  %v1601_v49 = vshll.u32 %v8751_v42, 16 }
  0x44   : > { %9996 = vmatmul.mubr.msk.bf16.gmra.mxu0 %vm307_vm0, %v709_v15  ;;  %10079 = vmatprep.subr.bf16.mxu1 %v10794_v29  ;;  %v11473_v15 = vld [vmem:[%s11195_s8 + $0x3c] sm:$0xf]  ;;  %v1555_v18 = vrot.slane %v1553_v4, 3  ;;  %v1558_v7 = vrot.slane %v1556_v5, 4  ;;  %v8770_v57 = vcombine.low %v11428_v50, %v11431_v51  ;;  %v11532_v4 = vld [vmem:[%s11195_s8 + $0x44] sm:$0xff]   ;;  %v1958_v5 = vshrl.u32 %v11510_v46, 16 }
  0x45   : > { %10027 = vmatprep.mubr.msk.bf16.mxu0 %vm307_vm0, %v8696_v16  ;;  %v1545_v62 = vshrl.u32 %v8745_v56, 16  ;;  %v1548_v63 = vshll.u32 %v8745_v56, 16  ;;  %v1352_v16 = vrot.slane %v1350_v48, 1  ;;  %v8749_v21 = vcombine.low %v11470_v14, %v11473_v15 }
  0x46   : > { %10016 = vmatmul.mubr.msk.bf16.gmra.mxu1 %vm307_vm0, %v961_v22  ;;  %v11482_v22 = vld [vmem:[%s11195_s8 + $0x40] sm:$0xf]  ;;  %v1559_v34 = vor.u32 %v1558_v7, %v1555_v18  ;;  %v1598_v48 = vshrl.u32 %v8751_v42, 16  ;;  %v1949_v56 = vshll.u32 %v11507_v33, 16  ;;  %v1603_v50 = vrot.slane %v1601_v49, 4  ;;  %v10828_v49 = vld [vmem:[%s13924_s3 + $0x8] sm:$0xff]  }
  0x47   : > { %10047 = vmatprep.mubr.msk.bf16.mxu1 %vm307_vm0, %v1313_v25  ;;  %v1547_v11 = vrot.slane %v1545_v62, 3  ;;  %v1550_v12 = vrot.slane %v1548_v63, 4  ;;  %v11487_v25 = vld [vmem:[%s11195_s8 + $0x44] sm:$0xf]  ;;  %v1583_v36 = vshll.u32 %v8749_v21, 16  ;;  %v1947_v63 = vshrl.u32 %v11507_v33, 16 }
  0x48   : > { %v8750_v38 = vcombine.low %v11482_v22, %v11487_v25  ;;  %v1600_v62 = vrot.slane %v1598_v48, 3  ;;  %v1951_v51 = vrot.slane %v1949_v56, 1  ;;  %v1986_v7 = vshll.u32 %v11532_v4, 16  ;;  %v2317_v56 = vld [vmem:[%s11195_s8 + $0x34] sm:$0xf] }
  0x49   : > { %v1551_v31 = vor.u32 %v1550_v12, %v1547_v11  ;;  %v1585_v43 = vrot.slane %v1583_v36, 4 }
  0x4a   : > { %v1952_v42 = vor.u32 %v1951_v51, %v1947_v63  ;;  %v2322_v63 = vld [vmem:[%s11195_s8 + $0x48] sm:$0xf]  ;;  %v10839_v51 = vld [vmem:[%s13923_s2 + $0x58] sm:$0xff]  }
  0x4c   : > { %10028 = vmatmul.mubr.msk.bf16.vlgmr.msra.gmra.mxu0 %vm307_vm0, %v8697_v35  ;;  %v1580_v35 = vshrl.u32 %v8749_v21, 16 }
  0x4d   : > { %10060 = vmatpush3.bf16.msra.mxu0 %v11381_v0  ;;  %10031 = vmatprep.mubr.msk.bf16.mxu0 %vm307_vm0, %v8698_v41  ;;  %v11457_v0 = vld [vmem:[%s11195_s8 + $0x30] sm:$0xf] }
  0x4e   : > { %10048 = vmatmul.mubr.msk.bf16.vlgmr.msra.gmra.mxu1 %vm307_vm0, %v1321_v45  ;;  %10061 = vmatprep.subr.bf16.mxu0 %v10789_v40  ;;  %v8748_v13 = vcombine.low %v11457_v0, %v11463_v9  ;;  %v1589_v45 = vshrl.u32 %v8750_v38, 16  ;;  %v1582_v23 = vrot.slane %v1580_v35, 3  ;;  %v1988_v35 = vrot.slane %v1986_v7, 1 }
  0x4f   : > { %10051 = vmatprep.mubr.msk.bf16.mxu1 %vm307_vm0, %v1329_v37  ;;  %10080 = vmatpush3.bf16.msra.mxu1 %v10794_v29  ;;  %v1348_v29 = vor.u32 %v1346_v47, %v1344_v3  ;;  %v11514_v37 = vld [vmem:[%s11195_s8 + $0x2c] sm:$0xff]   ;;  %v11526_v3 = vld [vmem:[%s11195_s8 + $0x3c] sm:$0xff]  }
  0x50   : > { %10081 = vmatprep.subr.bf16.mxu1 %v10796_v32  ;;  %v1571_v19 = vshrl.u32 %v8748_v13, 16  ;;  %v1574_v20 = vshll.u32 %v8748_v13, 16  ;;  %v1591_v58 = vrot.slane %v1589_v45, 3  ;;  %v1966_v11 = vshrl.u32 %v11514_v37, 16 }
  0x51   : > { %10062 = vmatpush3.bf16.msra.mxu0 %v10789_v40  ;;  %v1353_v47 = vsel %vm657_vm2, %v1348_v29, %v1352_v16  ;;  %v1978_v13 = vshll.u32 %v11526_v3, 16  ;;  %v10810_v16 = vld [vmem:[%s13923_s2 + $0x110] sm:$0xff]   ;;  %v1982_v21 = vshrl.u32 %v11526_v3, 16 }
  0x52   : > { %10063 = vmatprep.subr.bf16.mxu0 %v10795_v61  ;;  %v1573_v40 = vrot.slane %v1571_v19, 3  ;;  %v1576_v41 = vrot.slane %v1574_v20, 4 }
  0x53   : > { %10082 = vmatpush3.bf16.msra.mxu1 %v10796_v32  ;;  %v1592_v32 = vshll.u32 %v8750_v38, 16  ;;  %v1980_v20 = vrot.slane %v1978_v13, 1  ;;  %v8773_v38 = vcombine.low %v11463_v9, %v11470_v14  ;;  %v8775_v14 = vcombine.low %v11487_v25, %v11490_v26 }
  0x54   : > { %10032 = vmatmul.mubr.msk.bf16.gmra.mxu0 %vm307_vm0, %v8699_v53  ;;  %10083 = vmatprep.subr.bf16.mxu1 %v10802_v60  ;;  %v1560_v53 = vsel %vm416_vm1, %v1551_v31, %v1559_v34  ;;  %v1577_v8 = vor.u32 %v1576_v41, %v1573_v40  ;;  %v1990_v31 = vshrl.u32 %v11532_v4, 16  ;;  %v8774_v40 = vcombine.low %v11473_v15, %v11482_v22  ;;  %v2323_v4 = vld [vmem:[%s11195_s8 + $0x4c] sm:$0xf] }
  0x55   : > { %10064 = vmatpush3.bf16.msra.mxu0 %v10795_v61  ;;  %10035 = vmatprep.mubr.msk.bf16.mxu0 %vm307_vm0, %v8700_v10  ;;  %v11517_v61 = vld [vmem:[%s11195_s8 + $0x34] sm:$0xff]   ;;  %v1594_v59 = vrot.slane %v1592_v32, 4  ;;  %v1956_v10 = vrot.slane %v1954_v2, 1  ;;  %v1604_v41 = vor.u32 %v1603_v50, %v1600_v62  ;;  %v1984_v25 = vor.u32 %v1982_v21, %v1980_v20  ;;  %v2321_v62 = vld [vmem:[%s11195_s8 + $0x44] sm:$0xf]  ;;  %v10852_v21 = vld [vmem:[%s13923_s2 + $0x48] sm:$0xff]  }
  0x56   : > { %10052 = vmatmul.mubr.msk.bf16.gmra.mxu1 %vm307_vm0, %v1337_v39  ;;  %10065 = vmatprep.subr.bf16.mxu0 %v10801_v1  ;;  %v1970_v6 = vshll.u32 %v11517_v61, 16  ;;  %v1974_v18 = vshrl.u32 %v11517_v61, 16  ;;  %v10827_v39 = vld [vmem:[%s11195_s8 + $0x4c] ss:$0 sps:$4 sm:$0x11]   ;;  %v10830_v61 = vld [vmem:[%s13923_s2 + $0x30] sm:$0xff]  }
  0x57   : > { %10055 = vmatprep.mubr.msk.bf16.mxu1 %vm307_vm0, %v1345_v24  ;;  %10084 = vmatpush3.bf16.msra.mxu1 %v10802_v60  ;;  %v1568_v60 = vor.u32 %v1567_v28, %v1564_v27  ;;  %v8771_v24 = vcombine.low %v11434_v52, %v11441_v54  ;;  %v1994_v27 = vshll.u32 %v10827_v39, 16  ;;  %v8772_v28 = vcombine.low %v11444_v55, %v11457_v0  ;;  %v10820_v55 = vld [vmem:[%s13923_s2 + $0x100] sm:$0xff]   ;;  %v2324_v50 = vld [vmem:[%s11195_s8 + $0x50] sm:$0xf]  ;;  %v2327_v39 = vld [vmem:[%s11195_s8 + $0x5c] sm:$0xf] }
  0x58   : > { %10085 = vmatprep.subr.bf16.mxu1 %v10803_v17  ;;  %v1586_v52 = vor.u32 %v1585_v43, %v1582_v23  ;;  %v1595_v54 = vor.u32 %v1594_v59, %v1591_v58  ;;  %v1957_v15 = vsel %vm657_vm2, %v1952_v42, %v1956_v10  ;;  %v1960_v22 = vor.u32 %v1958_v5, %v1956_v10  ;;  %v10831_v23 = vld [vmem:[%s13924_s3] sm:$0xff]   ;;  %v2319_v58 = vld [vmem:[%s11195_s8 + $0x3c] sm:$0xf] }
  0x59   : > { %10066 = vmatpush3.bf16.msra.mxu0 %v10801_v1  ;;  %v1962_v1 = vshll.u32 %v11514_v37, 16  ;;  %v1569_v19 = vsel %vm416_vm1, %v1559_v34, %v1568_v60  ;;  %v1578_v29 = vsel %vm416_vm1, %v1568_v60, %v1577_v8  ;;  %v10815_v34 = vld [vmem:[%s13923_s2 + $0x108] sm:$0xff]   ;;  %v1996_v36 = vrot.slane %v1994_v27, 1  ;;  %v10829_v37 = vld [vmem:[%s13923_s2 + $0x38] sm:$0xff]   ;;  %v10833_v43 = vld [vmem:[%s13923_s2 + $0x20] sm:$0xff]  }
  0x5a   : > { %10099 = vmatprep.subr.bf16.mxu0 %v11496_v30  ;;  %v1587_v0 = vsel %vm416_vm1, %v1577_v8, %v1586_v52  ;;  %v1605_v9 = vsel %vm416_vm1, %v1595_v54, %v1604_v41  ;;  %v1989_v46 = vsel %vm657_vm2, %v1984_v25, %v1988_v35  ;;  %v2320_v59 = vld [vmem:[%s11195_s8 + $0x40] sm:$0xf]  ;;  %v8838_v5 = vcombine.low %v2323_v4, %v2324_v50  ;;  %v2316_v8 = vld [vmem:[%s11195_s8 + $0x30] sm:$0x8] }
  0x5b   : > { %10086 = vmatpush3.bf16.msra.mxu1 %v10803_v17  ;;  %v1964_v12 = vrot.slane %v1962_v1, 1  ;;  %v1972_v17 = vrot.slane %v1970_v6, 1  ;;  %v8836_v3 = vcombine.low %v2319_v58, %v2320_v59  ;;  %v8837_v1 = vcombine.low %v2321_v62, %v2322_v63  ;;  %v10838_v6 = vld [vmem:[%s13923_s2 + $0x18] sm:$0xff]  }
  0x5c   : > { %10036 = vmatmul.mubr.msk.bf16.gmra.mxu0 %vm307_vm0, %v8701_v44  ;;  %10119 = vmatprep.subr.bf16.mxu1 %v10828_v49  ;;  %v8853_v10 = vcombine.low %v2320_v59, %v2321_v62 }
  0x5d   : > { %10067 = vmatprep.mubr.msk.bf16.mxu0 %vm307_vm0, %v1560_v53  ;;  %v1968_v44 = vor.u32 %v1966_v11, %v1964_v12  ;;  %v1965_v45 = vsel %vm657_vm2, %v1960_v22, %v1964_v12  ;;  %v1976_v33 = vor.u32 %v1974_v18, %v1972_v17  ;;  %v10832_v53 = vld [vmem:[%s13923_s2 + $0x28] sm:$0xff]   ;;  %v11632_v11 = vcombine.low %v2322_v63, %v2323_v4  ;;  %v10845_v12 = vld [vmem:[%s13923_s2 + $0x50] sm:$0xff]   ;;  %v2326_v18 = vld [vmem:[%s11195_s8 + $0x58] sm:$0xf] }
  0x5e   : > { %10056 = vmatmul.mubr.msk.bf16.gmra.mxu1 %vm307_vm0, %v1353_v47  ;;  %v1992_v47 = vor.u32 %v1990_v31, %v1988_v35  ;;  %v2525_v13 = vshrl.u32 %v8853_v10, 16 }
  0x5f   : > { %10087 = vmatprep.mubr.msk.bf16.mxu1 %vm307_vm0, %v8770_v57  ;;  %v1973_v32 = vsel %vm657_vm2, %v1968_v44, %v1972_v17  ;;  %v1981_v26 = vsel %vm657_vm2, %v1976_v33, %v1980_v20  ;;  %v2318_v57 = vld [vmem:[%s11195_s8 + $0x38] sm:$0xf]  ;;  %v2325_v17 = vld [vmem:[%s11195_s8 + $0x54] sm:$0xf]  ;;  %v11641_v20 = vld [vmem:[%s11195_s8 + $0x60] sm:$0xf] }
  0x60   : > { %v1997_v48 = vsel %vm657_vm2, %v1992_v47, %v1996_v36  ;;  %v8835_v2 = vcombine.low %v2317_v56, %v2318_v57  ;;  %v11617_v60 = vcombine.low %v2318_v57, %v2319_v58  ;;  %v8839_v7 = vcombine.low %v2325_v17, %v2326_v18 }
  0x61   : > { %v11648_v31 = vcombine.low %v2324_v50, %v2325_v17  ;;  %v8840_v27 = vcombine.low %v2327_v39, %v11641_v20  ;;  %v10859_v50 = vld [vmem:[%s13923_s2 + $0x98] sm:$0xff]  }
  0x64   : > { %10068 = vmatmul.mubr.msk.bf16.vlgmr.msra.gmra.mxu0 %vm307_vm0, %v1569_v19  ;;  %v8851_v19 = vcombine.low %v2316_v8, %v2317_v56 }
  0x65   : > { %10100 = vmatpush3.bf16.msra.mxu0 %v11496_v30  ;;  %10071 = vmatprep.mubr.msk.bf16.mxu0 %vm307_vm0, %v1578_v29  ;;  %v1596_v30 = vsel %vm416_vm1, %v1586_v52, %v1595_v54  ;;  %v2527_v29 = vrot.slane %v2525_v13, 3  ;;  %v10857_v54 = vld [vmem:[%s11195_s8 + $0x44] sm:$0xff]   ;;  %v2534_v13 = vshrl.u32 %v11632_v11, 16 }
  0x66   : > { %10088 = vmatmul.mubr.msk.bf16.vlgmr.msra.gmra.mxu1 %vm307_vm0, %v8771_v24  ;;  %10101 = vmatprep.subr.bf16.mxu0 %v10810_v16  ;;  %v10855_v24 = vld [vmem:[%s11195_s8 + $0x34] sm:$0xff]   ;;  %v2762_v42 = vshll.u32 %v10857_v54, 16  ;;  %v2766_v4 = vshrl.u32 %v10857_v54, 16 }
  0x67   : > { %10091 = vmatprep.mubr.msk.bf16.mxu1 %vm307_vm0, %v8772_v28  ;;  %10120 = vmatpush3.bf16.msra.mxu1 %v10828_v49  ;;  %v11651_v28 = vcombine.low %v2326_v18, %v2327_v39  ;;  %v2749_v36 = vshll.u32 %v10855_v24, 16 }
  0x68   : > { %10121 = vmatprep.subr.bf16.mxu1 %v10831_v23  ;;  %v2764_v33 = vrot.slane %v2762_v42, 1 }
  0x69   : > { %10102 = vmatpush3.bf16.msra.mxu0 %v10810_v16  ;;  %v2528_v16 = vshll.u32 %v8853_v10, 16 }
  0x6a   : > { %10103 = vmatprep.subr.bf16.mxu0 %v10815_v34 }
  0x6b   : > { %10122 = vmatpush3.bf16.msra.mxu1 %v10831_v23  ;;  %v2530_v35 = vrot.slane %v2528_v16, 4  ;;  %v2537_v16 = vshll.u32 %v11632_v11, 16 }
  0x6c   : > { %10072 = vmatmul.mubr.msk.bf16.gmra.mxu0 %vm307_vm0, %v1587_v0  ;;  %10155 = vmatprep.subr.bf16.mxu1 %v10838_v6  ;;  %v2747_v0 = vshrl.u32 %v10855_v24, 16  ;;  %v2536_v24 = vrot.slane %v2534_v13, 3  ;;  %v2933_v13 = vld [vmem:[%s11195_s8 + $0x3c] sm:$0x8] }
  0x6d   : > { %10104 = vmatpush3.bf16.msra.mxu0 %v10815_v34  ;;  %10075 = vmatprep.mubr.msk.bf16.mxu0 %vm307_vm0, %v1596_v30  ;;  %v10856_v34 = vld [vmem:[%s11195_s8 + $0x3c] sm:$0xff]  }
  0x6e   : > { %10092 = vmatmul.mubr.msk.bf16.gmra.mxu1 %vm307_vm0, %v8773_v38  ;;  %10105 = vmatprep.subr.bf16.mxu0 %v10820_v55  ;;  %v2754_v52 = vshll.u32 %v10856_v34, 16  ;;  %v2751_v38 = vrot.slane %v2749_v36, 1  ;;  %v2758_v30 = vshrl.u32 %v10856_v34, 16  ;;  %v10864_v36 = vld [vmem:[%s11195_s8 + $0x5c] sm:$0xff]  }
  0x6f   : > { %10095 = vmatprep.mubr.msk.bf16.mxu1 %vm307_vm0, %v8774_v40  ;;  %v2508_v40 = vshrl.u32 %v8851_v19, 16 }
  0x70   : > { %v2756_v41 = vrot.slane %v2754_v52, 1  ;;  %v2752_v22 = vor.u32 %v2751_v38, %v2747_v0 }
  0x71   : > { %10106 = vmatpush3.bf16.msra.mxu0 %v10820_v55  ;;  %v10853_v55 = vld [vmem:[%s13923_s2 + $0x40] sm:$0xff]   ;;  %v2510_v44 = vrot.slane %v2508_v40, 3 }
  0x72   : > { %10135 = vmatprep.subr.bf16.mxu0 %v10829_v37  ;;  %v10866_v40 = vld [vmem:[%s11195_s8 + $0x64] ss:$0 sps:$4 sm:$0x11]  }
  0x74   : > { %10076 = vmatmul.mubr.msk.bf16.gmra.mxu0 %vm307_vm0, %v1605_v9  ;;  %v2511_v9 = vshll.u32 %v8851_v19, 16 }
  0x75   : > { %10107 = vmatprep.mubr.msk.bf16.mxu0 %vm307_vm0, %v1957_v15 }
  0x76   : > { %10096 = vmatmul.mubr.msk.bf16.gmra.mxu1 %vm307_vm0, %v8775_v14  ;;  %v2516_v14 = vshrl.u32 %v11617_v60, 16  ;;  %v2513_v25 = vrot.slane %v2511_v9, 4 }
  0x78   : > { %v2514_v23 = vor.u32 %v2513_v25, %v2510_v44 }
  0x7c   : > { %10108 = vmatmul.mubr.msk.bf16.vlgmr.msra.gmra.mxu0 %vm307_vm0, %v1965_v45  ;;  %v2519_v45 = vshll.u32 %v11617_v60, 16 }
  0x7d   : > { %10111 = vmatprep.mubr.msk.bf16.mxu0 %vm307_vm0, %v1973_v32  ;;  %10136 = vmatpush3.bf16.msra.mxu0 %v10829_v37  ;;  %v2760_v32 = vor.u32 %v2758_v30, %v2756_v41  ;;  %v2531_v37 = vor.u32 %v2530_v35, %v2527_v29  ;;  %v2539_v29 = vrot.slane %v2537_v16, 4  ;;  %v2934_v16 = vld [vmem:[%s11195_s8 + $0x40] sm:$0xf] }
  0x7e   : > { %10137 = vmatprep.subr.bf16.mxu0 %v10830_v61  ;;  %v2521_v49 = vrot.slane %v2519_v45, 4  ;;  %v2794_v45 = vshll.u32 %v10866_v40, 16 }
  0x7f   : > { %v2540_v0 = vor.u32 %v2539_v29, %v2536_v24  ;;  %v2936_v24 = vld [vmem:[%s11195_s8 + $0x48] sm:$0xf]  ;;  %v8901_v29 = vcombine.low %v2933_v13, %v2934_v16  ;;  %v10876_v13 = vld [vmem:[%s13923_s2 + $0xd8] sm:$0xff]  }
  0x81   : > { %10138 = vmatpush3.bf16.msra.mxu0 %v10830_v61  ;;  %v11711_v9 = vsel %vm416_vm1, %v2531_v37, %v2540_v0 }
  0x82   : > { %10139 = vmatprep.subr.bf16.mxu0 %v10832_v53  ;;  %13939 = vst [vmem:[#allocation4_spill] sm:$0xff] %v11711_v9 }
  0x84   : > { %10112 = vmatmul.mubr.msk.bf16.gmra.mxu0 %vm307_vm0, %v1981_v26  ;;  %v2518_v26 = vrot.slane %v2516_v14, 3 }
  0x85   : > { %10115 = vmatprep.mubr.msk.bf16.mxu0 %vm307_vm0, %v1989_v46  ;;  %10140 = vmatpush3.bf16.msra.mxu0 %v10832_v53  ;;  %v2765_v53 = vsel %vm657_vm2, %v2760_v32, %v2764_v33  ;;  %v10867_v32 = vld [vmem:[%s13923_s2 + $0x88] sm:$0xff]  }
  0x86   : > { %10141 = vmatprep.subr.bf16.mxu0 %v10833_v43  ;;  %v2522_v58 = vor.u32 %v2521_v49, %v2518_v26 }
  0x88   : > { %v11678_v63 = vsel %vm416_vm1, %v2514_v23, %v2522_v58 }
  0x89   : > { %10142 = vmatpush3.bf16.msra.mxu0 %v10833_v43  ;;  %v10860_v43 = vld [vmem:[%s11195_s8 + $0x4c] sm:$0xff]   ;;  %13937 = vst [vmem:[#allocation2_spill] sm:$0xff] %v11678_v63 }
  0x8a   : > { %10175 = vmatprep.subr.bf16.mxu0 %v10839_v51 }
  0x8c   : > { %10116 = vmatmul.mubr.msk.bf16.gmra.mxu0 %vm307_vm0, %v1997_v48  ;;  %v2757_v48 = vsel %vm657_vm2, %v2752_v22, %v2756_v41  ;;  %v2790_v22 = vshrl.u32 %v10864_v36, 16 }
  0x8d   : > { %10143 = vmatprep.mubr.msk.bf16.mxu0 %vm307_vm0, %v8835_v2  ;;  %v2770_v2 = vshll.u32 %v10860_v43, 16 }
  0x94   : > { %10144 = vmatmul.mubr.msk.bf16.vlgmr.msra.gmra.mxu0 %vm307_vm0, %v8836_v3  ;;  %v10861_v3 = vld [vmem:[%s11195_s8 + $0x54] sm:$0xff]  }
  0x95   : > { %10147 = vmatprep.mubr.msk.bf16.mxu0 %vm307_vm0, %v8837_v1  ;;  %10176 = vmatpush3.bf16.msra.mxu0 %v10839_v51  ;;  %v11681_v1 = vsel %vm416_vm1, %v2522_v58, %v2531_v37  ;;  %v2772_v51 = vrot.slane %v2770_v2, 1  ;;  %v2778_v6 = vshll.u32 %v10861_v3, 16 }
  0x96   : > { %10177 = vmatprep.subr.bf16.mxu0 %v10845_v12  ;;  %13938 = vst [vmem:[#allocation3_spill] sm:$0xff] %v11681_v1 }
  0x97   : > { %v2780_v18 = vrot.slane %v2778_v6, 1 }
  0x99   : > { %10178 = vmatpush3.bf16.msra.mxu0 %v10845_v12  ;;  %v2768_v12 = vor.u32 %v2766_v4, %v2764_v33  ;;  %v2552_v33 = vshrl.u32 %v11651_v28, 16 }
  0x9a   : > { %10179 = vmatprep.subr.bf16.mxu0 %v10852_v21 }
  0x9b   : > { %v2554_v23 = vrot.slane %v2552_v33, 3 }
  0x9c   : > { %10148 = vmatmul.mubr.msk.bf16.gmra.mxu0 %vm307_vm0, %v8838_v5  ;;  %v2774_v5 = vshrl.u32 %v10860_v43, 16 }
  0x9d   : > { %10151 = vmatprep.mubr.msk.bf16.mxu0 %vm307_vm0, %v8839_v7  ;;  %10180 = vmatpush3.bf16.msra.mxu0 %v10852_v21  ;;  %v2543_v7 = vshrl.u32 %v11648_v31, 16  ;;  %v2773_v21 = vsel %vm657_vm2, %v2768_v12, %v2772_v51 }
  0x9e   : > { %10181 = vmatprep.subr.bf16.mxu0 %v10853_v55  ;;  %v2776_v17 = vor.u32 %v2774_v5, %v2772_v51 }
  0x9f   : > { %v2545_v35 = vrot.slane %v2543_v7, 3 }
  0xa0   : > { %v2781_v11 = vsel %vm657_vm2, %v2776_v17, %v2780_v18  ;;  %v2935_v17 = vld [vmem:[%s11195_s8 + $0x44] sm:$0xf] }
  0xa1   : > { %10182 = vmatpush3.bf16.msra.mxu0 %v10853_v55  ;;  %v8857_v55 = vcombine.low %v11641_v20, %v11641_v20  ;;  %v10863_v20 = vld [vmem:[%s13923_s2 + $0x90] sm:$0xff]  }
  0xa2   : > { %10215 = vmatprep.subr.bf16.mxu0 %v10859_v50 }
  0xa3   : > { %v2561_v49 = vshrl.u32 %v8857_v55, 16  ;;  %v2564_v4 = vshll.u32 %v8857_v55, 16 }
  0xa4   : > { %10152 = vmatmul.mubr.msk.bf16.gmra.mxu0 %vm307_vm0, %v8840_v27  ;;  %v2546_v27 = vshll.u32 %v11648_v31, 16  ;;  %v2786_v31 = vshll.u32 %v10864_v36, 16  ;;  %v8902_v36 = vcombine.low %v2935_v17, %v2936_v24 }
  0xa5   : > { %10183 = vmatprep.mubr.msk.bf16.mxu0 %vm307_vm0, %v2757_v48  ;;  %v2555_v48 = vshll.u32 %v11651_v28, 16 }
  0xa6   : > { %v2548_v38 = vrot.slane %v2546_v27, 4  ;;  %v2788_v44 = vrot.slane %v2786_v31, 1  ;;  %v8926_v27 = vcombine.low %v2934_v16, %v2935_v17  ;;  %v2988_v31 = vshrl.u32 %v8901_v29, 16 }
  0xa7   : > { %v2557_v2 = vrot.slane %v2555_v48, 4 }
  0xa8   : > { %v2549_v14 = vor.u32 %v2548_v38, %v2545_v35  ;;  %v2792_v37 = vor.u32 %v2790_v22, %v2788_v44  ;;  %v2938_v35 = vld [vmem:[%s11195_s8 + $0x50] sm:$0xf] }
  0xa9   : > { %v2558_v6 = vor.u32 %v2557_v2, %v2554_v23  ;;  %v2940_v2 = vld [vmem:[%s11195_s8 + $0x58] sm:$0xf] }
  0xac   : > { %10184 = vmatmul.mubr.msk.bf16.vlgmr.msra.gmra.mxu0 %vm307_vm0, %v2765_v53  ;;  %v2796_v53 = vrot.slane %v2794_v45, 1  ;;  %v2990_v45 = vrot.slane %v2988_v31, 3 }
  0xad   : > { %10216 = vmatpush3.bf16.msra.mxu0 %v10859_v50  ;;  %10187 = vmatprep.mubr.msk.bf16.mxu0 %vm307_vm0, %v2773_v21  ;;  %v10868_v21 = vld [vmem:[%s13923_s2 + $0x80] sm:$0xff]  }
  0xae   : > { %10217 = vmatprep.subr.bf16.mxu0 %v10863_v20  ;;  %v2797_v28 = vsel %vm657_vm2, %v2792_v37, %v2796_v53 }
  0xb1   : > { %10218 = vmatpush3.bf16.msra.mxu0 %v10863_v20  ;;  %v2991_v20 = vshll.u32 %v8901_v29, 16 }
  0xb2   : > { %10219 = vmatprep.subr.bf16.mxu0 %v10867_v32 }
  0xb3   : > { %v2993_v48 = vrot.slane %v2991_v20, 4 }
  0xb4   : > { %10188 = vmatmul.mubr.msk.bf16.gmra.mxu0 %vm307_vm0, %v2781_v11  ;;  %v2937_v11 = vld [vmem:[%s11195_s8 + $0x4c] sm:$0xf] }
  0xb5   : > { %10220 = vmatpush3.bf16.msra.mxu0 %v10867_v32  ;;  %v8903_v38 = vcombine.low %v2937_v11, %v2938_v35  ;;  %v2999_v32 = vshll.u32 %v8902_v36, 16 }
  0xb6   : > { %10221 = vmatprep.subr.bf16.mxu0 %v10868_v21 }
  0xb7   : > { %v3005_v33 = vshrl.u32 %v8903_v38, 16  ;;  %v3001_v53 = vrot.slane %v2999_v32, 4 }
  0xb9   : > { %10222 = vmatpush3.bf16.msra.mxu0 %v10868_v21  ;;  %v3007_v23 = vrot.slane %v3005_v33, 3 }
  0xba   : > { %10255 = vmatprep.subr.bf16.mxu0 %v10876_v13 }
  0xdc   : > { %v9949_v15 = vpop.f32.mrf.mxu0 }
  0xdd   : > { %v9969_v46 = vpop.f32.mrf.mxu1 }
  0xde   : > { %v360_v47 = vpop.f32.mrf.mxu0  ;;  %v11662_v61 = vadd.f32 %v9969_v46, %v9949_v15  ;;  %v2782_v15 = vshrl.u32 %v10861_v3, 16  ;;  %v11723_v46 = vsel %vm416_vm1, %v2540_v0, %v2549_v14  ;;  %v2563_v3 = vrot.slane %v2561_v49, 3 }
  0xdf   : > { %v555_v56 = vpop.f32.mrf.mxu1  ;;  %13940 = vst [vmem:[#allocation5_spill] sm:$0xff] %v11723_v46 }
  0xe0   : > { %v11667_v57 = vpop.f32.mrf.mxu0  ;;  %v11669_v59 = vadd.f32 %v555_v56, %v360_v47  ;;  %v2784_v47 = vor.u32 %v2782_v15, %v2780_v18  ;;  %v2996_v15 = vshrl.u32 %v8902_v36, 16 }
  0xe1   : > { %v11673_v60 = vpop.f32.mrf.mxu1 }
  0xe2   : > { %v11675_v62 = vpop.f32.mrf.mxu0  ;;  %v2789_v58 = vsel %vm657_vm2, %v2784_v47, %v2788_v44 }
  0xe3   : > { %v11686_v8 = vpop.f32.mrf.mxu1  ;;  %10191 = vmatprep.mubr.msk.bf16.mxu0 %vm307_vm0, %v2789_v58  ;;  %v2939_v58 = vld [vmem:[%s11195_s8 + $0x54] sm:$0xf] }
  0xe4   : > { %v9953_v10 = vpop.f32.mrf.mxu0  ;;  %10192 = vmatmul.mubr.msk.bf16.gmra.mxu0 %vm307_vm0, %v2797_v28  ;;  %v8928_v16 = vcombine.low %v2938_v35, %v2939_v58 }
  0xe5   : > { %10223 = vmatprep.mubr.msk.bf16.mxu0 %vm307_vm0, %v8926_v27 }
  0xe6   : > { %v9973_v39 = vpop.f32.mrf.mxu1  ;;  %v376_v19 = vpop.f32.mrf.mxu0 }
  0xe7   : > { %v11693_v34 = vadd.f32 %v9973_v39, %v9953_v10  ;;  %v2566_v10 = vrot.slane %v2564_v4, 4  ;;  %v11744_v39 = vsel %vm416_vm1, %v2549_v14, %v2558_v6  ;;  %v8927_v14 = vcombine.low %v2936_v24, %v2937_v11 }
  0xe8   : > { %v571_v52 = vpop.f32.mrf.mxu1  ;;  %v11698_v54 = vpop.f32.mrf.mxu0  ;;  %13943 = vst [vmem:[#allocation8_spill] sm:$0xff] %v11744_v39  ;;  %v11887_v39 = vld [vmem:[%s11195_s8 + $0x64] sm:$0xf] }
  0xe9   : > { %v11702_v30 = vadd.f32 %v571_v52, %v376_v19  ;;  %v2567_v19 = vor.u32 %v2566_v10, %v2563_v3  ;;  %v8904_v10 = vcombine.low %v2939_v58, %v2940_v2  ;;  %v2945_v58 = vld [vmem:[%s11195_s8 + $0x6c] sm:$0xf] }
  0xea   : > { %v11706_v41 = vpop.f32.mrf.mxu1  ;;  %v11708_v42 = vpop.f32.mrf.mxu0 }
  0xeb   : > { %v11755_v0 = vsel %vm416_vm1, %v2558_v6, %v2567_v19  ;;  %v2942_v6 = vld [vmem:[%s11195_s8 + $0x60] sm:$0xf]  ;;  %v3014_v27 = vshrl.u32 %v8904_v10, 16  ;;  %v3017_v35 = vshll.u32 %v8904_v10, 16  ;;  %v10888_v10 = vld [vmem:[%s13923_s2 + $0xc8] sm:$0xff]  }
  0xec   : > { %v11720_v25 = vpop.f32.mrf.mxu1  ;;  %v9957_v26 = vpop.f32.mrf.mxu0  ;;  %13945 = vst [vmem:[#allocation10_spill] sm:$0xff] %v11755_v0  ;;  %10224 = vmatmul.mubr.msk.bf16.vlgmr.msra.gmra.mxu0 %vm307_vm0, %v8927_v14  ;;  %v11884_v0 = vld [vmem:[%s11195_s8 + $0x60] sm:$0xf] }
  0xed   : > { %10227 = vmatprep.mubr.msk.bf16.mxu0 %vm307_vm0, %v8928_v16  ;;  %10256 = vmatpush3.bf16.msra.mxu0 %v10876_v13  ;;  %v3016_v14 = vrot.slane %v3014_v27, 3  ;;  %13965 = vst [vmem:[#allocation30_spill] sm:$0xff] %v11884_v0 }
  0xee   : > { %v9977_v43 = vpop.f32.mrf.mxu1  ;;  %v392_v56 = vpop.f32.mrf.mxu0 }
  0xef   : > { %v11727_v50 = vadd.f32 %v9977_v43, %v9957_v26  ;;  %v3008_v26 = vshll.u32 %v8903_v38, 16 }
  0xf0   : > { %v587_v51 = vpop.f32.mrf.mxu1  ;;  %v11731_v5 = vpop.f32.mrf.mxu0 }
  0xf1   : > { %v11733_v12 = vadd.f32 %v587_v51, %v392_v56  ;;  %v3010_v43 = vrot.slane %v3008_v26, 4  ;;  %v2994_v56 = vor.u32 %v2993_v48, %v2990_v45  ;;  %v2941_v51 = vld [vmem:[%s11195_s8 + $0x5c] sm:$0xf]  ;;  %v2943_v48 = vld [vmem:[%s11195_s8 + $0x64] sm:$0xf] }
  0xf2   : > { %v11739_v18 = vpop.f32.mrf.mxu1  ;;  %v11741_v7 = vpop.f32.mrf.mxu0  ;;  %v8905_v17 = vcombine.low %v2941_v51, %v2942_v6  ;;  %v8929_v36 = vcombine.low %v2940_v2, %v2941_v51  ;;  %v8907_v51 = vcombine.low %v2945_v58, %v2945_v58 }
  0xf3   : > { %13941 = vst [vmem:[#allocation6_spill] sm:$0xff] %v11739_v18  ;;  %13942 = vst [vmem:[#allocation7_spill] sm:$0xff] %v11741_v7  ;;  %v3011_v28 = vor.u32 %v3010_v43, %v3007_v23 }
  0xf4   : > { %v11752_v52 = vpop.f32.mrf.mxu1  ;;  %v9989_v55 = vpop.f32.mrf.mxu0  ;;  %v3026_v20 = vshll.u32 %v8905_v17, 16  ;;  %10228 = vmatmul.mubr.msk.bf16.gmra.mxu0 %vm307_vm0, %v8929_v36  ;;  %v3041_v36 = vshrl.u32 %v8907_v51, 16 }
  0xf5   : > { %13944 = vst [vmem:[#allocation9_spill] sm:$0xff] %v11752_v52  ;;  %v11759_v40 = vadd.f32 %v9989_v55, %v11662_v61  ;;  %v2998_v61 = vrot.slane %v2996_v15, 3  ;;  %v3023_v55 = vshrl.u32 %v8905_v17, 16 }
  0xf6   : > { %v786_v22 = vpop.f32.mrf.mxu0  ;;  %v11761_v44 = vpop.f32.mrf.mxu1  ;;  %v3028_v33 = vrot.slane %v3026_v20, 4 }
  0xf7   : > { %v11764_v47 = vadd.f32 %v786_v22, %v11669_v59  ;;  %v3002_v4 = vor.u32 %v3001_v53, %v2998_v61  ;;  %v3025_v22 = vrot.slane %v3023_v55, 3  ;;  %v2944_v61 = vld [vmem:[%s11195_s8 + $0x68] sm:$0xf] }
  0xf8   : > { %v11766_v49 = vpop.f32.mrf.mxu0  ;;  %v11768_v37 = vpop.f32.mrf.mxu1  ;;  %v8906_v2 = vcombine.low %v2943_v48, %v2944_v61  ;;  %v8931_v27 = vcombine.low %v2944_v61, %v2945_v58  ;;  %v3574_v55 = vld [vmem:[%s11195_s8 + $0x48] sm:$0x8]  ;;  %v3043_v61 = vrot.slane %v3041_v36, 3  ;;  %v11849_v58 = vld [vmem:[%s11195_s8 + $0x5c] sm:$0xf] }
  0xf9   : > { %v11785_v24 = vsel %vm416_vm1, %v2994_v56, %v3002_v4  ;;  %v11788_v29 = vsel %vm416_vm1, %v3002_v4, %v3011_v28  ;;  %v3029_v43 = vor.u32 %v3028_v33, %v3025_v22  ;;  %v8930_v56 = vcombine.low %v2942_v6, %v2943_v48  ;;  %v11836_v33 = vld [vmem:[%s11195_s8 + $0x50] sm:$0xf] }
  0xfa   : > { %v11773_v3 = vpop.f32.mrf.mxu0  ;;  %v11775_v59 = vpop.f32.mrf.mxu1  ;;  %13946 = vst [vmem:[#allocation11_spill] sm:$0xff] %v11785_v24  ;;  %13947 = vst [vmem:[#allocation12_spill] sm:$0xff] %v11788_v29  ;;  %v3032_v6 = vshrl.u32 %v8906_v2, 16 }
  0xfb   : > { %10231 = vmatprep.mubr.msk.bf16.mxu0 %vm307_vm0, %v8930_v56  ;;  %13954 = vst [vmem:[#allocation19_spill] sm:$0xff] %v11836_v33  ;;  %v11846_v56 = vld [vmem:[%s11195_s8 + $0x58] sm:$0xf] }
  0xfc   : > { %v9993_v19 = vpop.f32.mrf.mxu0  ;;  %v11782_v21 = vpop.f32.mrf.mxu1  ;;  %13957 = vst [vmem:[#allocation22_spill] sm:$0xff] %v11846_v56  ;;  %10232 = vmatmul.mubr.msk.bf16.gmra.mxu0 %vm307_vm0, %v8931_v27 }
  0xfd   : > { %v11791_v11 = vadd.f32 %v9993_v19, %v11693_v34  ;;  %v3019_v34 = vrot.slane %v3017_v35, 4  ;;  %v3044_v35 = vshll.u32 %v8907_v51, 16 }
  0xfe   : > { %v802_v38 = vpop.f32.mrf.mxu0  ;;  %v11794_v31 = vpop.f32.mrf.mxu1 }
  0xff   : > { %v11797_v15 = vadd.f32 %v802_v38, %v11702_v30  ;;  %v3020_v26 = vor.u32 %v3019_v34, %v3016_v14  ;;  %v10882_v30 = vld [vmem:[%s13923_s2 + $0xd0] sm:$0xff]   ;;  %v11831_v38 = vld [vmem:[%s11195_s8 + $0x4c] sm:$0xf]  ;;  %v3034_v34 = vrot.slane %v3032_v6, 3 }
 0x100   : > { %v11799_v45 = vpop.f32.mrf.mxu0  ;;  %v11801_v32 = vpop.f32.mrf.mxu1  ;;  %10257 = vmatprep.subr.bf16.mxu0 %v10882_v30  ;;  %13952 = vst [vmem:[#allocation17_spill] sm:$0xff] %v11831_v38 }
 0x101   : > { %v11815_v4 = vsel %vm416_vm1, %v3011_v28, %v3020_v26  ;;  %v11823_v17 = vsel %vm416_vm1, %v3020_v26, %v3029_v43  ;;  %v3035_v28 = vshll.u32 %v8906_v2, 16  ;;  %10258 = vmatpush3.bf16.msra.mxu0 %v10882_v30  ;;  %v11839_v26 = vld [vmem:[%s11195_s8 + $0x54] sm:$0xf]  ;;  %v3046_v30 = vrot.slane %v3044_v35, 4 }
 0x102   : > { %v11806_v53 = vpop.f32.mrf.mxu0  ;;  %v11808_v23 = vpop.f32.mrf.mxu1  ;;  %13948 = vst [vmem:[#allocation13_spill] sm:$0xff] %v11815_v4  ;;  %13950 = vst [vmem:[#allocation15_spill] sm:$0xff] %v11823_v17  ;;  %10259 = vmatprep.subr.bf16.mxu0 %v10888_v10  ;;  %v8976_v6 = vcombine.low %v11836_v33, %v11839_v26 }
 0x103   : > { %v3037_v22 = vrot.slane %v3035_v28, 4  ;;  %13955 = vst [vmem:[#allocation20_spill] sm:$0xff] %v11839_v26  ;;  %v8977_v28 = vcombine.low %v11846_v56, %v11849_v58 }
 0x104   : > { %v9997_v13 = vpop.f32.mrf.mxu0  ;;  %v11820_v16 = vpop.f32.mrf.mxu1  ;;  %v3637_v4 = vshrl.u32 %v8976_v6, 16  ;;  %v3640_v29 = vshll.u32 %v8976_v6, 16 }
 0x105   : > { %13949 = vst [vmem:[#allocation14_spill] sm:$0xff] %v11820_v16  ;;  %v11827_v19 = vadd.f32 %v9997_v13, %v11727_v50  ;;  %v8975_v50 = vcombine.low %v3574_v55, %v11831_v38  ;;  %v3038_v13 = vor.u32 %v3037_v22, %v3034_v34  ;;  %10260 = vmatpush3.bf16.msra.mxu0 %v10888_v10  ;;  %v10889_v34 = vld [vmem:[%s13923_s2 + $0xc0] sm:$0xff]  }
 0x106   : > { %v818_v14 = vpop.f32.mrf.mxu0  ;;  %v11833_v20 = vpop.f32.mrf.mxu1  ;;  %10261 = vmatprep.subr.bf16.mxu0 %v10889_v34  ;;  %v3642_v10 = vrot.slane %v3640_v29, 4  ;;  %v11893_v29 = vld [vmem:[%s11195_s8 + $0x6c] sm:$0xf] }
 0x107   : > { %13951 = vst [vmem:[#allocation16_spill] sm:$0xff] %v11827_v19  ;;  %13953 = vst [vmem:[#allocation18_spill] sm:$0xff] %v11833_v20  ;;  %v11843_v48 = vadd.f32 %v818_v14, %v11733_v12  ;;  %v3629_v55 = vshrl.u32 %v8975_v50, 16  ;;  %v3047_v12 = vor.u32 %v3046_v30, %v3043_v61  ;;  %v3632_v36 = vshll.u32 %v8975_v50, 16  ;;  %v11929_v20 = vld [vmem:[%s11195_s8 + $0x78] sm:$0xf] }
 0x108   : > { %v11851_v2 = vpop.f32.mrf.mxu0  ;;  %v11853_v51 = vpop.f32.mrf.mxu1  ;;  %v11865_v17 = vsel %vm416_vm1, %v3029_v43, %v3038_v13  ;;  %v3639_v43 = vrot.slane %v3637_v4, 3  ;;  %v11890_v4 = vld [vmem:[%s11195_s8 + $0x68] sm:$0xf] }
 0x109   : > { %13956 = vst [vmem:[#allocation21_spill] sm:$0xff] %v11843_v48  ;;  %13958 = vst [vmem:[#allocation23_spill] sm:$0xff] %v11851_v2  ;;  %v3631_v22 = vrot.slane %v3629_v55, 3  ;;  %v11871_v24 = vsel %vm416_vm1, %v3038_v13, %v3047_v12  ;;  %v3634_v27 = vrot.slane %v3632_v36, 4  ;;  %v3646_v55 = vshrl.u32 %v8977_v28, 16  ;;  %10262 = vmatpush3.bf16.msra.mxu0 %v10889_v34 }
 0x10a   : > { %13959 = vst [vmem:[#allocation24_spill] sm:$0xff] %v11853_v51  ;;  %v11860_v35 = vpop.f32.mrf.mxu0  ;;  %v11862_v14 = vpop.f32.mrf.mxu1  ;;  %13962 = vst [vmem:[#allocation27_spill] sm:$0xff] %v11865_v17  ;;  %v3649_v17 = vshll.u32 %v8977_v28, 16  ;;  %v3643_v36 = vor.u32 %v3642_v10, %v3639_v43  ;;  %v8979_v10 = vcombine.low %v11890_v4, %v11893_v29  ;;  %v11926_v48 = vld [vmem:[%s11195_s8 + $0x74] sm:$0xf] }
 0x10b   : > { %13960 = vst [vmem:[#allocation25_spill] sm:$0xff] %v11860_v35  ;;  %13961 = vst [vmem:[#allocation26_spill] sm:$0xff] %v11862_v14  ;;  %v3635_v6 = vor.u32 %v3634_v27, %v3631_v22  ;;  %v11923_v35 = vld [vmem:[%s11195_s8 + $0x70] sm:$0xf] }
 0x10c   : > { %13963 = vst [vmem:[#allocation28_spill] sm:$0xff] %v11871_v24  ;;  %v11873_v50 = vpop.f32.mrf.mxu1  ;;  %v11875_v61 = vpop.f32.mrf.mxu0  ;;  %v3648_v24 = vrot.slane %v3646_v55, 3  ;;  %v3651_v46 = vrot.slane %v3649_v17, 4  ;;  %v8978_v17 = vcombine.low %v11884_v0, %v11887_v39  ;;  %v3664_v26 = vshrl.u32 %v8979_v10, 16 }
 0x10d   : > { %13964 = vst [vmem:[#allocation29_spill] sm:$0xff] %v11873_v50  ;;  %v3644_v28 = vsel %vm416_vm1, %v3635_v6, %v3643_v36  ;;  %v10899_v6 = vld [vmem:[%s13923_s2 + $0x118] sm:$0xff]   ;;  %v3667_v9 = vshll.u32 %v8979_v10, 16 }
 0x10e   : > { %v11879_v13 = vpop.f32.mrf.mxu0  ;;  %v11881_v12 = vpop.f32.mrf.mxu1  ;;  %10263 = vmatprep.mubr.msk.bf16.mxu0 %vm307_vm0, %v3644_v28  ;;  %v3652_v34 = vor.u32 %v3651_v46, %v3648_v24  ;;  %v3655_v24 = vshrl.u32 %v8978_v17, 16  ;;  %v3658_v28 = vshll.u32 %v8978_v17, 16  ;;  %10295 = vmatprep.subr.bf16.mxu0 %v10899_v6  ;;  %v3666_v14 = vrot.slane %v3664_v26, 3 }
 0x10f   : > { %v3669_v51 = vrot.slane %v3667_v9, 4  ;;  %v10905_v9 = vld [vmem:[%s13923_s2 + $0x110] sm:$0xff]   ;;  %v8980_v26 = vcombine.low %v11923_v35, %v11926_v48 }
 0x110   : > { %v11895_v30 = vpop.f32.mrf.mxu0  ;;  %v11897_v22 = vpop.f32.mrf.mxu1  ;;  %v3653_v55 = vsel %vm416_vm1, %v3643_v36, %v3652_v34  ;;  %v3657_v63 = vrot.slane %v3655_v24, 3  ;;  %v3660_v50 = vrot.slane %v3658_v28, 4  ;;  %v8981_v24 = vcombine.low %v11929_v20, %v11929_v20 }
 0x111   : > { %10264 = vmatmul.mubr.msk.bf16.vlgmr.msra.gmra.mxu0 %vm307_vm0, %v3653_v55  ;;  %v3670_v19 = vor.u32 %v3669_v51, %v3666_v14  ;;  %v10909_v51 = vld [vmem:[%s13923_s2 + $0x108] sm:$0xff]   ;;  %v3676_v28 = vshll.u32 %v8980_v26, 16 }
 0x112   : > { %v11901_v27 = vpop.f32.mrf.mxu0  ;;  %v11903_v43 = vpop.f32.mrf.mxu1  ;;  %10296 = vmatpush3.bf16.msra.mxu0 %v10899_v6  ;;  %v3661_v10 = vor.u32 %v3660_v50, %v3657_v63 }
 0x113   : > { %10297 = vmatprep.subr.bf16.mxu0 %v10905_v9  ;;  %v3678_v52 = vrot.slane %v3676_v28, 4 }
 0x114   : > { %v11913_v56 = vpop.f32.mrf.mxu0  ;;  %v11915_v46 = vpop.f32.mrf.mxu1  ;;  %v3662_v6 = vsel %vm416_vm1, %v3652_v34, %v3661_v10  ;;  %v3671_v63 = vsel %vm416_vm1, %v3661_v10, %v3670_v19  ;;  %v3673_v34 = vshrl.u32 %v8980_v26, 16  ;;  %v10915_v26 = vld [vmem:[%s11195_s8 + $0x54] sm:$0xff]  }
 0x115   : > { %10267 = vmatprep.mubr.msk.bf16.mxu0 %vm307_vm0, %v3662_v6  ;;  %v3685_v6 = vshll.u32 %v8981_v24, 16 }
 0x116   : > { %v11918_v1 = vpop.f32.mrf.mxu0  ;;  %v11920_v36 = vpop.f32.mrf.mxu1  ;;  %10298 = vmatpush3.bf16.msra.mxu0 %v10905_v9 }
 0x117   : > { %13966 = vst [vmem:[#allocation31_spill] sm:$0xff] %v11918_v1  ;;  %13967 = vst [vmem:[#allocation32_spill] sm:$0xff] %v11920_v36  ;;  %10299 = vmatprep.subr.bf16.mxu0 %v10909_v51 }
 0x118   : > { %v11931_v55 = vpop.f32.mrf.mxu0  ;;  %v11933_v17 = vpop.f32.mrf.mxu1 }
 0x119   : > { %13968 = vst [vmem:[#allocation33_spill] sm:$0xff] %v11931_v55  ;;  %13969 = vst [vmem:[#allocation34_spill] sm:$0xff] %v11933_v17  ;;  %10268 = vmatmul.mubr.msk.bf16.gmra.mxu0 %vm307_vm0, %v3671_v63 }
 0x11a   : > { %v11935_v2 = vpop.f32.mrf.mxu0  ;;  %v11937_v36 = vpop.f32.mrf.mxu1  ;;  %10300 = vmatpush3.bf16.msra.mxu0 %v10909_v51 }
 0x11b   : > { %13970 = vst [vmem:[#allocation35_spill] sm:$0xff] %v11935_v2  ;;  %13971 = vst [vmem:[#allocation36_spill] sm:$0xff] %v11937_v36  ;;  %v3682_v36 = vshrl.u32 %v8981_v24, 16  ;;  %v3675_v2 = vrot.slane %v3673_v34, 3  ;;  %v10916_v24 = vld [vmem:[%s11195_s8 + $0x5c] sm:$0xff]  }
 0x11c   : > { %v11952_v14 = vpop.f32.mrf.mxu0  ;;  %v11954_v50 = vpop.f32.mrf.mxu1 }
 0x11d   : > { %13972 = vst [vmem:[#allocation37_spill] sm:$0xff] %v11952_v14  ;;  %13973 = vst [vmem:[#allocation38_spill] sm:$0xff] %v11954_v50  ;;  %v3684_v7 = vrot.slane %v3682_v36, 3  ;;  %v10914_v14 = vld [vmem:[%s11195_s8 + $0x4c] sm:$0xff]   ;;  %v3687_v50 = vrot.slane %v3685_v6, 4  ;;  %v3679_v1 = vor.u32 %v3678_v52, %v3675_v2  ;;  %v10912_v36 = vld [vmem:[%s13923_s2 + $0x100] sm:$0xff]  }
 0x11e   : > { %v11957_v10 = vpop.f32.mrf.mxu0  ;;  %v11959_v17 = vpop.f32.mrf.mxu1  ;;  %v4031_v9 = vshll.u32 %v10914_v14, 16  ;;  %v4029_v28 = vshrl.u32 %v10914_v14, 16  ;;  %10301 = vmatprep.subr.bf16.mxu0 %v10912_v36 }
 0x11f   : > { %13974 = vst [vmem:[#allocation39_spill] sm:$0xff] %v11957_v10  ;;  %13975 = vst [vmem:[#allocation40_spill] sm:$0xff] %v11959_v17  ;;  %v3688_v16 = vor.u32 %v3687_v50, %v3684_v7  ;;  %v3680_v34 = vsel %vm416_vm1, %v3670_v19, %v3679_v1  ;;  %v4036_v50 = vshll.u32 %v10915_v26, 16  ;;  %v4040_v19 = vshrl.u32 %v10915_v26, 16  ;;  %10302 = vmatpush3.bf16.msra.mxu0 %v10912_v36 }
 0x120   : > { %v11962_v55 = vpop.f32.mrf.mxu0  ;;  %v11964_v63 = vpop.f32.mrf.mxu1  ;;  %10271 = vmatprep.mubr.msk.bf16.mxu0 %vm307_vm0, %v3680_v34  ;;  %v4033_v7 = vrot.slane %v4031_v9, 1 }
 0x121   : > { %13976 = vst [vmem:[#allocation41_spill] sm:$0xff] %v11962_v55  ;;  %13977 = vst [vmem:[#allocation42_spill] sm:$0xff] %v11964_v63  ;;  %v3689_v52 = vsel %vm416_vm1, %v3679_v1, %v3688_v16  ;;  %v4038_v1 = vrot.slane %v4036_v50, 1  ;;  %v4048_v16 = vshrl.u32 %v10916_v24, 16 }
 0x122   : > { %v11968_v18 = vpop.f32.mrf.mxu0  ;;  %v11970_v10 = vpop.f32.mrf.mxu1  ;;  %10272 = vmatmul.mubr.msk.bf16.gmra.mxu0 %vm307_vm0, %v3689_v52  ;;  %v4034_v6 = vor.u32 %v4033_v7, %v4029_v28  ;;  %v10919_v28 = vld [vmem:[%s11195_s8 + $0x6c] sm:$0xff]  }
 0x123   : > { %13978 = vst [vmem:[#allocation43_spill] sm:$0xff] %v11968_v18  ;;  %13979 = vst [vmem:[#allocation44_spill] sm:$0xff] %v11970_v10  ;;  %v4044_v10 = vshll.u32 %v10916_v24, 16  ;;  %v4042_v18 = vor.u32 %v4040_v19, %v4038_v1  ;;  %v4060_v55 = vshll.u32 %v10919_v28, 16 }
 0x124   : > { %v11978_v2 = vpop.f32.mrf.mxu1  ;;  %v11980_v51 = vpop.f32.mrf.mxu0  ;;  %v4039_v26 = vsel %vm657_vm2, %v4034_v6, %v4038_v1 }
 0x125   : > { %13980 = vst [vmem:[#allocation45_spill] sm:$0xff] %v11978_v2  ;;  %v4046_v9 = vrot.slane %v4044_v10, 1  ;;  %v10918_v2 = vld [vmem:[%s11195_s8 + $0x64] sm:$0xff]   ;;  %10303 = vmatprep.mubr.msk.bf16.mxu0 %vm307_vm0, %v4039_v26  ;;  %v559_v26 = vadd.f32 %v11686_v8, %v11675_v62  ;;  %v10923_v8 = vld [vmem:[%s11195_s8 + $0x7c] ss:$0 sps:$4 sm:$0x11]  }
 0x126   : > { %v11983_v14 = vpop.f32.mrf.mxu0  ;;  %v11985_v34 = vpop.f32.mrf.mxu1  ;;  %v4052_v36 = vshll.u32 %v10918_v2, 16  ;;  %v4056_v10 = vshrl.u32 %v10918_v2, 16  ;;  %v4062_v2 = vrot.slane %v4060_v55, 1  ;;  %v1085_v55 = vadd.f32 %v11768_v37, %v11764_v47 }
 0x127   : > { %v4047_v50 = vsel %vm657_vm2, %v4042_v18, %v4046_v9  ;;  %v4050_v19 = vor.u32 %v4048_v16, %v4046_v9  ;;  %v567_v18 = vadd.f32 %v11673_v60, %v11667_v57  ;;  %v10922_v9 = vld [vmem:[%s11195_s8 + $0x74] sm:$0xff]   ;;  %v1087_v57 = vadd.f32 %v11761_v44, %v11759_v40 }
 0x128   : > { %v11990_v63 = vpop.f32.mrf.mxu0  ;;  %v11992_v52 = vpop.f32.mrf.mxu1  ;;  %v4054_v38 = vrot.slane %v4052_v36, 1  ;;  %v4068_v62 = vshll.u32 %v10922_v9, 16 }
 0x129   : > { %v836_v16 = vadd.f32 %v11766_v49, %v567_v18  ;;  %v1237_v40 = vadd.f32 %v11875_v61, %v1087_v57  ;;  %v4076_v18 = vshll.u32 %v10923_v8, 16  ;;  %v575_v57 = vadd.f32 %v11720_v25, %v11708_v42 }
 0x12a   : > { %v11997_v7 = vpop.f32.mrf.mxu0  ;;  %v11999_v17 = vpop.f32.mrf.mxu1  ;;  %10304 = vmatmul.mubr.msk.bf16.vlgmr.msra.gmra.mxu0 %vm307_vm0, %v4047_v50  ;;  %v4058_v24 = vor.u32 %v4056_v10, %v4054_v38  ;;  %v4055_v0 = vsel %vm657_vm2, %v4050_v19, %v4054_v38  ;;  %v834_v50 = vadd.f32 %v11773_v3, %v559_v26  ;;  %v4072_v10 = vshrl.u32 %v10922_v9, 16 }
 0x12b   : > { %10307 = vmatprep.mubr.msk.bf16.mxu0 %vm307_vm0, %v4055_v0  ;;  %v4064_v0 = vshrl.u32 %v10919_v28, 16  ;;  %v9004_v3 = vcombine.low %v11893_v29, %v11923_v35  ;;  %v1088_v19 = vadd.f32 %v11775_v59, %v836_v16  ;;  %v4070_v44 = vrot.slane %v4068_v62, 1 }
 0x12c   : > { %v12004_v6 = vpop.f32.mrf.mxu0  ;;  %v12013_v33 = vpop.f32.mrf.mxu1  ;;  %v4063_v60 = vsel %vm657_vm2, %v4058_v24, %v4062_v2  ;;  %v583_v24 = vadd.f32 %v11706_v41, %v11698_v54  ;;  %v1086_v47 = vadd.f32 %v11782_v21, %v834_v50  ;;  %v9005_v26 = vcombine.low %v11926_v48, %v11929_v20 }
 0x12d   : > { %v4066_v28 = vor.u32 %v4064_v0, %v4062_v2  ;;  %v1235_v9 = vadd.f32 %v11879_v13, %v1085_v55  ;;  %v1238_v59 = vadd.f32 %v11895_v30, %v1088_v19  ;;  %v4074_v61 = vor.u32 %v4072_v10, %v4070_v44  ;;  %v13982_v10 = vld [vmem:[#allocation14_spill] sm:$0xff] }
 0x12e   : > { %v12015_v36 = vpop.f32.mrf.mxu0  ;;  %v12030_v38 = vpop.f32.mrf.mxu1  ;;  %v4078_v16 = vrot.slane %v4076_v18, 1  ;;  %v840_v2 = vadd.f32 %v11799_v45, %v583_v24  ;;  %v1479_v50 = vadd.f32 %v11881_v12, %v1237_v40  ;;  %v1091_v30 = vadd.f32 %v11794_v31, %v11791_v11  ;;  %v13983_v40 = vld [vmem:[#allocation31_spill] sm:$0xff] }
 0x12f   : > { %v4071_v21 = vsel %vm657_vm2, %v4066_v28, %v4070_v44  ;;  %v838_v13 = vadd.f32 %v11806_v53, %v575_v57  ;;  %v1477_v25 = vadd.f32 %v11897_v22, %v1235_v9  ;;  %v1480_v62 = vadd.f32 %v11903_v43, %v1238_v59  ;;  %v13981_v43 = vld [vmem:[#allocation6_spill] sm:$0xff]  ;;  %v13985_v18 = vld [vmem:[#allocation7_spill] sm:$0xff]  ;;  %v13988_v28 = vld [vmem:[#allocation32_spill] sm:$0xff] }
 0x130   : > { %v12022_v1 = vpop.f32.mrf.mxu0  ;;  %v12050_v54 = vpop.f32.mrf.mxu1  ;;  %v1731_v8 = vadd.f32 %v11980_v51, %v1479_v50  ;;  %v4079_v45 = vsel %vm657_vm2, %v4074_v61, %v4078_v16  ;;  %v1089_v12 = vadd.f32 %v11801_v32, %v11797_v15  ;;  %v1092_v11 = vadd.f32 %v11808_v23, %v840_v2  ;;  %v13989_v9 = vld [vmem:[#allocation35_spill] sm:$0xff]  ;;  %v13990_v57 = vld [vmem:[#allocation16_spill] sm:$0xff] }
 0x131   : > { %v1729_v53 = vadd.f32 %v11983_v14, %v1477_v25  ;;  %v1732_v22 = vadd.f32 %v11990_v63, %v1480_v62  ;;  %v599_v51 = vadd.f32 %v13981_v43, %v11731_v5  ;;  %v1090_v19 = vadd.f32 %v13982_v10, %v838_v13  ;;  %v13986_v14 = vld [vmem:[#allocation9_spill] sm:$0xff]  ;;  %v13987_v63 = vld [vmem:[#allocation23_spill] sm:$0xff] }
 0x132   : > { %v12032_v49 = vpop.f32.mrf.mxu0  ;;  %10308 = vmatmul.mubr.msk.bf16.gmra.mxu0 %vm307_vm0, %v4063_v60  ;;  %v1236_v60 = vadd.f32 %v11901_v27, %v1086_v47  ;;  %v1241_v27 = vadd.f32 %v11913_v56, %v1091_v30  ;;  %v10094_v55 = vpop.f32.mrf.mxu1  ;;  %v1239_v15 = vadd.f32 %v13983_v40, %v1089_v12  ;;  %v13984_v56 = vld [vmem:[#allocation33_spill] sm:$0xff]  ;;  %v1881_v23 = vadd.f32 %v11985_v34, %v1731_v8  ;;  %v13993_v30 = vld [vmem:[#allocation24_spill] sm:$0xff]  ;;  %v13995_v8 = vld [vmem:[#allocation34_spill] sm:$0xff] }
 0x133   : > { %10311 = vmatprep.mubr.msk.bf16.mxu0 %vm307_vm0, %v4071_v21  ;;  %v1242_v44 = vadd.f32 %v13984_v56, %v1092_v11  ;;  %v591_v24 = vadd.f32 %v13986_v14, %v13985_v18  ;;  %v844_v47 = vadd.f32 %v13987_v63, %v599_v51  ;;  %v1240_v59 = vadd.f32 %v13989_v9, %v1090_v19  ;;  %v13991_v21 = vld [vmem:[#allocation18_spill] sm:$0xff]  ;;  %v13994_v25 = vld [vmem:[#allocation25_spill] sm:$0xff]  ;;  %v13996_v11 = vld [vmem:[#allocation36_spill] sm:$0xff] }
 0x134   : > { %v12041_v37 = vpop.f32.mrf.mxu0  ;;  %v1478_v31 = vadd.f32 %v11915_v46, %v1236_v60  ;;  %v1483_v5 = vadd.f32 %v13988_v28, %v1241_v27  ;;  %v1851_v61 = vpop.f32.mrf.mxu1  ;;  %v1095_v2 = vadd.f32 %v13991_v21, %v13990_v57  ;;  %v1879_v50 = vadd.f32 %v11992_v52, %v1729_v53  ;;  %v13997_v52 = vld [vmem:[#allocation26_spill] sm:$0xff]  ;;  %v14002_v63 = vld [vmem:[#allocation41_spill] sm:$0xff]  ;;  %v14003_v57 = vld [vmem:[#allocation40_spill] sm:$0xff] }
 0x135   : > { %v1882_v34 = vadd.f32 %v11999_v17, %v1732_v22  ;;  %v842_v62 = vadd.f32 %v13994_v25, %v591_v24  ;;  %v1096_v53 = vadd.f32 %v13997_v52, %v844_v47  ;;  %v13998_v17 = vld [vmem:[#allocation37_spill] sm:$0xff]  ;;  %v13999_v19 = vld [vmem:[#allocation38_spill] sm:$0xff] }
 0x136   : > { %v12052_v41 = vpop.f32.mrf.mxu0  ;;  %v1730_v46 = vadd.f32 %v11997_v7, %v1478_v31  ;;  %v13992_v7 = vld [vmem:[#allocation21_spill] sm:$0xff]  ;;  %v1735_v12 = vadd.f32 %v12004_v6, %v1483_v5  ;;  %v1484_v31 = vadd.f32 %v13996_v11, %v1242_v44  ;;  %v1245_v22 = vadd.f32 %v13998_v17, %v1095_v2  ;;  %v10097_v56 = vpop.f32.mrf.mxu1  ;;  %v14005_v25 = vld [vmem:[#allocation42_spill] sm:$0xff] }
 0x137   : > { %v1093_v13 = vadd.f32 %v13993_v30, %v13992_v7  ;;  %v1482_v40 = vadd.f32 %v13999_v19, %v1240_v59  ;;  %v14000_v44 = vld [vmem:[#allocation29_spill] sm:$0xff]  ;;  %v1246_v28 = vadd.f32 %v14002_v63, %v1096_v53 }
 0x138   : > { %v12062_v42 = vpop.f32.mrf.mxu0  ;;  %v1880_v43 = vadd.f32 %v12013_v33, %v1730_v46  ;;  %v1094_v24 = vadd.f32 %v14000_v44, %v842_v62  ;;  %v14001_v33 = vld [vmem:[#allocation39_spill] sm:$0xff]  ;;  %v1885_v47 = vadd.f32 %v12030_v38, %v1735_v12  ;;  %v1487_v21 = vadd.f32 %v14003_v57, %v1245_v22 }
 0x139   : > { %v1243_v46 = vadd.f32 %v14001_v33, %v1093_v13  ;;  %v1734_v9 = vadd.f32 %v12032_v49, %v1482_v40 }
 0x13a   : > { %v12071_v0 = vpop.f32.mrf.mxu0  ;;  %10312 = vmatmul.mubr.msk.bf16.gmra.mxu0 %vm307_vm0, %v4079_v45  ;;  %v1481_v45 = vadd.f32 %v13995_v8, %v1239_v15  ;;  %v1736_v15 = vadd.f32 %v12022_v1, %v1484_v31  ;;  %v14004_v1 = vld [vmem:[#allocation43_spill] sm:$0xff]  ;;  %v1739_v62 = vadd.f32 %v12041_v37, %v1487_v21  ;;  %v10844_v8 = vld [vmem:[%s13923_s2 + $0x10] sm:$0xff]  }
 0x13b   : > { %v1244_v2 = vadd.f32 %v14004_v1, %v1094_v24  ;;  %v1485_v38 = vadd.f32 %v14005_v25, %v1243_v46  ;;  %v14008_v1 = vld [vmem:[#allocation2_spill] sm:$0xff]  ;;  %v10875_v25 = vld [vmem:[%s13923_s2 + $0xb8] sm:$0xff]  }
 0x13c   : > { %v10109_v32 = vpop.f32.mrf.mxu0  ;;  %v1886_v7 = vadd.f32 %v10094_v55, %v1736_v15  ;;  %v1889_v22 = vadd.f32 %v10097_v56, %v1739_v62  ;;  %v10854_v56 = vld [vmem:[%s13923_s2] sm:$0xff]   ;;  %v14014_v62 = vld [vmem:[#allocation11_spill] sm:$0xff] }
 0x13d   : > { %v2123_v60 = vadd.f32 %v10109_v32, %v1881_v23  ;;  %v1733_v32 = vadd.f32 %v12015_v36, %v1481_v45  ;;  %v14006_v45 = vld [vmem:[#allocation44_spill] sm:$0xff] }
 0x13e   : > { %v2074_v16 = vpop.f32.mrf.mxu0  ;;  %v1488_v12 = vadd.f32 %v14006_v45, %v1246_v28  ;;  %v14015_v45 = vld [vmem:[#allocation12_spill] sm:$0xff] }
 0x13f   : > { %v2121_v51 = vadd.f32 %v2074_v16, %v1879_v50  ;;  %v2135_v6 = vmax.f32 %v2123_v60, 0.0  ;;  %v1864_v50 = vpop.f32.mrf.mxu1  ;;  %v1883_v60 = vadd.f32 %v12050_v54, %v1733_v32  ;;  %v14007_v54 = vld [vmem:[#allocation45_spill] sm:$0xff] }
 0x140   : > { %v10110_v27 = vpop.f32.mrf.mxu0  ;;  %v1486_v55 = vadd.f32 %v14007_v54, %v1244_v2  ;;  %v1740_v37 = vadd.f32 %v12062_v42, %v1488_v12  ;;  %v10862_v2 = vld [vmem:[%s13923_s2 + $0x70] sm:$0xff]   ;;  %v14016_v12 = vld [vmem:[#allocation13_spill] sm:$0xff]  ;;  %v10890_v54 = vld [vmem:[%s13923_s2 + $0xa0] sm:$0xff]  }
 0x141   : > { %v2124_v10 = vadd.f32 %v10110_v27, %v1882_v34  ;;  %v2133_v59 = vmax.f32 %v2121_v51, 0.0  ;;  %v1884_v27 = vadd.f32 %v1851_v61, %v1734_v9  ;;  %v10098_v51 = vpop.f32.mrf.mxu1  ;;  %v11118_v61 = vld [vmem:[%s13923_s2 + $0x18] sm:$0xff]  }
 0x142   : > { %v2077_v23 = vpop.f32.mrf.mxu0  ;;  %v1738_v40 = vadd.f32 %v12071_v0, %v1486_v55 }
 0x143   : > { %v2136_v18 = vmax.f32 %v2124_v10, 0.0  ;;  %v2122_v14 = vadd.f32 %v2077_v23, %v1880_v43  ;;  %v1737_v43 = vadd.f32 %v12052_v41, %v1485_v38  ;;  %v10848_v41 = vld [vmem:[%s13923_s2 + $0x8] sm:$0xff]   ;;  %v1867_v15 = vpop.f32.mrf.mxu1  ;;  %v14013_v38 = vld [vmem:[#allocation10_spill] sm:$0xff] }
 0x144   : > { %v10113_v5 = vpop.f32.mrf.mxu0  ;;  %v1888_v46 = vadd.f32 %v1867_v15, %v1738_v40 }
 0x145   : > { %v2146_v36 = vpack.c.bf16 %v2136_v18, %v2135_v6  ;;  %v2134_v16 = vmax.f32 %v2122_v14, 0.0  ;;  %v2127_v13 = vadd.f32 %v10113_v5, %v1885_v47  ;;  %v1887_v18 = vadd.f32 %v1864_v50, %v1737_v43  ;;  %v14009_v50 = vld [vmem:[#allocation3_spill] sm:$0xff] }
 0x146   : > { %v2090_v34 = vpop.f32.mrf.mxu0  ;;  %v1890_v14 = vadd.f32 %v10098_v51, %v1740_v37  ;;  %v10897_v37 = vld [vmem:[%s11195_s8 + $0x50] sm:$0xff]  }
 0x147   : > { %v2145_v30 = vpack.c.bf16 %v2134_v16, %v2133_v59  ;;  %v2125_v11 = vadd.f32 %v2090_v34, %v1883_v60  ;;  %v2139_v52 = vmax.f32 %v2127_v13, 0.0  ;;  %v10858_v59 = vld [vmem:[%s13923_s2 + $0x78] sm:$0xff]   ;;  %v14010_v34 = vld [vmem:[#allocation4_spill] sm:$0xff]  ;;  %v10865_v60 = vld [vmem:[%s13923_s2 + $0x68] sm:$0xff]  }
 0x148   : > { %v10114_v49 = vpop.f32.mrf.mxu0  ;;  %v14012_v13 = vld [vmem:[#allocation8_spill] sm:$0xff] }
 0x149   : > { %v2128_v31 = vadd.f32 %v10114_v49, %v1886_v7  ;;  %10123 = vmatprep.mubr.msk.bf16.mxu1 %vm2163_vm3, %v2145_v30  ;;  %v2137_v32 = vmax.f32 %v2125_v11, 0.0  ;;  %v10869_v7 = vld [vmem:[%s13923_s2 + $0x60] sm:$0xff]   ;;  %v14011_v30 = vld [vmem:[#allocation5_spill] sm:$0xff]  ;;  %v10881_v49 = vld [vmem:[%s13923_s2 + $0xb0] sm:$0xff]  }
 0x14a   : > { %v2093_v10 = vpop.f32.mrf.mxu0  ;;  %10124 = vmatmul.mubr.msk.bf16.vlgmr.msra.gmra.mxu1 %vm2163_vm3, %v2146_v36  ;;  %v10896_v11 = vld [vmem:[%s11195_s8 + $0x48] sm:$0xff]  }
 0x14b   : > { %v2140_v53 = vmax.f32 %v2128_v31, 0.0  ;;  %v2126_v17 = vadd.f32 %v2093_v10, %v1884_v27  ;;  %10156 = vmatpush3.bf16.msra.mxu1 %v11118_v61  ;;  %v10884_v27 = vld [vmem:[%s13923_s2 + $0xa8] sm:$0xff]   ;;  %v3395_v51 = vshll.u32 %v10896_v11, 16  ;;  %v10898_v61 = vld [vmem:[%s13923_s2 + $0xf8] sm:$0xff]  }
 0x14c   : > { %v10117_v19 = vpop.f32.mrf.mxu0  ;;  %10157 = vmatprep.subr.bf16.mxu1 %v10844_v8  ;;  %v14017_v10 = vld [vmem:[#allocation15_spill] sm:$0xff] }
 0x14d   : > { %v2148_v23 = vpack.c.bf16 %v2140_v53, %v2139_v52  ;;  %v2138_v42 = vmax.f32 %v2126_v17, 0.0  ;;  %v2131_v24 = vadd.f32 %v10117_v19, %v1889_v22  ;;  %v14018_v52 = vld [vmem:[#allocation27_spill] sm:$0xff]  ;;  %v3397_v17 = vrot.slane %v3395_v51, 1  ;;  %v10903_v22 = vld [vmem:[%s11195_s8 + $0x58] sm:$0xff]  }
 0x14e   : > { %v2106_v6 = vpop.f32.mrf.mxu0  ;;  %v3403_v19 = vshll.u32 %v10897_v37, 16 }
 0x14f   : > { %v2147_v44 = vpack.c.bf16 %v2138_v42, %v2137_v32  ;;  %10158 = vmatpush3.bf16.msra.mxu1 %v10844_v8  ;;  %v2129_v63 = vadd.f32 %v2106_v6, %v1887_v18  ;;  %v2143_v47 = vmax.f32 %v2131_v24, 0.0  ;;  %v10895_v8 = vld [vmem:[%s11195_s8 + $0x40] sm:$0xff]   ;;  %v3407_v32 = vshrl.u32 %v10897_v37, 16  ;;  %v14019_v42 = vld [vmem:[#allocation28_spill] sm:$0xff]  ;;  %v10910_v24 = vld [vmem:[%s11195_s8 + $0x68] sm:$0xff]  }
 0x150   : > { %v10118_v33 = vpop.f32.mrf.mxu0  ;;  %10159 = vmatprep.subr.bf16.mxu1 %v10848_v41  ;;  %v3390_v31 = vshll.u32 %v10895_v8, 16  ;;  %v3388_v55 = vshrl.u32 %v10895_v8, 16  ;;  %v3405_v15 = vrot.slane %v3403_v19, 1  ;;  %v10904_v6 = vld [vmem:[%s11195_s8 + $0x60] sm:$0xff]   ;;  %v14020_v8 = vld [vmem:[#allocation17_spill] sm:$0xff] }
 0x151   : > { %v2132_v28 = vadd.f32 %v10118_v33, %v1890_v14  ;;  %10127 = vmatprep.mubr.msk.bf16.mxu1 %vm2163_vm3, %v2147_v44  ;;  %v2141_v36 = vmax.f32 %v2129_v63, 0.0  ;;  %v3419_v33 = vshll.u32 %v10904_v6, 16  ;;  %v10902_v63 = vld [vmem:[%s13923_s2 + $0xf0] sm:$0xff]  }
 0x152   : > { %v2109_v0 = vpop.f32.mrf.mxu0  ;;  %10128 = vmatmul.mubr.msk.bf16.gmra.mxu1 %vm2163_vm3, %v2148_v23  ;;  %v3392_v43 = vrot.slane %v3390_v31, 1  ;;  %v3411_v23 = vshll.u32 %v10903_v22, 16  ;;  %v3409_v14 = vor.u32 %v3407_v32, %v3405_v15  ;;  %v14024_v31 = vld [vmem:[#allocation22_spill] sm:$0xff]  ;;  %v10927_v32 = vld [vmem:[%s13923_s2 + $0x30] sm:$0xff]  }
 0x153   : > { %v2144_v5 = vmax.f32 %v2132_v28, 0.0  ;;  %v2130_v9 = vadd.f32 %v2109_v0, %v1888_v46  ;;  %10160 = vmatpush3.bf16.msra.mxu1 %v10848_v41  ;;  %v3399_v41 = vshrl.u32 %v10896_v11, 16  ;;  %v3415_v46 = vshrl.u32 %v10903_v22, 16  ;;  %v14023_v11 = vld [vmem:[#allocation20_spill] sm:$0xff] }
 0x154   : > { %10161 = vmatprep.subr.bf16.mxu1 %v10854_v56  ;;  %v3393_v53 = vor.u32 %v3392_v43, %v3388_v55  ;;  %v3413_v44 = vrot.slane %v3411_v23, 1  ;;  %v3423_v0 = vshrl.u32 %v10904_v6, 16  ;;  %v14026_v43 = vld [vmem:[#allocation30_spill] sm:$0xff] }
 0x155   : > { %v2150_v16 = vpack.c.bf16 %v2144_v5, %v2143_v47  ;;  %v2142_v57 = vmax.f32 %v2130_v9, 0.0  ;;  %v3401_v18 = vor.u32 %v3399_v41, %v3397_v17  ;;  %v3427_v47 = vshll.u32 %v10910_v24, 16  ;;  %v10929_v6 = vld [vmem:[%s13923_s2 + $0x20] sm:$0xff]  }
 0x156   : > { %v3398_v40 = vsel %vm657_vm2, %v3393_v53, %v3397_v17  ;;  %v3414_v28 = vsel %vm657_vm2, %v3409_v14, %v3413_v44  ;;  %v3421_v5 = vrot.slane %v3419_v33, 1  ;;  %v3417_v9 = vor.u32 %v3415_v46, %v3413_v44  ;;  %v4386_v14 = vld [vmem:[%s11195_s8 + $0x68] sm:$0xf]  ;;  %v4387_v44 = vld [vmem:[%s11195_s8 + $0x6c] sm:$0xf] }
 0x157   : > { %v2149_v21 = vpack.c.bf16 %v2142_v57, %v2141_v36  ;;  %10162 = vmatpush3.bf16.msra.mxu1 %v10854_v56  ;;  %v3406_v56 = vsel %vm657_vm2, %v3401_v18, %v3405_v15  ;;  %v10907_v36 = vld [vmem:[%s13923_s2 + $0xe8] sm:$0xff]   ;;  %v3429_v57 = vrot.slane %v3427_v47, 1  ;;  %v14027_v51 = vcombine.low %v11849_v58, %v14026_v43  ;;  %v4385_v18 = vld [vmem:[%s11195_s8 + $0x64] sm:$0xf] }
 0x158   : > { %10195 = vmatprep.subr.bf16.mxu1 %v10858_v59  ;;  %v9063_v33 = vcombine.low %v4385_v18, %v4386_v14  ;;  %v12320_v47 = vcombine.low %v4386_v14, %v4387_v44 }
 0x159   : > { %10131 = vmatprep.mubr.msk.bf16.mxu1 %vm2163_vm3, %v2149_v21  ;;  %v12209_v21 = vpop.f32.mrf.mxu0 }
 0x15a   : > { %10132 = vmatmul.mubr.msk.bf16.gmra.mxu1 %vm2163_vm3, %v2150_v16  ;;  %v3425_v16 = vor.u32 %v3423_v0, %v3421_v5  ;;  %10339 = vmatprep.mubr.msk.bf16.mxu0 %vm307_vm0, %v9063_v33  ;;  %v4390_v0 = vld [vmem:[%s11195_s8 + $0x78] sm:$0xf]  ;;  %v2259_v33 = vld [vmem:[%s12359_s6] sm:$0xff] }
 0x15b   : > { %10163 = vmatprep.mubr.msk.bf16.mxu1 %vm307_vm0, %v14008_v1  ;;  %v3422_v1 = vsel %vm657_vm2, %v3417_v9, %v3421_v5  ;;  %v4391_v5 = vld [vmem:[%s11195_s8 + $0x7c] sm:$0xf]  ;;  %v4392_v9 = vld [vmem:[%s11195_s8 + $0x80] sm:$0xf] }
 0x162   : > { %10164 = vmatmul.mubr.msk.bf16.vlgmr.msra.gmra.mxu1 %vm307_vm0, %v14009_v50 }
 0x163   : > { %10196 = vmatpush3.bf16.msra.mxu1 %v10858_v59  ;;  %10167 = vmatprep.mubr.msk.bf16.mxu1 %vm307_vm0, %v14010_v34  ;;  %v10911_v59 = vld [vmem:[%s11195_s8 + $0x70] ss:$0 sps:$4 sm:$0x11]   ;;  %v3430_v34 = vsel %vm657_vm2, %v3425_v16, %v3429_v57  ;;  %v10935_v16 = vld [vmem:[%s13923_s2 + $0x58] sm:$0xff]  }
 0x164   : > { %10197 = vmatprep.subr.bf16.mxu1 %v10862_v2  ;;  %v3435_v50 = vshll.u32 %v10911_v59, 16 }
 0x167   : > { %10198 = vmatpush3.bf16.msra.mxu1 %v10862_v2  ;;  %v3431_v2 = vshrl.u32 %v10910_v24, 16  ;;  %v4388_v24 = vld [vmem:[%s11195_s8 + $0x70] sm:$0xf] }
 0x168   : > { %10199 = vmatprep.subr.bf16.mxu1 %v10865_v60  ;;  %v9064_v46 = vcombine.low %v4387_v44, %v4388_v24  ;;  %v12369_v44 = vld [vmem:[%s11195_s8 + $0x74] sm:$0xff]  }
 0x16a   : > { %10168 = vmatmul.mubr.msk.bf16.gmra.mxu1 %vm307_vm0, %v14011_v30  ;;  %v3433_v30 = vor.u32 %v3431_v2, %v3429_v57  ;;  %v9066_v57 = vcombine.low %v4391_v5, %v4392_v9 }
 0x16b   : > { %10200 = vmatpush3.bf16.msra.mxu1 %v10865_v60  ;;  %10171 = vmatprep.mubr.msk.bf16.mxu1 %vm307_vm0, %v14012_v13  ;;  %v10913_v60 = vld [vmem:[%s13923_s2 + $0xe0] sm:$0xff]   ;;  %v3437_v13 = vrot.slane %v3435_v50, 1  ;;  %v10941_v50 = vld [vmem:[%s13923_s2 + $0x50] sm:$0xff]  }
 0x16c   : > { %10201 = vmatprep.subr.bf16.mxu1 %v10869_v7 }
 0x16f   : > { %10202 = vmatpush3.bf16.msra.mxu1 %v10869_v7  ;;  %v12217_v7 = vpop.f32.mrf.mxu0 }
 0x170   : > { %10235 = vmatprep.subr.bf16.mxu1 %v10875_v25 }
 0x172   : > { %10172 = vmatmul.mubr.msk.bf16.gmra.mxu1 %vm307_vm0, %v14013_v38  ;;  %v3438_v38 = vsel %vm657_vm2, %v3433_v30, %v3437_v13  ;;  %v4384_v30 = vld [vmem:[%s11195_s8 + $0x60] sm:$0x8] }
 0x173   : > { %10203 = vmatprep.mubr.msk.bf16.mxu1 %vm307_vm0, %v14014_v62  ;;  %v11119_v62 = vld [vmem:[%s13924_s3 + $0x8] sm:$0xff]  }
 0x17a   : > { %10204 = vmatmul.mubr.msk.bf16.vlgmr.msra.gmra.mxu1 %vm307_vm0, %v14015_v45  ;;  %v14021_v45 = vld [vmem:[#allocation19_spill] sm:$0xff] }
 0x17b   : > { %10236 = vmatpush3.bf16.msra.mxu1 %v10875_v25  ;;  %10207 = vmatprep.mubr.msk.bf16.mxu1 %vm307_vm0, %v14016_v12  ;;  %v12220_v25 = vpop.f32.mrf.mxu0  ;;  %v14022_v12 = vcombine.low %v14020_v8, %v14021_v45  ;;  %v12347_v8 = vld [vmem:[%s11195_s8 + $0x90] sm:$0xf] }
 0x17c   : > { %10237 = vmatprep.subr.bf16.mxu1 %v10881_v49 }
 0x17f   : > { %10238 = vmatpush3.bf16.msra.mxu1 %v10881_v49  ;;  %v12227_v49 = vpop.f32.mrf.mxu0 }
 0x180   : > { %10239 = vmatprep.subr.bf16.mxu1 %v10884_v27 }
 0x182   : > { %10208 = vmatmul.mubr.msk.bf16.gmra.mxu1 %vm307_vm0, %v14017_v10  ;;  %v11120_v10 = vld [vmem:[%s13924_s3] sm:$0xff]  }
 0x183   : > { %10240 = vmatpush3.bf16.msra.mxu1 %v10884_v27  ;;  %10211 = vmatprep.mubr.msk.bf16.mxu1 %vm307_vm0, %v14018_v52  ;;  %v12233_v27 = vpop.f32.mrf.mxu0  ;;  %v14028_v52 = vcombine.low %v11887_v39, %v11890_v4 }
 0x184   : > { %10241 = vmatprep.subr.bf16.mxu1 %v10890_v54 }
 0x185   : > { %v12239_v55 = vpop.f32.mrf.mxu0 }
 0x187   : > { %10242 = vmatpush3.bf16.msra.mxu1 %v10890_v54  ;;  %v14025_v54 = vcombine.low %v14023_v11, %v14024_v31  ;;  %v12248_v37 = vpop.f32.mrf.mxu0  ;;  %v10948_v31 = vld [vmem:[%s13923_s2 + $0x48] sm:$0xff]  }
 0x188   : > { %10275 = vmatprep.subr.bf16.mxu1 %v10898_v61 }
 0x189   : > { %v12254_v53 = vpop.f32.mrf.mxu0 }
 0x18a   : > { %10212 = vmatmul.mubr.msk.bf16.gmra.mxu1 %vm307_vm0, %v14019_v42  ;;  %v10928_v42 = vld [vmem:[%s13923_s2 + $0x28] sm:$0xff]  }
 0x18b   : > { %10243 = vmatprep.mubr.msk.bf16.mxu1 %vm307_vm0, %v3398_v40  ;;  %v12260_v58 = vpop.f32.mrf.mxu0 }
 0x18d   : > { %v12266_v17 = vpop.f32.mrf.mxu0 }
 0x192   : > { %10244 = vmatmul.mubr.msk.bf16.vlgmr.msra.gmra.mxu1 %vm307_vm0, %v3406_v56 }
 0x193   : > { %10276 = vmatpush3.bf16.msra.mxu1 %v10898_v61  ;;  %10247 = vmatprep.mubr.msk.bf16.mxu1 %vm307_vm0, %v3414_v28  ;;  %v12268_v61 = vpop.f32.mrf.mxu0  ;;  %v4389_v28 = vld [vmem:[%s11195_s8 + $0x74] sm:$0xf] }
 0x194   : > { %10277 = vmatprep.subr.bf16.mxu1 %v10902_v63  ;;  %14029 = vst [vmem:[#allocation6_spill] sm:$0xff] %v12268_v61  ;;  %v9065_v59 = vcombine.low %v4389_v28, %v4390_v0  ;;  %v9081_v13 = vcombine.low %v4388_v24, %v4389_v28 }
 0x195   : > { %v12270_v39 = vpop.f32.mrf.mxu0 }
 0x196   : > { %14030 = vst [vmem:[#allocation14_spill] sm:$0xff] %v12270_v39  ;;  %v4593_v43 = vshrl.u32 %v9081_v13, 16  ;;  %v12650_v39 = vld [vmem:[%s11195_s8 + $0xa8] sm:$0xf] }
 0x197   : > { %10278 = vmatpush3.bf16.msra.mxu1 %v10902_v63  ;;  %v12272_v4 = vpop.f32.mrf.mxu0 }
 0x198   : > { %10279 = vmatprep.subr.bf16.mxu1 %v10907_v36 }
 0x199   : > { %v12274_v22 = vpop.f32.mrf.mxu0 }
 0x19a   : > { %10248 = vmatmul.mubr.msk.bf16.gmra.mxu1 %vm307_vm0, %v3422_v1  ;;  %v10934_v1 = vld [vmem:[%s13923_s2 + $0x18] sm:$0xff]  }
 0x19b   : > { %10280 = vmatpush3.bf16.msra.mxu1 %v10907_v36  ;;  %10251 = vmatprep.mubr.msk.bf16.mxu1 %vm307_vm0, %v3430_v34  ;;  %v12276_v35 = vpop.f32.mrf.mxu0  ;;  %v4393_v34 = vld [vmem:[%s11195_s8 + $0x84] sm:$0xf] }
 0x19c   : > { %10281 = vmatprep.subr.bf16.mxu1 %v10913_v60 }
 0x19d   : > { %v12278_v29 = vpop.f32.mrf.mxu0 }
 0x19f   : > { %10282 = vmatpush3.bf16.msra.mxu1 %v10913_v60  ;;  %v4394_v60 = vld [vmem:[%s11195_s8 + $0x88] sm:$0xf] }
 0x1a0   : > { %10315 = vmatprep.subr.bf16.mxu1 %v11119_v62  ;;  %v9067_v45 = vcombine.low %v4393_v34, %v4394_v60 }
 0x1a2   : > { %10252 = vmatmul.mubr.msk.bf16.gmra.mxu1 %vm307_vm0, %v3438_v38  ;;  %v12343_v38 = vcombine.low %v4390_v0, %v4391_v5 }
 0x1a3   : > { %10283 = vmatprep.mubr.msk.bf16.mxu1 %vm307_vm0, %v14022_v12 }
 0x1aa   : > { %10284 = vmatmul.mubr.msk.bf16.vlgmr.msra.gmra.mxu1 %vm307_vm0, %v14025_v54  ;;  %v10951_v54 = vld [vmem:[%s11195_s8 + $0x64] sm:$0xff]  }
 0x1ab   : > { %10287 = vmatprep.mubr.msk.bf16.mxu1 %vm307_vm0, %v14027_v51  ;;  %10316 = vmatpush3.bf16.msra.mxu1 %v11119_v62  ;;  %v4395_v62 = vld [vmem:[%s11195_s8 + $0x8c] sm:$0xf]  ;;  %v4596_v51 = vshll.u32 %v9081_v13, 16  ;;  %v4815_v28 = vshrl.u32 %v10951_v54, 16 }
 0x1ac   : > { %10317 = vmatprep.subr.bf16.mxu1 %v11120_v10  ;;  %v9068_v11 = vcombine.low %v4395_v62, %v12347_v8 }
 0x1ad   : > { %v4598_v14 = vrot.slane %v4596_v51, 4  ;;  %v2260_v51 = vld [vmem:[%s12359_s6 + $0x8] sm:$0xff] }
 0x1af   : > { %10318 = vmatpush3.bf16.msra.mxu1 %v11120_v10  ;;  %v12362_v10 = vcombine.low %v4392_v9, %v4393_v34  ;;  %v2274_v34 = vld [vmem:[%s12359_s6 + $0x10] sm:$0xff] }
 0x1b0   : > { %10351 = vmatprep.subr.bf16.mxu1 %v10934_v1  ;;  %v4830_v1 = vshll.u32 %v12369_v44, 16 }
 0x1b2   : > { %10288 = vmatmul.mubr.msk.bf16.gmra.mxu1 %vm307_vm0, %v14028_v52  ;;  %v12364_v52 = vcombine.low %v4394_v60, %v4395_v62 }
 0x1b3   : > { %10291 = vmatprep.mubr.msk.bf16.mxu1 %vm307_vm0, %v9004_v3  ;;  %v12280_v3 = vpop.f32.mrf.mxu0 }
 0x1b5   : > { %v12282_v19 = vpop.f32.mrf.mxu0 }
 0x1b7   : > { %v12284_v20 = vpop.f32.mrf.mxu0 }
 0x1b9   : > { %v12286_v48 = vpop.f32.mrf.mxu0 }
 0x1ba   : > { %10292 = vmatmul.mubr.msk.bf16.gmra.mxu1 %vm307_vm0, %v9005_v26  ;;  %14031 = vst [vmem:[#allocation31_spill] sm:$0xff] %v12286_v48  ;;  %v10926_v26 = vld [vmem:[%s13923_s2 + $0x38] sm:$0xff]  }
 0x1bb   : > { %v12291_v41 = vpop.f32.mrf.mxu0  ;;  %10331 = vmatprep.subr.bf16.mxu0 %v10926_v26 }
 0x1bc   : > { %14032 = vst [vmem:[#allocation33_spill] sm:$0xff] %v12291_v41  ;;  %10332 = vmatpush3.bf16.msra.mxu0 %v10926_v26  ;;  %v10952_v26 = vld [vmem:[%s11195_s8 + $0x6c] sm:$0xff]  }
 0x1bd   : > { %v12293_v40 = vpop.f32.mrf.mxu0  ;;  %10333 = vmatprep.subr.bf16.mxu0 %v10927_v32  ;;  %v4822_v5 = vshll.u32 %v10952_v26, 16  ;;  %v4826_v9 = vshrl.u32 %v10952_v26, 16 }
 0x1bf   : > { %v12298_v23 = vpop.f32.mrf.mxu0 }
 0x1c0   : > { %10334 = vmatpush3.bf16.msra.mxu0 %v10927_v32  ;;  %14033 = vst [vmem:[#allocation7_spill] sm:$0xff] %v12298_v23  ;;  %v9079_v32 = vcombine.low %v4384_v30, %v4385_v18  ;;  %v10949_v18 = vld [vmem:[%s13923_s2 + $0x40] sm:$0xff]   ;;  %v4824_v30 = vrot.slane %v4822_v5, 1 }
 0x1c1   : > { %10335 = vmatprep.subr.bf16.mxu0 %v10928_v42  ;;  %v12303_v15 = vpop.f32.mrf.mxu0 }
 0x1c2   : > { %14034 = vst [vmem:[#allocation9_spill] sm:$0xff] %v12303_v15  ;;  %v4576_v13 = vshrl.u32 %v9079_v32, 16  ;;  %v4579_v62 = vshll.u32 %v9079_v32, 16  ;;  %v4828_v32 = vor.u32 %v4826_v9, %v4824_v30 }
 0x1c3   : > { %v12312_v56 = vpop.f32.mrf.mxu0 }
 0x1c4   : > { %10336 = vmatpush3.bf16.msra.mxu0 %v10928_v42  ;;  %v4817_v42 = vshll.u32 %v10951_v54, 16  ;;  %v4587_v54 = vshll.u32 %v12320_v47, 16 }
 0x1c5   : > { %10337 = vmatprep.subr.bf16.mxu0 %v10929_v6  ;;  %v12316_v63 = vpop.f32.mrf.mxu0 }
 0x1c6   : > { %v4819_v0 = vrot.slane %v4817_v42, 1  ;;  %v4578_v42 = vrot.slane %v4576_v13, 3 }
 0x1c7   : > { %v12324_v36 = vpop.f32.mrf.mxu0 }
 0x1c8   : > { %10338 = vmatpush3.bf16.msra.mxu0 %v10929_v6  ;;  %v4595_v6 = vrot.slane %v4593_v43, 3  ;;  %v4820_v60 = vor.u32 %v4819_v0, %v4815_v28  ;;  %v2288_v0 = vld [vmem:[%s12359_s6 + $0x20] sm:$0xff] }
 0x1c9   : > { %10371 = vmatprep.subr.bf16.mxu0 %v10935_v16  ;;  %v12334_v2 = vpop.f32.mrf.mxu0 }
 0x1ca   : > { %v4825_v26 = vsel %vm657_vm2, %v4820_v60, %v4824_v30  ;;  %v12403_v30 = vld [vmem:[%s11195_s8 + $0x84] sm:$0xff]  }
 0x1cb   : > { %10340 = vmatmul.mubr.msk.bf16.vlgmr.msra.gmra.mxu0 %vm307_vm0, %v9064_v46  ;;  %v12349_v12 = vpop.f32.mrf.mxu0 }
 0x1cc   : > { %10343 = vmatprep.mubr.msk.bf16.mxu0 %vm307_vm0, %v9065_v59  ;;  %10372 = vmatpush3.bf16.msra.mxu0 %v10935_v16  ;;  %14035 = vst [vmem:[#allocation23_spill] sm:$0xff] %v12349_v12  ;;  %v12378_v59 = vor.u32 %v4598_v14, %v4595_v6  ;;  %v4611_v16 = vshrl.u32 %v12362_v10, 16  ;;  %v4581_v6 = vrot.slane %v4579_v62, 4  ;;  %v2275_v62 = vld [vmem:[%s12359_s6 + $0x18] sm:$0xff]  ;;  %v12645_v12 = vld [vmem:[%s11195_s8 + $0xa4] sm:$0xf] }
 0x1cd   : > { %10373 = vmatprep.subr.bf16.mxu0 %v10941_v50  ;;  %v12372_v46 = vpop.f32.mrf.mxu0 }
 0x1ce   : > { %14036 = vst [vmem:[#allocation32_spill] sm:$0xff] %v12372_v46 }
 0x1d0   : > { %10374 = vmatpush3.bf16.msra.mxu0 %v10941_v50 }
 0x1d1   : > { %10375 = vmatprep.subr.bf16.mxu0 %v10948_v31 }
 0x1d3   : > { %10344 = vmatmul.mubr.msk.bf16.gmra.mxu0 %vm307_vm0, %v9066_v57  ;;  %v4614_v57 = vshll.u32 %v12362_v10, 16  ;;  %v12392_v10 = vpop.f32.mrf.mxu0 }
 0x1d4   : > { %10347 = vmatprep.mubr.msk.bf16.mxu0 %vm307_vm0, %v9067_v45  ;;  %10376 = vmatpush3.bf16.msra.mxu0 %v10948_v31  ;;  %v4584_v31 = vshrl.u32 %v12320_v47, 16  ;;  %14037 = vst [vmem:[#allocation35_spill] sm:$0xff] %v12392_v10  ;;  %v12642_v10 = vld [vmem:[%s11195_s8 + $0xa0] sm:$0xf] }
 0x1d5   : > { %10377 = vmatprep.subr.bf16.mxu0 %v10949_v18 }
 0x1d6   : > { %v4586_v47 = vrot.slane %v4584_v31, 3  ;;  %v4613_v31 = vrot.slane %v4611_v16, 3  ;;  %v2289_v16 = vld [vmem:[%s12359_s6 + $0x28] sm:$0xff] }
 0x1d8   : > { %10378 = vmatpush3.bf16.msra.mxu0 %v10949_v18  ;;  %v10956_v18 = vld [vmem:[%s11195_s8 + $0x7c] sm:$0xff]  }
 0x1db   : > { %10348 = vmatmul.mubr.msk.bf16.gmra.mxu0 %vm307_vm0, %v9068_v11  ;;  %v4832_v11 = vrot.slane %v4830_v1, 1  ;;  %v4582_v1 = vor.u32 %v4581_v6, %v4578_v42  ;;  %v10955_v6 = vld [vmem:[%s13923_s2 + $0x98] sm:$0xff]  }
 0x1dc   : > { %10379 = vmatprep.mubr.msk.bf16.mxu0 %vm307_vm0, %v4825_v26  ;;  %10411 = vmatprep.subr.bf16.mxu0 %v10955_v6 }
 0x1dd   : > { %v4833_v5 = vsel %vm657_vm2, %v4828_v32, %v4832_v11 }
 0x1e3   : > { %10380 = vmatmul.mubr.msk.bf16.vlgmr.msra.gmra.mxu0 %vm307_vm0, %v4833_v5  ;;  %v4605_v5 = vshll.u32 %v12343_v38, 16 }
 0x1e4   : > { %10412 = vmatpush3.bf16.msra.mxu0 %v10955_v6 }
 0x20a   : > { %v10125_v24 = vpop.f32.mrf.mxu1 }
 0x20c   : > { %v2216_v50 = vpop.f32.mrf.mxu1 }
 0x20d   : > { %v2261_v45 = vadd.f32 %v2259_v33, %v2216_v50  ;;  %v4589_v33 = vrot.slane %v4587_v54, 4  ;;  %v4616_v54 = vrot.slane %v4614_v57, 4 }
 0x20e   : > { %v10126_v43 = vpop.f32.mrf.mxu1 }
 0x20f   : > { %v9515_v14 = vpack.c.bf16 %v2261_v45, %v2261_v45  ;;  %v2276_v24 = vadd.f32 %v10126_v43, %v2274_v34  ;;  %v4590_v60 = vor.u32 %v4589_v33, %v4586_v47  ;;  %v4838_v34 = vshll.u32 %v10956_v18, 16  ;;  %v12406_v45 = vpop.f32.mrf.mxu0 }
 0x210   : > { %v2219_v28 = vpop.f32.mrf.mxu1  ;;  %14038 = vst [vmem:[#allocation16_spill] sm:$0xff] %v12406_v45  ;;  %v4834_v43 = vshrl.u32 %v12369_v44, 16  ;;  %v4846_v47 = vshll.u32 %v12403_v30, 16  ;;  %v4617_v6 = vor.u32 %v4616_v54, %v4613_v31  ;;  %v4850_v31 = vshrl.u32 %v12403_v30, 16 }
 0x211   : > { %2272 = vst.msk [vmem:[%s12389_s12] sm:$0xf] %vm2271_vm4, %v9515_v14  ;;  %v9517_v9 = vpack.c.bf16 %v2276_v24, %v2276_v24  ;;  %v2262_v50 = vadd.f32 %v2260_v51, %v2219_v28  ;;  %v12412_v32 = vsel %vm416_vm1, %v4582_v1, %v4590_v60  ;;  %v12416_v42 = vsel %vm416_vm1, %v4590_v60, %v12378_v59 }
 0x212   : > { %v10129_v13 = vpop.f32.mrf.mxu1  ;;  %14039 = vst [vmem:[#allocation18_spill] sm:$0xff] %v12412_v32  ;;  %14040 = vst [vmem:[#allocation21_spill] sm:$0xff] %v12416_v42  ;;  %v4836_v57 = vor.u32 %v4834_v43, %v4832_v11  ;;  %v4840_v44 = vrot.slane %v4838_v34, 1  ;;  %v4842_v24 = vshrl.u32 %v10956_v18, 16  ;;  %v10960_v43 = vld [vmem:[%s11195_s8 + $0x8c] sm:$0xff]  }
 0x213   : > { %2286 = vst.msk [vmem:[%s12389_s12 + $0x8] sm:$0xf] %vm2271_vm4, %v9517_v9  ;;  %v9516_v26 = vpack.c.bf16 %v2262_v50, %v2262_v50  ;;  %v2290_v51 = vadd.f32 %v10129_v13, %v2288_v0  ;;  %v4602_v0 = vshrl.u32 %v12343_v38, 16  ;;  %v12427_v9 = vpop.f32.mrf.mxu0  ;;  %v4848_v50 = vrot.slane %v4846_v47, 1  ;;  %v12556_v32 = vld [vmem:[%s11195_s8 + $0x7c] sm:$0xf] }
 0x214   : > { %v2231_v14 = vpop.f32.mrf.mxu1  ;;  %14041 = vst [vmem:[#allocation24_spill] sm:$0xff] %v12427_v9  ;;  %v4841_v11 = vsel %vm657_vm2, %v4836_v57, %v4840_v44  ;;  %v4844_v18 = vor.u32 %v4842_v24, %v4840_v44  ;;  %v9085_v57 = vcombine.low %v12347_v8, %v12347_v8  ;;  %v4854_v44 = vshll.u32 %v10960_v43, 16  ;;  %v10962_v24 = vld [vmem:[%s11195_s8 + $0x94] ss:$0 sps:$4 sm:$0x11]  }
 0x215   : > { %2273 = vst.msk [vmem:[%s12389_s12 + $0x4] sm:$0xf] %vm2271_vm4, %v9516_v26  ;;  %v9519_v33 = vpack.c.bf16 %v2290_v51, %v2290_v51  ;;  %v2277_v28 = vadd.f32 %v2275_v62, %v2231_v14  ;;  %10383 = vmatprep.mubr.msk.bf16.mxu0 %vm307_vm0, %v4841_v11  ;;  %v4604_v13 = vrot.slane %v4602_v0, 3  ;;  %v4607_v62 = vrot.slane %v4605_v5, 4  ;;  %v2303_v26 = vld [vmem:[%s12359_s6 + $0x38] sm:$0xff]  ;;  %v10963_v11 = vld [vmem:[%s13923_s2 + $0x88] sm:$0xff]  }
 0x216   : > { %v10130_v1 = vpop.f32.mrf.mxu1  ;;  %v4849_v51 = vsel %vm657_vm2, %v4844_v18, %v4848_v50  ;;  %v4858_v54 = vshrl.u32 %v10960_v43, 16  ;;  %v4852_v30 = vor.u32 %v4850_v31, %v4848_v50  ;;  %v4629_v43 = vshrl.u32 %v9085_v57, 16 }
 0x217   : > { %2300 = vst.msk [vmem:[%s12389_s12 + $0x10] sm:$0xf] %vm2271_vm4, %v9519_v33  ;;  %v9518_v60 = vpack.c.bf16 %v2277_v28, %v2277_v28  ;;  %v2291_v34 = vadd.f32 %v10130_v1, %v2289_v16  ;;  %10384 = vmatmul.mubr.msk.bf16.gmra.mxu0 %vm307_vm0, %v4849_v51  ;;  %v4608_v16 = vor.u32 %v4607_v62, %v4604_v13  ;;  %v12442_v33 = vpop.f32.mrf.mxu0  ;;  %v10959_v28 = vld [vmem:[%s13923_s2 + $0x90] sm:$0xff]   ;;  %v4856_v1 = vrot.slane %v4854_v44, 1 }
 0x218   : > { %v2234_v38 = vpop.f32.mrf.mxu1  ;;  %14042 = vst [vmem:[#allocation25_spill] sm:$0xff] %v12442_v33  ;;  %10413 = vmatprep.subr.bf16.mxu0 %v10959_v28  ;;  %v4623_v13 = vshll.u32 %v12364_v52, 16  ;;  %v2302_v51 = vld [vmem:[%s12359_s6 + $0x30] sm:$0xff] }
 0x219   : > { %2287 = vst.msk [vmem:[%s12389_s12 + $0xc] sm:$0xf] %vm2271_vm4, %v9518_v60  ;;  %v9520_v14 = vpack.c.bf16 %v2291_v34, %v2291_v34  ;;  %v12452_v8 = vsel %vm416_vm1, %v12378_v59, %v4608_v16  ;;  %v12455_v5 = vsel %vm416_vm1, %v4608_v16, %v4617_v6  ;;  %v4862_v60 = vshll.u32 %v10962_v24, 16  ;;  %10414 = vmatpush3.bf16.msra.mxu0 %v10959_v28 }
 0x21a   : > { %v10133_v47 = vpop.f32.mrf.mxu1  ;;  %14043 = vst [vmem:[#allocation34_spill] sm:$0xff] %v12452_v8  ;;  %14044 = vst [vmem:[#allocation36_spill] sm:$0xff] %v12455_v5  ;;  %v4620_v34 = vshrl.u32 %v12364_v52, 16  ;;  %v4860_v62 = vor.u32 %v4858_v54, %v4856_v1  ;;  %v4632_v38 = vshll.u32 %v9085_v57, 16  ;;  %v4857_v16 = vsel %vm657_vm2, %v4852_v30, %v4856_v1  ;;  %10415 = vmatprep.subr.bf16.mxu0 %v10963_v11  ;;  %v5001_v1 = vld [vmem:[%s11195_s8 + $0x6c] sm:$0x8] }
 0x21b   : > { %2301 = vst.msk [vmem:[%s12389_s12 + $0x14] sm:$0xf] %vm2271_vm4, %v9520_v14  ;;  %v2305_v0 = vadd.f32 %v10133_v47, %v2303_v26  ;;  %v12463_v14 = vpop.f32.mrf.mxu0  ;;  %v4864_v50 = vrot.slane %v4862_v60, 1  ;;  %v4625_v24 = vrot.slane %v4623_v13, 4  ;;  %10387 = vmatprep.mubr.msk.bf16.mxu0 %vm307_vm0, %v4857_v16  ;;  %v4631_v52 = vrot.slane %v4629_v43, 3 }
 0x21c   : > { %v2246_v18 = vpop.f32.mrf.mxu1  ;;  %14045 = vst [vmem:[#allocation26_spill] sm:$0xff] %v12463_v14  ;;  %v4622_v44 = vrot.slane %v4620_v34, 3  ;;  %v4634_v57 = vrot.slane %v4632_v38, 4  ;;  %v5003_v30 = vld [vmem:[%s11195_s8 + $0x74] sm:$0xf] }
 0x21d   : > { %v9522_v59 = vpack.c.bf16 %v2305_v0, %v2305_v0  ;;  %v4865_v28 = vsel %vm657_vm2, %v4860_v62, %v4864_v50  ;;  %v5002_v18 = vld [vmem:[%s11195_s8 + $0x70] sm:$0xf]  ;;  %v12476_v34 = vpop.f32.mrf.mxu0  ;;  %10416 = vmatpush3.bf16.msra.mxu0 %v10963_v11  ;;  %v5004_v62 = vld [vmem:[%s11195_s8 + $0x78] sm:$0xf]  ;;  %v5005_v16 = vld [vmem:[%s11195_s8 + $0x7c] sm:$0xf] }
 0x21e   : > { %v10134_v26 = vpop.f32.mrf.mxu1  ;;  %v4626_v31 = vor.u32 %v4625_v24, %v4622_v44  ;;  %v4635_v0 = vor.u32 %v4634_v57, %v4631_v52  ;;  %14046 = vst [vmem:[#allocation37_spill] sm:$0xff] %v12476_v34  ;;  %v9129_v43 = vcombine.low %v5001_v1, %v5002_v18  ;;  %v9154_v38 = vcombine.low %v5002_v18, %v5003_v30  ;;  %v5006_v50 = vld [vmem:[%s11195_s8 + $0x80] sm:$0xf]  ;;  %v5009_v5 = vld [vmem:[%s11195_s8 + $0x8c] sm:$0xf] }
 0x21f   : > { %2315 = vst.msk [vmem:[%s12389_s12 + $0x1c] sm:$0xf] %vm2271_vm4, %v9522_v59  ;;  %10388 = vmatmul.mubr.msk.bf16.gmra.mxu0 %vm307_vm0, %v4865_v28  ;;  %v10964_v59 = vld [vmem:[%s13923_s2 + $0x80] sm:$0xff]   ;;  %v9130_v44 = vcombine.low %v5003_v30, %v5004_v62  ;;  %v9131_v11 = vcombine.low %v5005_v16, %v5006_v50  ;;  %v5012_v8 = vld [vmem:[%s11195_s8 + $0x98] sm:$0xf] }
 0x220   : > { %v2248_v47 = vpop.f32.mrf.mxu1  ;;  %v12479_v13 = vsel %vm416_vm1, %v4617_v6, %v4626_v31  ;;  %10417 = vmatprep.subr.bf16.mxu0 %v10964_v59  ;;  %10419 = vmatprep.mubr.msk.bf16.mxu0 %vm307_vm0, %v9154_v38  ;;  %v5056_v6 = vshrl.u32 %v9129_v43, 16  ;;  %v5059_v52 = vshll.u32 %v9129_v43, 16  ;;  %v12563_v14 = vld [vmem:[%s11195_s8 + $0x80] sm:$0xf] }
 0x221   : > { %v2304_v54 = vadd.f32 %v2302_v51, %v2248_v47  ;;  %14047 = vst [vmem:[#allocation38_spill] sm:$0xff] %v12479_v13  ;;  %v12486_v51 = vsel %vm416_vm1, %v4626_v31, %v4635_v0  ;;  %v9155_v47 = vcombine.low %v5004_v62, %v5005_v16  ;;  %v5064_v28 = vshrl.u32 %v9130_v44, 16  ;;  %v12496_v31 = vpop.f32.mrf.mxu0  ;;  %10418 = vmatpush3.bf16.msra.mxu0 %v10964_v59  ;;  %v5007_v59 = vld [vmem:[%s11195_s8 + $0x84] sm:$0xf]  ;;  %v5008_v13 = vld [vmem:[%s11195_s8 + $0x88] sm:$0xf] }
 0x222   : > { %v12474_v60 = vpop.f32.mrf.mxu1  ;;  %14048 = vst [vmem:[#allocation29_spill] sm:$0xff] %v12486_v51  ;;  %14049 = vst [vmem:[#allocation39_spill] sm:$0xff] %v12496_v31  ;;  %v5073_v0 = vshrl.u32 %v9131_v11, 16  ;;  %v5076_v18 = vshll.u32 %v9131_v11, 16  ;;  %v5058_v30 = vrot.slane %v5056_v6, 3  ;;  %v5061_v38 = vrot.slane %v5059_v52, 4 }
 0x223   : > { %v9521_v26 = vpack.c.bf16 %v2304_v54, %v2304_v54  ;;  %v5067_v54 = vshll.u32 %v9130_v44, 16  ;;  %v12508_v6 = vpop.f32.mrf.mxu0  ;;  %14059 = vst [vmem:[#allocation5_spill] sm:$0xff] %v12563_v14 }
 0x224   : > { %v2645_v24 = vpop.f32.mrf.mxu1  ;;  %v5075_v16 = vrot.slane %v5073_v0, 3  ;;  %v5078_v44 = vrot.slane %v5076_v18, 4  ;;  %14050 = vst [vmem:[#allocation41_spill] sm:$0xff] %v12508_v6 }
 0x225   : > { %2314 = vst.msk [vmem:[%s12389_s12 + $0x18] sm:$0xf] %vm2271_vm4, %v9521_v26  ;;  %v2646_v57 = vadd.f32 %v2645_v24, %v12217_v7  ;;  %v5066_v7 = vrot.slane %v5064_v28, 3  ;;  %v5069_v62 = vrot.slane %v5067_v54, 4  ;;  %v5062_v24 = vor.u32 %v5061_v38, %v5058_v30  ;;  %v10972_v54 = vld [vmem:[%s13923_s2 + $0xd8] sm:$0xff]  }
 0x226   : > { %v12494_v1 = vpop.f32.mrf.mxu1  ;;  %v5079_v52 = vor.u32 %v5078_v44, %v5075_v16  ;;  %v9156_v30 = vcombine.low %v5006_v50, %v5007_v59  ;;  %10451 = vmatprep.subr.bf16.mxu0 %v10972_v54 }
 0x227   : > { %v12499_v43 = vadd.f32 %v12274_v22, %v2646_v57  ;;  %10420 = vmatmul.mubr.msk.bf16.vlgmr.msra.gmra.mxu0 %vm307_vm0, %v9155_v47  ;;  %v5070_v51 = vor.u32 %v5069_v62, %v5066_v7  ;;  %v5010_v22 = vld [vmem:[%s11195_s8 + $0x90] sm:$0xf]  ;;  %v9132_v57 = vcombine.low %v5007_v59, %v5008_v13  ;;  %v9157_v62 = vcombine.low %v5008_v13, %v5009_v5 }
 0x228   : > { %v12501_v26 = vpop.f32.mrf.mxu1  ;;  %v9133_v0 = vcombine.low %v5009_v5, %v5010_v22  ;;  %10452 = vmatpush3.bf16.msra.mxu0 %v10972_v54  ;;  %10423 = vmatprep.mubr.msk.bf16.mxu0 %vm307_vm0, %v9156_v30 }
 0x229   : > { %v12513_v28 = vsel %vm416_vm1, %v5062_v24, %v5070_v51  ;;  %v12519_v18 = vsel %vm416_vm1, %v5070_v51, %v5079_v52  ;;  %v5082_v38 = vshrl.u32 %v9132_v57, 16  ;;  %v5085_v16 = vshll.u32 %v9132_v57, 16 }
 0x22a   : > { %v12506_v11 = vpop.f32.mrf.mxu1  ;;  %14051 = vst [vmem:[#allocation40_spill] sm:$0xff] %v12513_v28  ;;  %14052 = vst [vmem:[#allocation43_spill] sm:$0xff] %v12519_v18  ;;  %v5091_v44 = vshrl.u32 %v9133_v0, 16  ;;  %v12524_v28 = vpop.f32.mrf.mxu0  ;;  %v5094_v18 = vshll.u32 %v9133_v0, 16  ;;  %v5013_v0 = vld [vmem:[%s11195_s8 + $0x9c] sm:$0xf] }
 0x22b   : > { %14053 = vst [vmem:[#allocation42_spill] sm:$0xff] %v12524_v28  ;;  %v5084_v51 = vrot.slane %v5082_v38, 3 }
 0x22c   : > { %v2661_v47 = vpop.f32.mrf.mxu1  ;;  %v5093_v59 = vrot.slane %v5091_v44, 3  ;;  %v5096_v13 = vrot.slane %v5094_v18, 4  ;;  %v12537_v54 = vpop.f32.mrf.mxu0 }
 0x22d   : > { %v2662_v7 = vadd.f32 %v2661_v47, %v12239_v55  ;;  %v5087_v55 = vrot.slane %v5085_v16, 4  ;;  %v5011_v47 = vld [vmem:[%s11195_s8 + $0x94] sm:$0xf]  ;;  %14054 = vst [vmem:[#allocation44_spill] sm:$0xff] %v12537_v54  ;;  %v10984_v16 = vld [vmem:[%s13923_s2 + $0xc8] sm:$0xff]  }
 0x22e   : > { %v12522_v24 = vpop.f32.mrf.mxu1  ;;  %v5097_v30 = vor.u32 %v5096_v13, %v5093_v59  ;;  %v9134_v38 = vcombine.low %v5011_v47, %v5012_v8 }
 0x22f   : > { %v12528_v50 = vadd.f32 %v12282_v19, %v2662_v7  ;;  %10424 = vmatmul.mubr.msk.bf16.gmra.mxu0 %vm307_vm0, %v9157_v62  ;;  %v5088_v57 = vor.u32 %v5087_v55, %v5084_v51  ;;  %v10978_v19 = vld [vmem:[%s13923_s2 + $0xd0] sm:$0xff]   ;;  %v9158_v7 = vcombine.low %v5010_v22, %v5011_v47  ;;  %v9135_v62 = vcombine.low %v5013_v0, %v5013_v0 }
 0x230   : > { %v12530_v5 = vpop.f32.mrf.mxu1  ;;  %10453 = vmatprep.subr.bf16.mxu0 %v10978_v19  ;;  %v5100_v55 = vshrl.u32 %v9134_v38, 16  ;;  %v5103_v22 = vshll.u32 %v9134_v38, 16  ;;  %v12566_v38 = vld [vmem:[%s11195_s8 + $0x84] sm:$0xf] }
 0x231   : > { %v12544_v18 = vsel %vm416_vm1, %v5079_v52, %v5088_v57  ;;  %v12550_v51 = vsel %vm416_vm1, %v5088_v57, %v5097_v30  ;;  %10427 = vmatprep.mubr.msk.bf16.mxu0 %vm307_vm0, %v9158_v7  ;;  %10454 = vmatpush3.bf16.msra.mxu0 %v10978_v19  ;;  %v9159_v52 = vcombine.low %v5012_v8, %v5013_v0  ;;  %v5109_v13 = vshrl.u32 %v9135_v62, 16 }
 0x232   : > { %v12535_v42 = vpop.f32.mrf.mxu1  ;;  %14055 = vst [vmem:[#allocation45_spill] sm:$0xff] %v12544_v18  ;;  %14056 = vst [vmem:[#allocation2_spill] sm:$0xff] %v12550_v51  ;;  %v5112_v47 = vshll.u32 %v9135_v62, 16  ;;  %v5642_v18 = vld [vmem:[%s11195_s8 + $0x78] sm:$0x8]  ;;  %v12560_v51 = vpop.f32.mrf.mxu0  ;;  %10455 = vmatprep.subr.bf16.mxu0 %v10984_v16  ;;  %v5102_v7 = vrot.slane %v5100_v55, 3  ;;  %v9204_v55 = vcombine.low %v12563_v14, %v12566_v38 }
 0x233   : > { %14058 = vst [vmem:[#allocation4_spill] sm:$0xff] %v12560_v51  ;;  %v5105_v34 = vrot.slane %v5103_v22, 4  ;;  %14060 = vst [vmem:[#allocation8_spill] sm:$0xff] %v12566_v38  ;;  %v5111_v19 = vrot.slane %v5109_v13, 3  ;;  %v12573_v62 = vld [vmem:[%s11195_s8 + $0x88] sm:$0xf] }
 0x234   : > { %v2677_v44 = vpop.f32.mrf.mxu1  ;;  %v5114_v0 = vrot.slane %v5112_v47, 4  ;;  %14062 = vst [vmem:[#allocation11_spill] sm:$0xff] %v12573_v62  ;;  %v12587_v13 = vpop.f32.mrf.mxu0  ;;  %v5705_v15 = vshrl.u32 %v9204_v55, 16  ;;  %v5708_v45 = vshll.u32 %v9204_v55, 16 }
 0x235   : > { %v2678_v59 = vadd.f32 %v2677_v44, %v12266_v17  ;;  %v9203_v17 = vcombine.low %v5642_v18, %v12556_v32  ;;  %v12576_v44 = vld [vmem:[%s11195_s8 + $0x8c] sm:$0xf]  ;;  %v5106_v51 = vor.u32 %v5105_v34, %v5102_v7  ;;  %14064 = vst [vmem:[#allocation13_spill] sm:$0xff] %v12587_v13  ;;  %10456 = vmatpush3.bf16.msra.mxu0 %v10984_v16  ;;  %v10985_v34 = vld [vmem:[%s13923_s2 + $0xc0] sm:$0xff]   ;;  %v12607_v13 = vld [vmem:[%s11195_s8 + $0x90] sm:$0xf] }
 0x236   : > { %v12558_v57 = vpop.f32.mrf.mxu1  ;;  %v9205_v22 = vcombine.low %v12573_v62, %v12576_v44  ;;  %10457 = vmatprep.subr.bf16.mxu0 %v10985_v34  ;;  %v5710_v16 = vrot.slane %v5708_v45, 4  ;;  %v12616_v45 = vld [vmem:[%s11195_s8 + $0x9c] sm:$0xf] }
 0x237   : > { %14057 = vst [vmem:[#allocation3_spill] sm:$0xff] %v12558_v57  ;;  %v12570_v8 = vadd.f32 %v12293_v40, %v2678_v59  ;;  %v5697_v33 = vshrl.u32 %v9203_v17, 16  ;;  %10428 = vmatmul.mubr.msk.bf16.gmra.mxu0 %vm307_vm0, %v9159_v52  ;;  %v5115_v40 = vor.u32 %v5114_v0, %v5111_v19  ;;  %v5700_v18 = vshll.u32 %v9203_v17, 16  ;;  %v11012_v57 = vld [vmem:[%s11195_s8 + $0x8c] sm:$0xff]  }
 0x238   : > { %v12578_v9 = vpop.f32.mrf.mxu1  ;;  %v12590_v47 = vsel %vm416_vm1, %v5097_v30, %v5106_v51  ;;  %v5707_v30 = vrot.slane %v5705_v15, 3  ;;  %v5714_v19 = vshrl.u32 %v9205_v22, 16  ;;  %v5717_v0 = vshll.u32 %v9205_v22, 16  ;;  %v12613_v15 = vld [vmem:[%s11195_s8 + $0x98] sm:$0xf] }
 0x239   : > { %14061 = vst [vmem:[#allocation10_spill] sm:$0xff] %v12570_v8  ;;  %14063 = vst [vmem:[#allocation12_spill] sm:$0xff] %v12578_v9  ;;  %v5699_v7 = vrot.slane %v5697_v33, 3  ;;  %v12596_v23 = vsel %vm416_vm1, %v5106_v51, %v5115_v40  ;;  %v5702_v52 = vrot.slane %v5700_v18, 4  ;;  %v12604_v51 = vpop.f32.mrf.mxu0  ;;  %10458 = vmatpush3.bf16.msra.mxu0 %v10985_v34  ;;  %v12610_v8 = vld [vmem:[%s11195_s8 + $0x94] sm:$0xf] }
 0x23a   : > { %v12585_v59 = vpop.f32.mrf.mxu1  ;;  %14065 = vst [vmem:[#allocation15_spill] sm:$0xff] %v12590_v47  ;;  %14066 = vst [vmem:[#allocation27_spill] sm:$0xff] %v12596_v23  ;;  %v5711_v40 = vor.u32 %v5710_v16, %v5707_v30  ;;  %v5716_v18 = vrot.slane %v5714_v19, 3  ;;  %v5719_v23 = vrot.slane %v5717_v0, 4  ;;  %v9206_v16 = vcombine.low %v12607_v13, %v12610_v8 }
 0x23b   : > { %v5703_v47 = vor.u32 %v5702_v52, %v5699_v7  ;;  %14067 = vst [vmem:[#allocation28_spill] sm:$0xff] %v12604_v51  ;;  %v12624_v34 = vpop.f32.mrf.mxu0  ;;  %v9207_v19 = vcombine.low %v12613_v15, %v12616_v45 }
 0x23c   : > { %v12598_v17 = vpop.f32.mrf.mxu1  ;;  %v5720_v52 = vor.u32 %v5719_v23, %v5716_v18  ;;  %14068 = vst [vmem:[#allocation17_spill] sm:$0xff] %v12624_v34  ;;  %v10995_v23 = vld [vmem:[%s13923_s2 + $0x118] sm:$0xff]   ;;  %v5723_v0 = vshrl.u32 %v9206_v16, 16  ;;  %v5726_v18 = vshll.u32 %v9206_v16, 16 }
 0x23d   : > { %v5712_v7 = vsel %vm416_vm1, %v5703_v47, %v5711_v40  ;;  %10491 = vmatprep.subr.bf16.mxu0 %v10995_v23  ;;  %v12639_v38 = vpop.f32.mrf.mxu0 }
 0x23e   : > { %v12602_v55 = vpop.f32.mrf.mxu1  ;;  %10459 = vmatprep.mubr.msk.bf16.mxu0 %vm307_vm0, %v5712_v7  ;;  %v5721_v30 = vsel %vm416_vm1, %v5711_v40, %v5720_v52  ;;  %v5732_v40 = vshrl.u32 %v9207_v19, 16  ;;  %v5735_v7 = vshll.u32 %v9207_v19, 16  ;;  %14070 = vst [vmem:[#allocation20_spill] sm:$0xff] %v12639_v38  ;;  %v5725_v34 = vrot.slane %v5723_v0, 3 }
 0x23f   : > { %10460 = vmatmul.mubr.msk.bf16.vlgmr.msra.gmra.mxu0 %vm307_vm0, %v5721_v30  ;;  %v5728_v30 = vrot.slane %v5726_v18, 4  ;;  %v12654_v28 = vpop.f32.mrf.mxu0  ;;  %v11001_v18 = vld [vmem:[%s13923_s2 + $0x110] sm:$0xff]  }
 0x240   : > { %v12618_v22 = vpop.f32.mrf.mxu1  ;;  %10492 = vmatpush3.bf16.msra.mxu0 %v10995_v23  ;;  %v5734_v51 = vrot.slane %v5732_v40, 3  ;;  %v5737_v54 = vrot.slane %v5735_v7, 4  ;;  %14073 = vst [vmem:[#allocation46_spill] sm:$0xff] %v12654_v28  ;;  %v9208_v40 = vcombine.low %v12642_v10, %v12645_v12  ;;  %v9209_v7 = vcombine.low %v12650_v39, %v12650_v39 }
 0x241   : > { %v5729_v16 = vor.u32 %v5728_v30, %v5725_v34  ;;  %10493 = vmatprep.subr.bf16.mxu0 %v11001_v18 }
 0x242   : > { %v12622_v33 = vpop.f32.mrf.mxu1  ;;  %v5738_v9 = vor.u32 %v5737_v54, %v5734_v51  ;;  %v11005_v54 = vld [vmem:[%s13923_s2 + $0x108] sm:$0xff]   ;;  %v5744_v34 = vshll.u32 %v9208_v40, 16  ;;  %v5750_v28 = vshrl.u32 %v9209_v7, 16 }
 0x243   : > { %v5730_v23 = vsel %vm416_vm1, %v5720_v52, %v5729_v16  ;;  %v5741_v52 = vshrl.u32 %v9208_v40, 16 }
 0x244   : > { %v12635_v47 = vpop.f32.mrf.mxu1  ;;  %v5739_v0 = vsel %vm416_vm1, %v5729_v16, %v5738_v9  ;;  %10463 = vmatprep.mubr.msk.bf16.mxu0 %vm307_vm0, %v5730_v23  ;;  %10494 = vmatpush3.bf16.msra.mxu0 %v11001_v18  ;;  %v12674_v16 = vpop.f32.mrf.mxu0  ;;  %v5746_v38 = vrot.slane %v5744_v34, 4  ;;  %v5752_v31 = vrot.slane %v5750_v28, 3  ;;  %v11008_v34 = vld [vmem:[%s13923_s2 + $0x100] sm:$0xff]  }
 0x245   : > { %14076 = vst [vmem:[#allocation49_spill] sm:$0xff] %v12674_v16  ;;  %v5743_v23 = vrot.slane %v5741_v52, 3  ;;  %10495 = vmatprep.subr.bf16.mxu0 %v11005_v54 }
 0x246   : > { %v12637_v62 = vpop.f32.mrf.mxu1  ;;  %v12683_v18 = vpop.f32.mrf.mxu0 }
 0x247   : > { %14069 = vst [vmem:[#allocation19_spill] sm:$0xff] %v12637_v62  ;;  %10464 = vmatmul.mubr.msk.bf16.gmra.mxu0 %vm307_vm0, %v5739_v0  ;;  %v5747_v46 = vor.u32 %v5746_v38, %v5743_v23  ;;  %14078 = vst [vmem:[#allocation51_spill] sm:$0xff] %v12683_v18  ;;  %v6112_v18 = vshll.u32 %v11012_v57, 16 }
 0x248   : > { %v12647_v41 = vpop.f32.mrf.mxu1  ;;  %10496 = vmatpush3.bf16.msra.mxu0 %v11005_v54 }
 0x249   : > { %14071 = vst [vmem:[#allocation22_spill] sm:$0xff] %v12647_v41  ;;  %v11011_v41 = vld [vmem:[%s11195_s8 + $0x84] sm:$0xff]   ;;  %v5748_v16 = vsel %vm416_vm1, %v5738_v9, %v5747_v46  ;;  %10497 = vmatprep.subr.bf16.mxu0 %v11008_v34 }
 0x24a   : > { %v12652_v19 = vpop.f32.mrf.mxu1  ;;  %10467 = vmatprep.mubr.msk.bf16.mxu0 %vm307_vm0, %v5748_v16  ;;  %v6104_v54 = vshll.u32 %v11011_v41, 16  ;;  %v6108_v23 = vshrl.u32 %v11011_v41, 16 }
 0x24b   : > { %14072 = vst [vmem:[#allocation30_spill] sm:$0xff] %v12652_v19  ;;  %v5753_v19 = vshll.u32 %v9209_v7, 16 }
 0x24c   : > { %v12667_v51 = vpop.f32.mrf.mxu1  ;;  %10498 = vmatpush3.bf16.msra.mxu0 %v11008_v34  ;;  %v6106_v16 = vrot.slane %v6104_v54, 1  ;;  %v6116_v34 = vshrl.u32 %v11012_v57, 16 }
 0x24d   : > { %14074 = vst [vmem:[#allocation47_spill] sm:$0xff] %v12667_v51  ;;  %v11010_v51 = vld [vmem:[%s11195_s8 + $0x7c] sm:$0xff]   ;;  %v5755_v40 = vrot.slane %v5753_v19, 4 }
 0x24e   : > { %v12672_v30 = vpop.f32.mrf.mxu1  ;;  %v6097_v7 = vshrl.u32 %v11010_v51, 16  ;;  %v6099_v38 = vshll.u32 %v11010_v51, 16  ;;  %v6114_v51 = vrot.slane %v6112_v18, 1  ;;  %v6110_v41 = vor.u32 %v6108_v23, %v6106_v16 }
 0x24f   : > { %14075 = vst [vmem:[#allocation48_spill] sm:$0xff] %v12672_v30  ;;  %v5756_v52 = vor.u32 %v5755_v40, %v5752_v31  ;;  %v12696_v40 = vpop.f32.mrf.mxu0  ;;  %v2654_v23 = vadd.f32 %v12474_v60, %v12209_v21 }
 0x250   : > { %v12677_v0 = vpop.f32.mrf.mxu1  ;;  %v6101_v9 = vrot.slane %v6099_v38, 1  ;;  %v6115_v18 = vsel %vm657_vm2, %v6110_v41, %v6114_v51 }
 0x251   : > { %14077 = vst [vmem:[#allocation50_spill] sm:$0xff] %v12677_v0  ;;  %v5757_v19 = vsel %vm416_vm1, %v5747_v46, %v5756_v52  ;;  %v11014_v46 = vld [vmem:[%s11195_s8 + $0x94] sm:$0xff]   ;;  %v12707_v48 = vpop.f32.mrf.mxu0  ;;  %v6118_v0 = vor.u32 %v6116_v34, %v6114_v51  ;;  %v2649_v51 = vadd.f32 %v12501_v26, %v12227_v49  ;;  %v2923_v41 = vadd.f32 %v12272_v4, %v2654_v23  ;;  %v11018_v34 = vld [vmem:[%s11195_s8 + $0xa4] sm:$0xff]  }
 0x252   : > { %v12681_v61 = vpop.f32.mrf.mxu1  ;;  %10468 = vmatmul.mubr.msk.bf16.gmra.mxu0 %vm307_vm0, %v5757_v19  ;;  %v6102_v30 = vor.u32 %v6101_v9, %v6097_v7  ;;  %v6120_v62 = vshll.u32 %v11014_v46, 16  ;;  %v11015_v19 = vld [vmem:[%s11195_s8 + $0x9c] sm:$0xff]   ;;  %v6124_v54 = vshrl.u32 %v11014_v46, 16  ;;  %v9230_v7 = vcombine.low %v12576_v44, %v12607_v13 }
 0x253   : > { %v6128_v9 = vshll.u32 %v11015_v19, 16  ;;  %v12724_v46 = vpop.f32.mrf.mxu0  ;;  %v6132_v4 = vshrl.u32 %v11015_v19, 16  ;;  %v6140_v26 = vshrl.u32 %v11018_v34, 16  ;;  %v9232_v23 = vcombine.low %v12616_v45, %v12642_v10 }
 0x254   : > { %v12690_v28 = vpop.f32.mrf.mxu1  ;;  %v6107_v6 = vsel %vm657_vm2, %v6102_v30, %v6106_v16  ;;  %v6122_v30 = vrot.slane %v6120_v62, 1  ;;  %v2673_v19 = vadd.f32 %v12522_v24, %v12248_v37 }
 0x255   : > { %10499 = vmatprep.mubr.msk.bf16.mxu0 %vm307_vm0, %v6107_v6  ;;  %v2657_v6 = vadd.f32 %v12494_v1, %v12220_v25  ;;  %v6130_v62 = vrot.slane %v6128_v9, 1  ;;  %v3174_v1 = vadd.f32 %v12585_v59, %v2923_v41  ;;  %v12741_v9 = vpop.f32.mrf.mxu0 }
 0x256   : > { %v12694_v31 = vpop.f32.mrf.mxu1  ;;  %v6123_v21 = vsel %vm657_vm2, %v6118_v0, %v6122_v30  ;;  %v6126_v60 = vor.u32 %v6124_v54, %v6122_v30  ;;  %v6136_v0 = vshll.u32 %v11018_v34, 16  ;;  %v11019_v54 = vld [vmem:[%s11195_s8 + $0xac] ss:$0 sps:$4 sm:$0x11]   ;;  %v2665_v34 = vadd.f32 %v12530_v5, %v12254_v53 }
 0x257   : > { %v2924_v14 = vadd.f32 %v12276_v35, %v2657_v6  ;;  %v2670_v35 = vadd.f32 %v12506_v11, %v12233_v27  ;;  %v6134_v41 = vor.u32 %v6132_v4, %v6130_v62  ;;  %v3323_v27 = vadd.f32 %v12312_v56, %v3174_v1 }
 0x258   : > { %v12701_v52 = vpop.f32.mrf.mxu1  ;;  %v6131_v49 = vsel %vm657_vm2, %v6126_v60, %v6130_v62  ;;  %v9233_v60 = vcombine.low %v12645_v12, %v12650_v39  ;;  %v3176_v56 = vadd.f32 %v12635_v47, %v12528_v50  ;;  %v14081_v47 = vld [vmem:[#allocation41_spill] sm:$0xff] }
 0x259   : > { %v3175_v59 = vadd.f32 %v12602_v55, %v2924_v14  ;;  %v12764_v55 = vpop.f32.mrf.mxu0  ;;  %v3564_v24 = vadd.f32 %v12681_v61, %v3323_v27  ;;  %v14089_v27 = vld [vmem:[#allocation12_spill] sm:$0xff] }
 0x25a   : > { %v12705_v38 = vpop.f32.mrf.mxu1  ;;  %10500 = vmatmul.mubr.msk.bf16.vlgmr.msra.gmra.mxu0 %vm307_vm0, %v6115_v18  ;;  %v3172_v18 = vadd.f32 %v12598_v17, %v12499_v43  ;;  %v6138_v43 = vrot.slane %v6136_v0, 1  ;;  %v6144_v17 = vshll.u32 %v11019_v54, 16  ;;  %v14079_v54 = vld [vmem:[#allocation31_spill] sm:$0xff] }
 0x25b   : > { %10503 = vmatprep.mubr.msk.bf16.mxu0 %vm307_vm0, %v6123_v21  ;;  %v2922_v21 = vadd.f32 %v12278_v29, %v2649_v51  ;;  %v3324_v53 = vadd.f32 %v12324_v36, %v3175_v59  ;;  %v2686_v36 = vadd.f32 %v12535_v42, %v12260_v58  ;;  %v12783_v61 = vpop.f32.mrf.mxu0  ;;  %v14082_v59 = vld [vmem:[#allocation6_spill] sm:$0xff]  ;;  %v14085_v42 = vld [vmem:[#allocation39_spill] sm:$0xff] }
 0x25c   : > { %v12715_v16 = vpop.f32.mrf.mxu1  ;;  %v3321_v29 = vadd.f32 %v12316_v63, %v3172_v18  ;;  %v6139_v62 = vsel %vm657_vm2, %v6134_v41, %v6138_v43  ;;  %v6142_v51 = vor.u32 %v6140_v26, %v6138_v43  ;;  %v6146_v0 = vrot.slane %v6144_v17, 1  ;;  %v14080_v26 = vld [vmem:[#allocation19_spill] sm:$0xff]  ;;  %v14084_v43 = vld [vmem:[#allocation22_spill] sm:$0xff] }
 0x25d   : > { %v3173_v14 = vadd.f32 %v12618_v22, %v2922_v21  ;;  %v2927_v63 = vadd.f32 %v12280_v3, %v2670_v35  ;;  %v2928_v22 = vadd.f32 %v12284_v20, %v2673_v19  ;;  %v3565_v1 = vadd.f32 %v12694_v31, %v3324_v53  ;;  %v14086_v35 = vld [vmem:[#allocation32_spill] sm:$0xff] }
 0x25e   : > { %v12722_v57 = vpop.f32.mrf.mxu1  ;;  %v3562_v37 = vadd.f32 %v12690_v28, %v3321_v29  ;;  %v2926_v3 = vadd.f32 %v14079_v54, %v2665_v34  ;;  %v6147_v4 = vsel %vm657_vm2, %v6142_v51, %v6146_v0  ;;  %v3325_v41 = vadd.f32 %v14086_v35, %v3176_v56  ;;  %v14087_v34 = vld [vmem:[#allocation42_spill] sm:$0xff]  ;;  %v14091_v0 = vld [vmem:[#allocation23_spill] sm:$0xff] }
 0x25f   : > { %v3322_v18 = vadd.f32 %v12334_v2, %v3173_v14  ;;  %v3178_v28 = vadd.f32 %v12622_v33, %v2927_v63  ;;  %v3179_v50 = vadd.f32 %v14080_v26, %v2928_v22  ;;  %v14083_v2 = vld [vmem:[#allocation3_spill] sm:$0xff]  ;;  %v3815_v33 = vadd.f32 %v14085_v42, %v3564_v24  ;;  %v14088_v29 = vld [vmem:[#allocation14_spill] sm:$0xff]  ;;  %v10310_v22 = vpop.f32.mrf.mxu0 }
 0x260   : > { %v12732_v25 = vpop.f32.mrf.mxu1  ;;  %v3813_v31 = vadd.f32 %v14081_v47, %v3562_v37  ;;  %v2689_v21 = vadd.f32 %v14083_v2, %v14082_v59  ;;  %v3177_v58 = vadd.f32 %v14084_v43, %v2926_v3  ;;  %v3816_v14 = vadd.f32 %v14087_v34, %v3565_v1  ;;  %v14093_v3 = vld [vmem:[#allocation44_spill] sm:$0xff]  ;;  %v14094_v1 = vld [vmem:[#allocation10_spill] sm:$0xff]  ;;  %v14095_v47 = vld [vmem:[#allocation47_spill] sm:$0xff] }
 0x261   : > { %v3563_v20 = vadd.f32 %v12701_v52, %v3322_v18  ;;  %v2681_v52 = vadd.f32 %v14089_v27, %v14088_v29  ;;  %v3327_v37 = vadd.f32 %v14091_v0, %v3178_v28  ;;  %v3566_v24 = vadd.f32 %v12715_v16, %v3325_v41  ;;  %v14092_v18 = vld [vmem:[#allocation35_spill] sm:$0xff]  ;;  %v14100_v41 = vld [vmem:[#allocation9_spill] sm:$0xff] }
 0x262   : > { %v12739_v30 = vpop.f32.mrf.mxu1  ;;  %10504 = vmatmul.mubr.msk.bf16.gmra.mxu0 %vm307_vm0, %v6131_v49  ;;  %v3328_v54 = vadd.f32 %v14092_v18, %v3179_v50 }
 0x263   : > { %10507 = vmatprep.mubr.msk.bf16.mxu0 %vm307_vm0, %v6139_v62  ;;  %v14090_v62 = vld [vmem:[#allocation33_spill] sm:$0xff]  ;;  %v3814_v26 = vadd.f32 %v14093_v3, %v3563_v20  ;;  %v3568_v2 = vadd.f32 %v12705_v38, %v3327_v37  ;;  %v14099_v20 = vld [vmem:[#allocation48_spill] sm:$0xff]  ;;  %v2930_v34 = vadd.f32 %v14100_v41, %v2681_v52  ;;  %v4175_v38 = vpop.f32.mrf.mxu0 }
 0x264   : > { %v12750_v6 = vpop.f32.mrf.mxu1  ;;  %v2931_v51 = vadd.f32 %v14090_v62, %v2686_v36  ;;  %v14097_v36 = vld [vmem:[#allocation16_spill] sm:$0xff] }
 0x265   : > { %v3326_v43 = vadd.f32 %v14097_v36, %v3177_v58  ;;  %v14108_v36 = vld [vmem:[#allocation17_spill] sm:$0xff] }
 0x266   : > { %v12762_v11 = vpop.f32.mrf.mxu1 }
 0x267   : > { %v3567_v58 = vadd.f32 %v12732_v25, %v3326_v43  ;;  %v14107_v25 = vld [vmem:[#allocation26_spill] sm:$0xff] }
 0x268   : > { %v12772_v5 = vpop.f32.mrf.mxu1 }
 0x26a   : > { %v10285_v49 = vpop.f32.mrf.mxu1  ;;  %10508 = vmatmul.mubr.msk.bf16.gmra.mxu0 %vm307_vm0, %v6147_v4  ;;  %v3180_v4 = vadd.f32 %v14095_v47, %v14094_v1  ;;  %v10313_v47 = vpop.f32.mrf.mxu0 }
 0x26b   : > { %v3964_v53 = vadd.f32 %v10285_v49, %v3815_v33  ;;  %v3569_v49 = vadd.f32 %v12722_v57, %v3328_v54  ;;  %v14098_v33 = vld [vmem:[#allocation30_spill] sm:$0xff]  ;;  %v14101_v57 = vld [vmem:[#allocation13_spill] sm:$0xff] }
 0x26c   : > { %v3915_v17 = vpop.f32.mrf.mxu1  ;;  %v3817_v27 = vadd.f32 %v14101_v57, %v3566_v24  ;;  %v4188_v41 = vpop.f32.mrf.mxu0 }
 0x26d   : > { %v3962_v19 = vadd.f32 %v3915_v17, %v3813_v31  ;;  %v14096_v31 = vld [vmem:[#allocation7_spill] sm:$0xff]  ;;  %v3182_v17 = vadd.f32 %v14098_v33, %v2931_v51  ;;  %v14104_v51 = vld [vmem:[#allocation4_spill] sm:$0xff] }
 0x26e   : > { %v10286_v63 = vpop.f32.mrf.mxu1  ;;  %v2932_v59 = vadd.f32 %v14096_v31, %v2689_v21  ;;  %v4205_v21 = vadd.f32 %v12696_v40, %v3964_v53  ;;  %v3819_v37 = vadd.f32 %v14104_v51, %v3568_v2  ;;  %v14105_v40 = vld [vmem:[#allocation28_spill] sm:$0xff]  ;;  %v3818_v2 = vadd.f32 %v14108_v36, %v3567_v58 }
 0x26f   : > { %v3965_v56 = vadd.f32 %v10286_v63, %v3816_v14  ;;  %v4203_v42 = vadd.f32 %v12707_v48, %v3962_v19  ;;  %v14102_v48 = vld [vmem:[#allocation50_spill] sm:$0xff]  ;;  %v3820_v53 = vadd.f32 %v14105_v40, %v3569_v49  ;;  %v14111_v58 = vld [vmem:[#allocation20_spill] sm:$0xff] }
 0x270   : > { %v3918_v28 = vpop.f32.mrf.mxu1  ;;  %v3183_v35 = vadd.f32 %v14099_v20, %v2932_v59  ;;  %v3181_v19 = vadd.f32 %v14102_v48, %v2930_v34 }
 0x271   : > { %v4206_v16 = vadd.f32 %v12724_v46, %v3965_v56  ;;  %v3963_v50 = vadd.f32 %v3918_v28, %v3814_v26  ;;  %v14103_v46 = vld [vmem:[#allocation25_spill] sm:$0xff]  ;;  %v4215_v18 = vmax.f32 %v4203_v42, 0.0  ;;  %v14106_v56 = vld [vmem:[#allocation24_spill] sm:$0xff] }
 0x272   : > { %v10289_v14 = vpop.f32.mrf.mxu1  ;;  %v3329_v62 = vadd.f32 %v14103_v46, %v3180_v4  ;;  %v3331_v3 = vadd.f32 %v14106_v56, %v3182_v17  ;;  %v3332_v26 = vadd.f32 %v14107_v25, %v3183_v35  ;;  %v14109_v28 = vld [vmem:[#allocation37_spill] sm:$0xff] }
 0x273   : > { %v4204_v29 = vadd.f32 %v12741_v9, %v3963_v50  ;;  %v4218_v0 = vmax.f32 %v4206_v16, 0.0  ;;  %v4217_v9 = vmax.f32 %v4205_v21, 0.0  ;;  %v3968_v1 = vadd.f32 %v10289_v14, %v3819_v37  ;;  %v10940_v50 = vld [vmem:[%s13923_s2 + $0x10] sm:$0xff]   ;;  %v11121_v14 = vld [vmem:[%s13923_s2 + $0x18] sm:$0xff]  }
 0x274   : > { %v3931_v63 = vpop.f32.mrf.mxu1  ;;  %v3570_v31 = vadd.f32 %v12750_v6, %v3329_v62  ;;  %v3572_v43 = vadd.f32 %v12739_v30, %v3331_v3  ;;  %v3330_v42 = vadd.f32 %v14109_v28, %v3181_v19  ;;  %v3573_v33 = vadd.f32 %v12762_v11, %v3332_v26  ;;  %v14110_v11 = vld [vmem:[#allocation46_spill] sm:$0xff]  ;;  %v10958_v28 = vld [vmem:[%s13923_s2 + $0x70] sm:$0xff]  }
 0x275   : > { %v4216_v52 = vmax.f32 %v4204_v29, 0.0  ;;  %v3966_v54 = vadd.f32 %v3931_v63, %v3817_v27  ;;  %v4228_v16 = vpack.c.bf16 %v4218_v0, %v4217_v9  ;;  %v4209_v35 = vadd.f32 %v12764_v55, %v3968_v1  ;;  %v10947_v55 = vld [vmem:[%s13923_s2 + $0x8] sm:$0xff]   ;;  %v10314_v0 = vpop.f32.mrf.mxu0 }
 0x276   : > { %v10290_v24 = vpop.f32.mrf.mxu1  ;;  %v3571_v34 = vadd.f32 %v12772_v5, %v3330_v42  ;;  %v3823_v29 = vadd.f32 %v14111_v58, %v3572_v43  ;;  %v14115_v42 = vld [vmem:[#allocation21_spill] sm:$0xff] }
 0x277   : > { %v4227_v4 = vpack.c.bf16 %v4216_v52, %v4215_v18  ;;  %v3969_v59 = vadd.f32 %v10290_v24, %v3820_v53  ;;  %v4207_v17 = vadd.f32 %v12783_v61, %v3966_v54  ;;  %v3821_v61 = vadd.f32 %v14110_v11, %v3570_v31  ;;  %v14113_v18 = vld [vmem:[#allocation51_spill] sm:$0xff]  ;;  %v10950_v53 = vld [vmem:[%s13923_s2] sm:$0xff]   ;;  %v4191_v9 = vpop.f32.mrf.mxu0  ;;  %v10954_v31 = vld [vmem:[%s13923_s2 + $0x78] sm:$0xff]  }
 0x278   : > { %v3934_v49 = vpop.f32.mrf.mxu1  ;;  %v4221_v46 = vmax.f32 %v4209_v35, 0.0  ;;  %v3822_v52 = vadd.f32 %v14113_v18, %v3571_v34  ;;  %v14120_v35 = vld [vmem:[#allocation40_spill] sm:$0xff]  ;;  %v14121_v34 = vld [vmem:[#allocation43_spill] sm:$0xff]  ;;  %v10992_v11 = vld [vmem:[%s11195_s8 + $0x78] sm:$0xff]  }
 0x279   : > { %v4210_v20 = vadd.f32 %v10310_v22, %v3969_v59  ;;  %v3967_v6 = vadd.f32 %v3934_v49, %v3818_v2  ;;  %10319 = vmatprep.mubr.msk.bf16.mxu1 %vm2163_vm3, %v4227_v4  ;;  %v4219_v27 = vmax.f32 %v4207_v17, 0.0  ;;  %v10961_v49 = vld [vmem:[%s13923_s2 + $0x68] sm:$0xff]   ;;  %v14118_v17 = vld [vmem:[#allocation38_spill] sm:$0xff] }
 0x27a   : > { %v10293_v30 = vpop.f32.mrf.mxu1  ;;  %10320 = vmatmul.mubr.msk.bf16.vlgmr.msra.gmra.mxu1 %vm2163_vm3, %v4228_v16  ;;  %v14116_v16 = vld [vmem:[#allocation34_spill] sm:$0xff]  ;;  %v14125_v18 = vld [vmem:[#allocation27_spill] sm:$0xff] }
 0x27b   : > { %v4208_v21 = vadd.f32 %v4175_v38, %v3967_v6  ;;  %10352 = vmatpush3.bf16.msra.mxu1 %v11121_v14  ;;  %v4222_v22 = vmax.f32 %v4210_v20, 0.0  ;;  %v14112_v38 = vld [vmem:[#allocation49_spill] sm:$0xff]  ;;  %v3972_v62 = vadd.f32 %v10293_v30, %v3823_v29  ;;  %v10991_v30 = vld [vmem:[%s11195_s8 + $0x70] sm:$0xff]   ;;  %v10983_v14 = vld [vmem:[%s13923_s2 + $0xa8] sm:$0xff]  }
 0x27c   : > { %v3947_v57 = vpop.f32.mrf.mxu1  ;;  %10353 = vmatprep.subr.bf16.mxu1 %v10940_v50  ;;  %v3824_v19 = vadd.f32 %v14112_v38, %v3573_v33  ;;  %v14117_v33 = vld [vmem:[#allocation36_spill] sm:$0xff]  ;;  %v10971_v20 = vld [vmem:[%s13923_s2 + $0xb8] sm:$0xff]   ;;  %v5456_v58 = vshrl.u32 %v10991_v30, 16 }
 0x27d   : > { %v4220_v48 = vmax.f32 %v4208_v21, 0.0  ;;  %v3970_v5 = vadd.f32 %v3947_v57, %v3821_v61  ;;  %v4230_v54 = vpack.c.bf16 %v4222_v22, %v4221_v46  ;;  %v4213_v26 = vadd.f32 %v10313_v47, %v3972_v62  ;;  %v14114_v47 = vld [vmem:[#allocation18_spill] sm:$0xff]  ;;  %v14119_v6 = vld [vmem:[#allocation29_spill] sm:$0xff]  ;;  %v10999_v46 = vld [vmem:[%s11195_s8 + $0x88] sm:$0xff]  }
 0x27e   : > { %v10294_v51 = vpop.f32.mrf.mxu1  ;;  %v14122_v21 = vld [vmem:[#allocation45_spill] sm:$0xff]  ;;  %v5458_v61 = vshll.u32 %v10991_v30, 16  ;;  %v10986_v22 = vld [vmem:[%s13923_s2 + $0xa0] sm:$0xff]   ;;  %v5463_v57 = vshll.u32 %v10992_v11, 16 }
 0x27f   : > { %v4229_v37 = vpack.c.bf16 %v4220_v48, %v4219_v27  ;;  %v3973_v63 = vadd.f32 %v10294_v51, %v3824_v19  ;;  %10354 = vmatpush3.bf16.msra.mxu1 %v10940_v50  ;;  %v4211_v56 = vadd.f32 %v4188_v41, %v3970_v5  ;;  %v4225_v36 = vmax.f32 %v4213_v26, 0.0  ;;  %v10965_v50 = vld [vmem:[%s13923_s2 + $0x60] sm:$0xff]   ;;  %v10977_v41 = vld [vmem:[%s13923_s2 + $0xb0] sm:$0xff]   ;;  %v14124_v48 = vld [vmem:[#allocation15_spill] sm:$0xff] }
 0x280   : > { %v3950_v40 = vpop.f32.mrf.mxu1  ;;  %10355 = vmatprep.subr.bf16.mxu1 %v10947_v55  ;;  %v5460_v29 = vrot.slane %v5458_v61, 1  ;;  %v10993_v27 = vld [vmem:[%s11195_s8 + $0x80] sm:$0xff]   ;;  %v5465_v38 = vrot.slane %v5463_v57, 1  ;;  %v10994_v19 = vld [vmem:[%s13923_s2 + $0xf8] sm:$0xff]  }
 0x281   : > { %v4214_v3 = vadd.f32 %v10314_v0, %v3973_v63  ;;  %v3971_v25 = vadd.f32 %v3950_v40, %v3822_v52  ;;  %10323 = vmatprep.mubr.msk.bf16.mxu1 %vm2163_vm3, %v4229_v37  ;;  %v4223_v4 = vmax.f32 %v4211_v56, 0.0  ;;  %v5471_v62 = vshll.u32 %v10993_v27, 16 }
 0x282   : > { %10324 = vmatmul.mubr.msk.bf16.gmra.mxu1 %vm2163_vm3, %v4230_v54  ;;  %v5461_v5 = vor.u32 %v5460_v29, %v5456_v58  ;;  %v5467_v0 = vshrl.u32 %v10992_v11, 16  ;;  %v5475_v37 = vshrl.u32 %v10993_v27, 16  ;;  %v5479_v63 = vshll.u32 %v10999_v46, 16  ;;  %v11000_v54 = vld [vmem:[%s11195_s8 + $0x90] sm:$0xff]   ;;  %v14129_v58 = vld [vmem:[#allocation11_spill] sm:$0xff] }
 0x283   : > { %v4212_v1 = vadd.f32 %v4191_v9, %v3971_v25  ;;  %10356 = vmatpush3.bf16.msra.mxu1 %v10947_v55  ;;  %v4226_v24 = vmax.f32 %v4214_v3, 0.0  ;;  %v14123_v55 = vld [vmem:[#allocation2_spill] sm:$0xff]  ;;  %v5473_v52 = vrot.slane %v5471_v62, 1  ;;  %v11006_v3 = vld [vmem:[%s11195_s8 + $0x98] sm:$0xff]   ;;  %v5487_v25 = vshll.u32 %v11000_v54, 16  ;;  %v11023_v62 = vld [vmem:[%s13923_s2 + $0x30] sm:$0xff]  }
 0x284   : > { %10357 = vmatprep.subr.bf16.mxu1 %v10950_v53  ;;  %v5466_v51 = vsel %vm657_vm2, %v5461_v5, %v5465_v38  ;;  %v5469_v40 = vor.u32 %v5467_v0, %v5465_v38  ;;  %v5481_v56 = vrot.slane %v5479_v63, 1  ;;  %v5483_v9 = vshrl.u32 %v10999_v46, 16  ;;  %v11025_v63 = vld [vmem:[%s13923_s2 + $0x20] sm:$0xff]  }
 0x285   : > { %v4224_v59 = vmax.f32 %v4212_v1, 0.0  ;;  %v4232_v43 = vpack.c.bf16 %v4226_v24, %v4225_v36  ;;  %v10998_v1 = vld [vmem:[%s13923_s2 + $0xf0] sm:$0xff]   ;;  %v14131_v27 = vcombine.low %v12610_v8, %v12613_v15 }
 0x286   : > { %v5474_v26 = vsel %vm657_vm2, %v5469_v40, %v5473_v52  ;;  %v5485_v36 = vor.u32 %v5483_v9, %v5481_v56  ;;  %v6456_v40 = vld [vmem:[%s11195_s8 + $0xa0] sm:$0xf]  ;;  %v6458_v9 = vld [vmem:[%s11195_s8 + $0xa8] sm:$0xf] }
 0x287   : > { %v4231_v2 = vpack.c.bf16 %v4224_v59, %v4223_v4  ;;  %10358 = vmatpush3.bf16.msra.mxu1 %v10950_v53  ;;  %v5477_v53 = vor.u32 %v5475_v37, %v5473_v52  ;;  %v5495_v4 = vshll.u32 %v11006_v3, 16  ;;  %v5489_v59 = vrot.slane %v5487_v25, 1  ;;  %v6454_v52 = vld [vmem:[%s11195_s8 + $0x98] sm:$0xf] }
 0x288   : > { %10391 = vmatprep.subr.bf16.mxu1 %v10954_v31 }
 0x289   : > { %10327 = vmatprep.mubr.msk.bf16.mxu1 %vm2163_vm3, %v4231_v2  ;;  %v5482_v24 = vsel %vm657_vm2, %v5477_v53, %v5481_v56  ;;  %v11007_v2 = vld [vmem:[%s11195_s8 + $0xa0] ss:$0 sps:$4 sm:$0x11]  }
 0x28a   : > { %10328 = vmatmul.mubr.msk.bf16.gmra.mxu1 %vm2163_vm3, %v4232_v43  ;;  %v11003_v43 = vld [vmem:[%s13923_s2 + $0xe8] sm:$0xff]  }
 0x28b   : > { %10359 = vmatprep.mubr.msk.bf16.mxu1 %vm307_vm0, %v14114_v47 }
 0x292   : > { %10360 = vmatmul.mubr.msk.bf16.vlgmr.msra.gmra.mxu1 %vm307_vm0, %v14115_v42  ;;  %v12924_v42 = vpop.f32.mrf.mxu0 }
 0x293   : > { %10392 = vmatpush3.bf16.msra.mxu1 %v10954_v31  ;;  %10363 = vmatprep.mubr.msk.bf16.mxu1 %vm307_vm0, %v14116_v16  ;;  %v5491_v31 = vshrl.u32 %v11000_v54, 16  ;;  %v5490_v16 = vsel %vm657_vm2, %v5485_v36, %v5489_v59  ;;  %v6455_v54 = vld [vmem:[%s11195_s8 + $0x9c] sm:$0xf] }
 0x294   : > { %10393 = vmatprep.subr.bf16.mxu1 %v10958_v28  ;;  %v11031_v36 = vld [vmem:[%s13923_s2 + $0x58] sm:$0xff]  }
 0x295   : > { %v5493_v47 = vor.u32 %v5491_v31, %v5489_v59  ;;  %v6460_v31 = vld [vmem:[%s11195_s8 + $0xb0] sm:$0xf] }
 0x297   : > { %10394 = vmatpush3.bf16.msra.mxu1 %v10958_v28  ;;  %v5497_v28 = vrot.slane %v5495_v4, 1 }
 0x298   : > { %10395 = vmatprep.subr.bf16.mxu1 %v10961_v49 }
 0x29a   : > { %10364 = vmatmul.mubr.msk.bf16.gmra.mxu1 %vm307_vm0, %v14117_v33  ;;  %v5498_v33 = vsel %vm657_vm2, %v5493_v47, %v5497_v28 }
 0x29b   : > { %10396 = vmatpush3.bf16.msra.mxu1 %v10961_v49  ;;  %10367 = vmatprep.mubr.msk.bf16.mxu1 %vm307_vm0, %v14118_v17  ;;  %v5499_v49 = vshrl.u32 %v11006_v3, 16  ;;  %v11009_v17 = vld [vmem:[%s13923_s2 + $0xe0] sm:$0xff]   ;;  %v9292_v3 = vcombine.low %v6455_v54, %v6456_v40 }
 0x29c   : > { %10397 = vmatprep.subr.bf16.mxu1 %v10965_v50 }
 0x29f   : > { %10398 = vmatpush3.bf16.msra.mxu1 %v10965_v50  ;;  %v5503_v50 = vshll.u32 %v11007_v2, 16 }
 0x2a0   : > { %10431 = vmatprep.subr.bf16.mxu1 %v10971_v20 }
 0x2a2   : > { %10368 = vmatmul.mubr.msk.bf16.gmra.mxu1 %vm307_vm0, %v14119_v6  ;;  %v5501_v6 = vor.u32 %v5499_v49, %v5497_v28  ;;  %v11037_v28 = vld [vmem:[%s13923_s2 + $0x50] sm:$0xff]   ;;  %v6462_v49 = vld [vmem:[%s11195_s8 + $0xb8] sm:$0xf] }
 0x2a3   : > { %10399 = vmatprep.mubr.msk.bf16.mxu1 %vm307_vm0, %v14120_v35  ;;  %v5505_v35 = vrot.slane %v5503_v50, 1  ;;  %v6452_v50 = vld [vmem:[%s11195_s8 + $0x90] sm:$0x8] }
 0x2a5   : > { %v5506_v30 = vsel %vm657_vm2, %v5501_v6, %v5505_v35  ;;  %v6463_v6 = vld [vmem:[%s11195_s8 + $0xbc] sm:$0xf]  ;;  %v13061_v35 = vld [vmem:[%s11195_s8 + $0xc0] sm:$0xf] }
 0x2aa   : > { %10400 = vmatmul.mubr.msk.bf16.vlgmr.msra.gmra.mxu1 %vm307_vm0, %v14121_v34  ;;  %v11122_v34 = vld [vmem:[%s13924_s3 + $0x8] sm:$0xff]  }
 0x2ab   : > { %10432 = vmatpush3.bf16.msra.mxu1 %v10971_v20  ;;  %10403 = vmatprep.mubr.msk.bf16.mxu1 %vm307_vm0, %v14122_v21  ;;  %v12932_v20 = vpop.f32.mrf.mxu0 }
 0x2ac   : > { %10433 = vmatprep.subr.bf16.mxu1 %v10977_v41 }
 0x2af   : > { %10434 = vmatpush3.bf16.msra.mxu1 %v10977_v41  ;;  %v12935_v41 = vpop.f32.mrf.mxu0 }
 0x2b0   : > { %10435 = vmatprep.subr.bf16.mxu1 %v10983_v14 }
 0x2b1   : > { %v12942_v21 = vpop.f32.mrf.mxu0 }
 0x2b2   : > { %10404 = vmatmul.mubr.msk.bf16.gmra.mxu1 %vm307_vm0, %v14123_v55 }
 0x2b3   : > { %10436 = vmatpush3.bf16.msra.mxu1 %v10983_v14  ;;  %10407 = vmatprep.mubr.msk.bf16.mxu1 %vm307_vm0, %v14124_v48  ;;  %v14126_v14 = vld [vmem:[#allocation5_spill] sm:$0xff]  ;;  %v12948_v61 = vpop.f32.mrf.mxu0 }
 0x2b4   : > { %10437 = vmatprep.subr.bf16.mxu1 %v10986_v22  ;;  %v14127_v11 = vcombine.low %v12556_v32, %v14126_v14  ;;  %v11123_v32 = vld [vmem:[%s13924_s3] sm:$0xff]   ;;  %v9296_v14 = vcombine.low %v6463_v6, %v13061_v35 }
 0x2b5   : > { %v12954_v57 = vpop.f32.mrf.mxu0 }
 0x2b7   : > { %10438 = vmatpush3.bf16.msra.mxu1 %v10986_v22  ;;  %v14128_v22 = vld [vmem:[#allocation8_spill] sm:$0xff]  ;;  %v12963_v55 = vpop.f32.mrf.mxu0 }
 0x2b8   : > { %10471 = vmatprep.subr.bf16.mxu1 %v10994_v19  ;;  %v14130_v29 = vcombine.low %v14128_v22, %v14129_v58  ;;  %v11047_v22 = vld [vmem:[%s11195_s8 + $0x94] sm:$0xff]  }
 0x2b9   : > { %v12969_v48 = vpop.f32.mrf.mxu0 }
 0x2ba   : > { %10408 = vmatmul.mubr.msk.bf16.gmra.mxu1 %vm307_vm0, %v14125_v18  ;;  %v6453_v18 = vld [vmem:[%s11195_s8 + $0x94] sm:$0xf] }
 0x2bb   : > { %10439 = vmatprep.mubr.msk.bf16.mxu1 %vm307_vm0, %v5466_v51  ;;  %v12975_v44 = vpop.f32.mrf.mxu0  ;;  %v11024_v51 = vld [vmem:[%s13923_s2 + $0x28] sm:$0xff]   ;;  %v9291_v53 = vcombine.low %v6453_v18, %v6454_v52 }
 0x2bd   : > { %v12981_v13 = vpop.f32.mrf.mxu0  ;;  %10535 = vmatprep.mubr.msk.bf16.mxu0 %vm307_vm0, %v9291_v53  ;;  %v4328_v53 = vld [vmem:[%s12359_s6 + $0x40] sm:$0xff] }
 0x2c2   : > { %10440 = vmatmul.mubr.msk.bf16.vlgmr.msra.gmra.mxu1 %vm307_vm0, %v5474_v26  ;;  %v6457_v26 = vld [vmem:[%s11195_s8 + $0xa4] sm:$0xf] }
 0x2c3   : > { %10472 = vmatpush3.bf16.msra.mxu1 %v10994_v19  ;;  %10443 = vmatprep.mubr.msk.bf16.mxu1 %vm307_vm0, %v5482_v24  ;;  %v6459_v24 = vld [vmem:[%s11195_s8 + $0xac] sm:$0xf]  ;;  %v9293_v4 = vcombine.low %v6457_v26, %v6458_v9 }
 0x2c4   : > { %10473 = vmatprep.subr.bf16.mxu1 %v10998_v1  ;;  %v9294_v2 = vcombine.low %v6459_v24, %v6460_v31 }
 0x2c7   : > { %10474 = vmatpush3.bf16.msra.mxu1 %v10998_v1  ;;  %v13035_v1 = vcombine.low %v6454_v52, %v6455_v54  ;;  %v13078_v54 = vld [vmem:[%s11195_s8 + $0xa4] sm:$0xff]  }
 0x2c8   : > { %10475 = vmatprep.subr.bf16.mxu1 %v11003_v43 }
 0x2ca   : > { %10444 = vmatmul.mubr.msk.bf16.gmra.mxu1 %vm307_vm0, %v5490_v16  ;;  %v6461_v16 = vld [vmem:[%s11195_s8 + $0xb4] sm:$0xf] }
 0x2cb   : > { %10476 = vmatpush3.bf16.msra.mxu1 %v11003_v43  ;;  %10447 = vmatprep.mubr.msk.bf16.mxu1 %vm307_vm0, %v5498_v33  ;;  %v11030_v43 = vld [vmem:[%s13923_s2 + $0x18] sm:$0xff]   ;;  %v9309_v33 = vcombine.low %v6456_v40, %v6457_v26  ;;  %v11045_v26 = vld [vmem:[%s13923_s2 + $0x40] sm:$0xff]  }
 0x2cc   : > { %10477 = vmatprep.subr.bf16.mxu1 %v11009_v17 }
 0x2cd   : > { %v6661_v58 = vshrl.u32 %v9309_v33, 16 }
 0x2cf   : > { %10478 = vmatpush3.bf16.msra.mxu1 %v11009_v17  ;;  %v13057_v17 = vcombine.low %v6458_v9, %v6459_v24  ;;  %v6883_v9 = vshrl.u32 %v11047_v22, 16 }
 0x2d0   : > { %10511 = vmatprep.subr.bf16.mxu1 %v11122_v34 }
 0x2d2   : > { %10448 = vmatmul.mubr.msk.bf16.gmra.mxu1 %vm307_vm0, %v5506_v30  ;;  %v9295_v30 = vcombine.low %v6461_v16, %v6462_v49 }
 0x2d3   : > { %10479 = vmatprep.mubr.msk.bf16.mxu1 %vm307_vm0, %v14127_v11  ;;  %v11044_v11 = vld [vmem:[%s13923_s2 + $0x48] sm:$0xff]  }
 0x2da   : > { %10480 = vmatmul.mubr.msk.bf16.vlgmr.msra.gmra.mxu1 %vm307_vm0, %v14130_v29  ;;  %v6664_v29 = vshll.u32 %v9309_v33, 16 }
 0x2db   : > { %10483 = vmatprep.mubr.msk.bf16.mxu1 %vm307_vm0, %v9230_v7  ;;  %10512 = vmatpush3.bf16.msra.mxu1 %v11122_v34  ;;  %v12983_v7 = vpop.f32.mrf.mxu0 }
 0x2dc   : > { %10513 = vmatprep.subr.bf16.mxu1 %v11123_v32  ;;  %14132 = vst [vmem:[#allocation31_spill] sm:$0xff] %v12983_v7  ;;  %v6666_v52 = vrot.slane %v6664_v29, 4  ;;  %v4329_v29 = vld [vmem:[%s12359_s6 + $0x48] sm:$0xff] }
 0x2dd   : > { %v12985_v8 = vpop.f32.mrf.mxu0 }
 0x2de   : > { %14133 = vst [vmem:[#allocation19_spill] sm:$0xff] %v12985_v8  ;;  %v13353_v8 = vld [vmem:[%s11195_s8 + $0xd8] sm:$0xf] }
 0x2df   : > { %10514 = vmatpush3.bf16.msra.mxu1 %v11123_v32  ;;  %v12987_v15 = vpop.f32.mrf.mxu0  ;;  %v13071_v32 = vcombine.low %v6460_v31, %v6461_v16  ;;  %v4342_v16 = vld [vmem:[%s12359_s6 + $0x50] sm:$0xff] }
 0x2e0   : > { %10547 = vmatprep.subr.bf16.mxu1 %v11030_v43  ;;  %v6898_v43 = vshll.u32 %v13078_v54, 16 }
 0x2e1   : > { %v12989_v5 = vpop.f32.mrf.mxu0 }
 0x2e2   : > { %10484 = vmatmul.mubr.msk.bf16.gmra.mxu1 %vm307_vm0, %v14131_v27  ;;  %v13073_v27 = vcombine.low %v6462_v49, %v6463_v6 }
 0x2e3   : > { %10487 = vmatprep.mubr.msk.bf16.mxu1 %vm307_vm0, %v9232_v23  ;;  %v12991_v10 = vpop.f32.mrf.mxu0 }
 0x2e5   : > { %v12993_v45 = vpop.f32.mrf.mxu0 }
 0x2e7   : > { %v12995_v23 = vpop.f32.mrf.mxu0 }
 0x2e9   : > { %v12997_v38 = vpop.f32.mrf.mxu0 }
 0x2ea   : > { %10488 = vmatmul.mubr.msk.bf16.gmra.mxu1 %vm307_vm0, %v9233_v60  ;;  %v11022_v60 = vld [vmem:[%s13923_s2 + $0x38] sm:$0xff]  }
 0x2eb   : > { %v12999_v39 = vpop.f32.mrf.mxu0  ;;  %10527 = vmatprep.subr.bf16.mxu0 %v11022_v60 }
 0x2ec   : > { %10528 = vmatpush3.bf16.msra.mxu0 %v11022_v60  ;;  %v11048_v60 = vld [vmem:[%s11195_s8 + $0x9c] sm:$0xff]  }
 0x2ed   : > { %v13001_v12 = vpop.f32.mrf.mxu0  ;;  %10529 = vmatprep.subr.bf16.mxu0 %v11023_v62  ;;  %v6890_v24 = vshll.u32 %v11048_v60, 16  ;;  %v6894_v31 = vshrl.u32 %v11048_v60, 16 }
 0x2ee   : > { %14134 = vst [vmem:[#allocation41_spill] sm:$0xff] %v13001_v12 }
 0x2ef   : > { %v13006_v19 = vpop.f32.mrf.mxu0 }
 0x2f0   : > { %14135 = vst [vmem:[#allocation6_spill] sm:$0xff] %v13006_v19  ;;  %10530 = vmatpush3.bf16.msra.mxu0 %v11023_v62  ;;  %v9307_v62 = vcombine.low %v6452_v50, %v6453_v18  ;;  %v6892_v50 = vrot.slane %v6890_v24, 1 }
 0x2f1   : > { %v13008_v46 = vpop.f32.mrf.mxu0  ;;  %10531 = vmatprep.subr.bf16.mxu0 %v11024_v51 }
 0x2f2   : > { %v6644_v33 = vshrl.u32 %v9307_v62, 16  ;;  %v6647_v6 = vshll.u32 %v9307_v62, 16 }
 0x2f3   : > { %v13013_v0 = vpop.f32.mrf.mxu0 }
 0x2f4   : > { %14136 = vst [vmem:[#allocation3_spill] sm:$0xff] %v13013_v0  ;;  %10532 = vmatpush3.bf16.msra.mxu0 %v11024_v51  ;;  %v6885_v51 = vshll.u32 %v11047_v22, 16  ;;  %v6655_v22 = vshll.u32 %v13035_v1, 16 }
 0x2f5   : > { %v13018_v37 = vpop.f32.mrf.mxu0  ;;  %10533 = vmatprep.subr.bf16.mxu0 %v11025_v63 }
 0x2f6   : > { %14137 = vst [vmem:[#allocation22_spill] sm:$0xff] %v13018_v37  ;;  %v6887_v18 = vrot.slane %v6885_v51, 1  ;;  %v6896_v51 = vor.u32 %v6894_v31, %v6892_v50 }
 0x2f7   : > { %v13027_v56 = vpop.f32.mrf.mxu0 }
 0x2f8   : > { %10534 = vmatpush3.bf16.msra.mxu0 %v11025_v63  ;;  %v6663_v63 = vrot.slane %v6661_v58, 3  ;;  %v6888_v49 = vor.u32 %v6887_v18, %v6883_v9  ;;  %v11052_v9 = vld [vmem:[%s11195_s8 + $0xac] sm:$0xff]   ;;  %v4356_v18 = vld [vmem:[%s12359_s6 + $0x60] sm:$0xff] }
 0x2f9   : > { %v13031_v25 = vpop.f32.mrf.mxu0  ;;  %10567 = vmatprep.subr.bf16.mxu0 %v11031_v36 }
 0x2fa   : > { %v6893_v60 = vsel %vm657_vm2, %v6888_v49, %v6892_v50  ;;  %v13106_v50 = vld [vmem:[%s11195_s8 + $0xb4] sm:$0xff]  }
 0x2fb   : > { %10536 = vmatmul.mubr.msk.bf16.vlgmr.msra.gmra.mxu0 %vm307_vm0, %v9292_v3  ;;  %v13039_v59 = vpop.f32.mrf.mxu0 }
 0x2fc   : > { %10539 = vmatprep.mubr.msk.bf16.mxu0 %vm307_vm0, %v9293_v4  ;;  %10568 = vmatpush3.bf16.msra.mxu0 %v11031_v36  ;;  %v13086_v4 = vor.u32 %v6666_v52, %v6663_v63  ;;  %v6679_v36 = vshrl.u32 %v13071_v32, 16  ;;  %v6646_v63 = vrot.slane %v6644_v33, 3  ;;  %v6649_v52 = vrot.slane %v6647_v6, 4  ;;  %v4343_v6 = vld [vmem:[%s12359_s6 + $0x58] sm:$0xff] }
 0x2fd   : > { %v13049_v47 = vpop.f32.mrf.mxu0  ;;  %10569 = vmatprep.subr.bf16.mxu0 %v11037_v28 }
 0x2ff   : > { %v13063_v34 = vpop.f32.mrf.mxu0 }
 0x300   : > { %10570 = vmatpush3.bf16.msra.mxu0 %v11037_v28  ;;  %14138 = vst [vmem:[#allocation39_spill] sm:$0xff] %v13063_v34  ;;  %v13348_v34 = vld [vmem:[%s11195_s8 + $0xd4] sm:$0xf] }
 0x301   : > { %10571 = vmatprep.subr.bf16.mxu0 %v11044_v11  ;;  %v13081_v3 = vpop.f32.mrf.mxu0 }
 0x302   : > { %14139 = vst [vmem:[#allocation32_spill] sm:$0xff] %v13081_v3 }
 0x303   : > { %10540 = vmatmul.mubr.msk.bf16.gmra.mxu0 %vm307_vm0, %v9294_v2  ;;  %v6682_v2 = vshll.u32 %v13071_v32, 16  ;;  %v13095_v32 = vpop.f32.mrf.mxu0 }
 0x304   : > { %10543 = vmatprep.mubr.msk.bf16.mxu0 %vm307_vm0, %v9295_v30  ;;  %10572 = vmatpush3.bf16.msra.mxu0 %v11044_v11  ;;  %v6652_v11 = vshrl.u32 %v13035_v1, 16  ;;  %14140 = vst [vmem:[#allocation42_spill] sm:$0xff] %v13095_v32  ;;  %v13345_v32 = vld [vmem:[%s11195_s8 + $0xd0] sm:$0xf] }
 0x305   : > { %10573 = vmatprep.subr.bf16.mxu0 %v11045_v26 }
 0x308   : > { %10574 = vmatpush3.bf16.msra.mxu0 %v11045_v26  ;;  %v6657_v26 = vrot.slane %v6655_v22, 4  ;;  %v6684_v22 = vrot.slane %v6682_v2, 4 }
 0x30b   : > { %10544 = vmatmul.mubr.msk.bf16.gmra.mxu0 %vm307_vm0, %v9296_v14  ;;  %v6900_v14 = vrot.slane %v6898_v43, 1  ;;  %v6650_v43 = vor.u32 %v6649_v52, %v6646_v63  ;;  %v11051_v52 = vld [vmem:[%s13923_s2 + $0x98] sm:$0xff]  }
 0x30c   : > { %10575 = vmatprep.mubr.msk.bf16.mxu0 %vm307_vm0, %v6893_v60  ;;  %10607 = vmatprep.subr.bf16.mxu0 %v11051_v52 }
 0x30d   : > { %v6901_v24 = vsel %vm657_vm2, %v6896_v51, %v6900_v14 }
 0x313   : > { %10576 = vmatmul.mubr.msk.bf16.vlgmr.msra.gmra.mxu0 %vm307_vm0, %v6901_v24  ;;  %v6673_v24 = vshll.u32 %v13057_v17, 16 }
 0x314   : > { %10608 = vmatpush3.bf16.msra.mxu0 %v11051_v52 }
 0x33a   : > { %v10321_v40 = vpop.f32.mrf.mxu1 }
 0x33c   : > { %v4285_v28 = vpop.f32.mrf.mxu1 }
 0x33d   : > { %v4330_v30 = vadd.f32 %v4328_v53, %v4285_v28  ;;  %v6654_v53 = vrot.slane %v6652_v11, 3  ;;  %v6681_v11 = vrot.slane %v6679_v36, 3  ;;  %v4357_v36 = vld [vmem:[%s12359_s6 + $0x68] sm:$0xff] }
 0x33e   : > { %v10322_v58 = vpop.f32.mrf.mxu1 }
 0x33f   : > { %v9523_v62 = vpack.c.bf16 %v4330_v30, %v4330_v30  ;;  %v4344_v40 = vadd.f32 %v10322_v58, %v4342_v16  ;;  %v6658_v49 = vor.u32 %v6657_v26, %v6654_v53  ;;  %v6906_v16 = vshll.u32 %v11052_v9, 16  ;;  %v13109_v30 = vpop.f32.mrf.mxu0 }
 0x340   : > { %v4288_v1 = vpop.f32.mrf.mxu1  ;;  %14141 = vst [vmem:[#allocation14_spill] sm:$0xff] %v13109_v30  ;;  %v6902_v58 = vshrl.u32 %v13078_v54, 16  ;;  %v6914_v53 = vshll.u32 %v13106_v50, 16  ;;  %v6685_v52 = vor.u32 %v6684_v22, %v6681_v11  ;;  %v6918_v11 = vshrl.u32 %v13106_v50, 16 }
 0x341   : > { %4340 = vst.msk [vmem:[%s12389_s12 + $0x20] sm:$0xf] %vm2271_vm4, %v9523_v62  ;;  %v9525_v31 = vpack.c.bf16 %v4344_v40, %v4344_v40  ;;  %v4331_v28 = vadd.f32 %v4329_v29, %v4288_v1  ;;  %v13115_v51 = vsel %vm416_vm1, %v6650_v43, %v6658_v49  ;;  %v13119_v63 = vsel %vm416_vm1, %v6658_v49, %v13086_v4 }
 0x342   : > { %v10325_v33 = vpop.f32.mrf.mxu1  ;;  %14142 = vst [vmem:[#allocation12_spill] sm:$0xff] %v13115_v51  ;;  %14143 = vst [vmem:[#allocation33_spill] sm:$0xff] %v13119_v63  ;;  %v6904_v2 = vor.u32 %v6902_v58, %v6900_v14  ;;  %v6908_v54 = vrot.slane %v6906_v16, 1  ;;  %v6910_v40 = vshrl.u32 %v11052_v9, 16  ;;  %v11056_v58 = vld [vmem:[%s11195_s8 + $0xbc] sm:$0xff]  }
 0x343   : > { %4354 = vst.msk [vmem:[%s12389_s12 + $0x28] sm:$0xf] %vm2271_vm4, %v9525_v31  ;;  %v9524_v60 = vpack.c.bf16 %v4331_v28, %v4331_v28  ;;  %v4358_v29 = vadd.f32 %v10325_v33, %v4356_v18  ;;  %v6670_v18 = vshrl.u32 %v13057_v17, 16  ;;  %v13130_v31 = vpop.f32.mrf.mxu0  ;;  %v6916_v28 = vrot.slane %v6914_v53, 1  ;;  %v13259_v51 = vld [vmem:[%s11195_s8 + $0xac] sm:$0xf] }
 0x344   : > { %v4300_v62 = vpop.f32.mrf.mxu1  ;;  %14144 = vst [vmem:[#allocation23_spill] sm:$0xff] %v13130_v31  ;;  %v6909_v14 = vsel %vm657_vm2, %v6904_v2, %v6908_v54  ;;  %v6912_v9 = vor.u32 %v6910_v40, %v6908_v54  ;;  %v9313_v2 = vcombine.low %v13061_v35, %v13061_v35  ;;  %v6922_v54 = vshll.u32 %v11056_v58, 16  ;;  %v11058_v40 = vld [vmem:[%s11195_s8 + $0xc4] ss:$0 sps:$4 sm:$0x11]  }
 0x345   : > { %4341 = vst.msk [vmem:[%s12389_s12 + $0x24] sm:$0xf] %vm2271_vm4, %v9524_v60  ;;  %v9527_v26 = vpack.c.bf16 %v4358_v29, %v4358_v29  ;;  %v4345_v1 = vadd.f32 %v4343_v6, %v4300_v62  ;;  %10579 = vmatprep.mubr.msk.bf16.mxu0 %vm307_vm0, %v6909_v14  ;;  %v6672_v33 = vrot.slane %v6670_v18, 3  ;;  %v6675_v6 = vrot.slane %v6673_v24, 4  ;;  %v4371_v60 = vld [vmem:[%s12359_s6 + $0x78] sm:$0xff]  ;;  %v11059_v14 = vld [vmem:[%s13923_s2 + $0x88] sm:$0xff]  }
 0x346   : > { %v10326_v43 = vpop.f32.mrf.mxu1  ;;  %v6917_v29 = vsel %vm657_vm2, %v6912_v9, %v6916_v28  ;;  %v6926_v22 = vshrl.u32 %v11056_v58, 16  ;;  %v6920_v50 = vor.u32 %v6918_v11, %v6916_v28  ;;  %v6697_v58 = vshrl.u32 %v9313_v2, 16 }
 0x347   : > { %4368 = vst.msk [vmem:[%s12389_s12 + $0x30] sm:$0xf] %vm2271_vm4, %v9527_v26  ;;  %v9526_v49 = vpack.c.bf16 %v4345_v1, %v4345_v1  ;;  %v4359_v16 = vadd.f32 %v10326_v43, %v4357_v36  ;;  %10580 = vmatmul.mubr.msk.bf16.gmra.mxu0 %vm307_vm0, %v6917_v29  ;;  %v6676_v36 = vor.u32 %v6675_v6, %v6672_v33  ;;  %v13145_v26 = vpop.f32.mrf.mxu0  ;;  %v11055_v1 = vld [vmem:[%s13923_s2 + $0x90] sm:$0xff]   ;;  %v6924_v43 = vrot.slane %v6922_v54, 1 }
 0x348   : > { %v4303_v17 = vpop.f32.mrf.mxu1  ;;  %14145 = vst [vmem:[#allocation35_spill] sm:$0xff] %v13145_v26  ;;  %10609 = vmatprep.subr.bf16.mxu0 %v11055_v1  ;;  %v6691_v33 = vshll.u32 %v13073_v27, 16  ;;  %v4370_v29 = vld [vmem:[%s12359_s6 + $0x70] sm:$0xff] }
 0x349   : > { %4355 = vst.msk [vmem:[%s12389_s12 + $0x2c] sm:$0xf] %vm2271_vm4, %v9526_v49  ;;  %v9528_v62 = vpack.c.bf16 %v4359_v16, %v4359_v16  ;;  %v13155_v35 = vsel %vm416_vm1, %v13086_v4, %v6676_v36  ;;  %v13158_v24 = vsel %vm416_vm1, %v6676_v36, %v6685_v52  ;;  %v6930_v49 = vshll.u32 %v11058_v40, 16  ;;  %10610 = vmatpush3.bf16.msra.mxu0 %v11055_v1 }
 0x34a   : > { %v10329_v53 = vpop.f32.mrf.mxu1  ;;  %14146 = vst [vmem:[#allocation44_spill] sm:$0xff] %v13155_v35  ;;  %14147 = vst [vmem:[#allocation10_spill] sm:$0xff] %v13158_v24  ;;  %v6688_v16 = vshrl.u32 %v13073_v27, 16  ;;  %v6928_v6 = vor.u32 %v6926_v22, %v6924_v43  ;;  %v6700_v17 = vshll.u32 %v9313_v2, 16  ;;  %v6925_v36 = vsel %vm657_vm2, %v6920_v50, %v6924_v43  ;;  %10611 = vmatprep.subr.bf16.mxu0 %v11059_v14  ;;  %v7069_v43 = vld [vmem:[%s11195_s8 + $0x9c] sm:$0x8] }
 0x34b   : > { %4369 = vst.msk [vmem:[%s12389_s12 + $0x34] sm:$0xf] %vm2271_vm4, %v9528_v62  ;;  %v4373_v18 = vadd.f32 %v10329_v53, %v4371_v60  ;;  %v13166_v62 = vpop.f32.mrf.mxu0  ;;  %v6932_v28 = vrot.slane %v6930_v49, 1  ;;  %v6693_v40 = vrot.slane %v6691_v33, 4  ;;  %10583 = vmatprep.mubr.msk.bf16.mxu0 %vm307_vm0, %v6925_v36  ;;  %v6699_v27 = vrot.slane %v6697_v58, 3 }
 0x34c   : > { %v4315_v9 = vpop.f32.mrf.mxu1  ;;  %14148 = vst [vmem:[#allocation47_spill] sm:$0xff] %v13166_v62  ;;  %v6690_v54 = vrot.slane %v6688_v16, 3  ;;  %v6702_v2 = vrot.slane %v6700_v17, 4  ;;  %v7071_v50 = vld [vmem:[%s11195_s8 + $0xa4] sm:$0xf] }
 0x34d   : > { %v9530_v4 = vpack.c.bf16 %v4373_v18, %v4373_v18  ;;  %v6933_v1 = vsel %vm657_vm2, %v6928_v6, %v6932_v28  ;;  %v7070_v9 = vld [vmem:[%s11195_s8 + $0xa0] sm:$0xf]  ;;  %v13179_v16 = vpop.f32.mrf.mxu0  ;;  %10612 = vmatpush3.bf16.msra.mxu0 %v11059_v14  ;;  %v7072_v6 = vld [vmem:[%s11195_s8 + $0xa8] sm:$0xf]  ;;  %v7073_v36 = vld [vmem:[%s11195_s8 + $0xac] sm:$0xf] }
 0x34e   : > { %v10330_v60 = vpop.f32.mrf.mxu1  ;;  %v6694_v11 = vor.u32 %v6693_v40, %v6690_v54  ;;  %v6703_v18 = vor.u32 %v6702_v2, %v6699_v27  ;;  %14149 = vst [vmem:[#allocation7_spill] sm:$0xff] %v13179_v16  ;;  %v9357_v58 = vcombine.low %v7069_v43, %v7070_v9  ;;  %v9382_v17 = vcombine.low %v7070_v9, %v7071_v50  ;;  %v7074_v28 = vld [vmem:[%s11195_s8 + $0xb0] sm:$0xf]  ;;  %v7077_v24 = vld [vmem:[%s11195_s8 + $0xbc] sm:$0xf] }
 0x34f   : > { %4383 = vst.msk [vmem:[%s12389_s12 + $0x3c] sm:$0xf] %vm2271_vm4, %v9530_v4  ;;  %10584 = vmatmul.mubr.msk.bf16.gmra.mxu0 %vm307_vm0, %v6933_v1  ;;  %v11060_v4 = vld [vmem:[%s13923_s2 + $0x80] sm:$0xff]   ;;  %v9358_v54 = vcombine.low %v7071_v50, %v7072_v6  ;;  %v9359_v14 = vcombine.low %v7073_v36, %v7074_v28  ;;  %v7080_v35 = vld [vmem:[%s11195_s8 + $0xc8] sm:$0xf] }
 0x350   : > { %v4317_v53 = vpop.f32.mrf.mxu1  ;;  %v13182_v33 = vsel %vm416_vm1, %v6685_v52, %v6694_v11  ;;  %10613 = vmatprep.subr.bf16.mxu0 %v11060_v4  ;;  %10615 = vmatprep.mubr.msk.bf16.mxu0 %vm307_vm0, %v9382_v17  ;;  %v7124_v52 = vshrl.u32 %v9357_v58, 16  ;;  %v7127_v27 = vshll.u32 %v9357_v58, 16  ;;  %v13266_v62 = vld [vmem:[%s11195_s8 + $0xb0] sm:$0xf] }
 0x351   : > { %v4372_v22 = vadd.f32 %v4370_v29, %v4317_v53  ;;  %14150 = vst [vmem:[#allocation16_spill] sm:$0xff] %v13182_v33  ;;  %v13189_v29 = vsel %vm416_vm1, %v6694_v11, %v6703_v18  ;;  %v9383_v53 = vcombine.low %v7072_v6, %v7073_v36  ;;  %v7132_v1 = vshrl.u32 %v9358_v54, 16  ;;  %v13199_v11 = vpop.f32.mrf.mxu0  ;;  %10614 = vmatpush3.bf16.msra.mxu0 %v11060_v4  ;;  %v7075_v4 = vld [vmem:[%s11195_s8 + $0xb4] sm:$0xf]  ;;  %v7076_v33 = vld [vmem:[%s11195_s8 + $0xb8] sm:$0xf] }
 0x352   : > { %v13177_v49 = vpop.f32.mrf.mxu1  ;;  %14151 = vst [vmem:[#allocation30_spill] sm:$0xff] %v13189_v29  ;;  %14152 = vst [vmem:[#allocation48_spill] sm:$0xff] %v13199_v11  ;;  %v7141_v18 = vshrl.u32 %v9359_v14, 16  ;;  %v7144_v9 = vshll.u32 %v9359_v14, 16  ;;  %v7126_v50 = vrot.slane %v7124_v52, 3  ;;  %v7129_v17 = vrot.slane %v7127_v27, 4 }
 0x353   : > { %v9529_v60 = vpack.c.bf16 %v4372_v22, %v4372_v22  ;;  %v7135_v22 = vshll.u32 %v9358_v54, 16  ;;  %v13211_v52 = vpop.f32.mrf.mxu0  ;;  %14162 = vst [vmem:[#allocation37_spill] sm:$0xff] %v13266_v62 }
 0x354   : > { %v4713_v40 = vpop.f32.mrf.mxu1  ;;  %v7143_v36 = vrot.slane %v7141_v18, 3  ;;  %v7146_v54 = vrot.slane %v7144_v9, 4  ;;  %14153 = vst [vmem:[#allocation9_spill] sm:$0xff] %v13211_v52 }
 0x355   : > { %4382 = vst.msk [vmem:[%s12389_s12 + $0x38] sm:$0xf] %vm2271_vm4, %v9529_v60  ;;  %v4714_v2 = vadd.f32 %v4713_v40, %v12932_v20  ;;  %v7134_v20 = vrot.slane %v7132_v1, 3  ;;  %v7137_v6 = vrot.slane %v7135_v22, 4  ;;  %v7130_v40 = vor.u32 %v7129_v17, %v7126_v50  ;;  %v11068_v22 = vld [vmem:[%s13923_s2 + $0xd8] sm:$0xff]  }
 0x356   : > { %v13197_v43 = vpop.f32.mrf.mxu1  ;;  %v7147_v27 = vor.u32 %v7146_v54, %v7143_v36  ;;  %v9384_v50 = vcombine.low %v7074_v28, %v7075_v4  ;;  %10647 = vmatprep.subr.bf16.mxu0 %v11068_v22 }
 0x357   : > { %v13202_v58 = vadd.f32 %v12989_v5, %v4714_v2  ;;  %10616 = vmatmul.mubr.msk.bf16.vlgmr.msra.gmra.mxu0 %vm307_vm0, %v9383_v53  ;;  %v7138_v29 = vor.u32 %v7137_v6, %v7134_v20  ;;  %v7078_v5 = vld [vmem:[%s11195_s8 + $0xc0] sm:$0xf]  ;;  %v9360_v2 = vcombine.low %v7075_v4, %v7076_v33  ;;  %v9385_v6 = vcombine.low %v7076_v33, %v7077_v24 }
 0x358   : > { %v13204_v60 = vpop.f32.mrf.mxu1  ;;  %v9361_v18 = vcombine.low %v7077_v24, %v7078_v5  ;;  %10648 = vmatpush3.bf16.msra.mxu0 %v11068_v22  ;;  %10619 = vmatprep.mubr.msk.bf16.mxu0 %vm307_vm0, %v9384_v50 }
 0x359   : > { %v13216_v1 = vsel %vm416_vm1, %v7130_v40, %v7138_v29  ;;  %v13222_v9 = vsel %vm416_vm1, %v7138_v29, %v7147_v27  ;;  %v7150_v17 = vshrl.u32 %v9360_v2, 16  ;;  %v7153_v36 = vshll.u32 %v9360_v2, 16 }
 0x35a   : > { %v13209_v14 = vpop.f32.mrf.mxu1  ;;  %14154 = vst [vmem:[#allocation13_spill] sm:$0xff] %v13216_v1  ;;  %14155 = vst [vmem:[#allocation50_spill] sm:$0xff] %v13222_v9  ;;  %v7159_v54 = vshrl.u32 %v9361_v18, 16  ;;  %v13227_v1 = vpop.f32.mrf.mxu0  ;;  %v7162_v9 = vshll.u32 %v9361_v18, 16  ;;  %v7081_v18 = vld [vmem:[%s11195_s8 + $0xcc] sm:$0xf] }
 0x35b   : > { %14156 = vst [vmem:[#allocation25_spill] sm:$0xff] %v13227_v1  ;;  %v7152_v29 = vrot.slane %v7150_v17, 3 }
 0x35c   : > { %v4729_v53 = vpop.f32.mrf.mxu1  ;;  %v7161_v4 = vrot.slane %v7159_v54, 3  ;;  %v7164_v33 = vrot.slane %v7162_v9, 4  ;;  %v13240_v22 = vpop.f32.mrf.mxu0 }
 0x35d   : > { %v4730_v20 = vadd.f32 %v4729_v53, %v12954_v57  ;;  %v7155_v57 = vrot.slane %v7153_v36, 4  ;;  %v7079_v53 = vld [vmem:[%s11195_s8 + $0xc4] sm:$0xf]  ;;  %14157 = vst [vmem:[#allocation4_spill] sm:$0xff] %v13240_v22  ;;  %v11080_v36 = vld [vmem:[%s13923_s2 + $0xc8] sm:$0xff]  }
 0x35e   : > { %v13225_v40 = vpop.f32.mrf.mxu1  ;;  %v7165_v50 = vor.u32 %v7164_v33, %v7161_v4  ;;  %v9362_v17 = vcombine.low %v7079_v53, %v7080_v35 }
 0x35f   : > { %v13231_v28 = vadd.f32 %v12997_v38, %v4730_v20  ;;  %10620 = vmatmul.mubr.msk.bf16.gmra.mxu0 %vm307_vm0, %v9385_v6  ;;  %v7156_v2 = vor.u32 %v7155_v57, %v7152_v29  ;;  %v11074_v38 = vld [vmem:[%s13923_s2 + $0xd0] sm:$0xff]   ;;  %v9386_v20 = vcombine.low %v7078_v5, %v7079_v53  ;;  %v9363_v6 = vcombine.low %v7081_v18, %v7081_v18 }
 0x360   : > { %v13233_v24 = vpop.f32.mrf.mxu1  ;;  %10649 = vmatprep.subr.bf16.mxu0 %v11074_v38  ;;  %v7168_v57 = vshrl.u32 %v9362_v17, 16  ;;  %v7171_v5 = vshll.u32 %v9362_v17, 16  ;;  %v13269_v17 = vld [vmem:[%s11195_s8 + $0xb4] sm:$0xf] }
 0x361   : > { %v13247_v9 = vsel %vm416_vm1, %v7147_v27, %v7156_v2  ;;  %v13253_v29 = vsel %vm416_vm1, %v7156_v2, %v7165_v50  ;;  %10623 = vmatprep.mubr.msk.bf16.mxu0 %vm307_vm0, %v9386_v20  ;;  %10650 = vmatpush3.bf16.msra.mxu0 %v11074_v38  ;;  %v9387_v27 = vcombine.low %v7080_v35, %v7081_v18  ;;  %v7177_v33 = vshrl.u32 %v9363_v6, 16 }
 0x362   : > { %v13238_v63 = vpop.f32.mrf.mxu1  ;;  %14158 = vst [vmem:[#allocation28_spill] sm:$0xff] %v13247_v9  ;;  %14159 = vst [vmem:[#allocation24_spill] sm:$0xff] %v13253_v29  ;;  %v7180_v53 = vshll.u32 %v9363_v6, 16  ;;  %v7710_v9 = vld [vmem:[%s11195_s8 + $0xa8] sm:$0x8]  ;;  %v13263_v29 = vpop.f32.mrf.mxu0  ;;  %10651 = vmatprep.subr.bf16.mxu0 %v11080_v36  ;;  %v7170_v20 = vrot.slane %v7168_v57, 3  ;;  %v9432_v57 = vcombine.low %v13266_v62, %v13269_v17 }
 0x363   : > { %14161 = vst [vmem:[#allocation17_spill] sm:$0xff] %v13263_v29  ;;  %v7173_v16 = vrot.slane %v7171_v5, 4  ;;  %14163 = vst [vmem:[#allocation46_spill] sm:$0xff] %v13269_v17  ;;  %v7179_v38 = vrot.slane %v7177_v33, 3  ;;  %v13276_v6 = vld [vmem:[%s11195_s8 + $0xb8] sm:$0xf] }
 0x364   : > { %v4745_v54 = vpop.f32.mrf.mxu1  ;;  %v7182_v18 = vrot.slane %v7180_v53, 4  ;;  %14165 = vst [vmem:[#allocation49_spill] sm:$0xff] %v13276_v6  ;;  %v13290_v33 = vpop.f32.mrf.mxu0  ;;  %v7773_v37 = vshrl.u32 %v9432_v57, 16  ;;  %v7776_v30 = vshll.u32 %v9432_v57, 16 }
 0x365   : > { %v4746_v4 = vadd.f32 %v4745_v54, %v12981_v13  ;;  %v9431_v13 = vcombine.low %v7710_v9, %v13259_v51  ;;  %v13279_v54 = vld [vmem:[%s11195_s8 + $0xbc] sm:$0xf]  ;;  %v7174_v29 = vor.u32 %v7173_v16, %v7170_v20  ;;  %14167 = vst [vmem:[#allocation18_spill] sm:$0xff] %v13290_v33  ;;  %10652 = vmatpush3.bf16.msra.mxu0 %v11080_v36  ;;  %v11081_v16 = vld [vmem:[%s13923_s2 + $0xc0] sm:$0xff]  }
 0x366   : > { %v13261_v2 = vpop.f32.mrf.mxu1  ;;  %v9433_v5 = vcombine.low %v13276_v6, %v13279_v54  ;;  %10653 = vmatprep.subr.bf16.mxu0 %v11081_v16  ;;  %v7778_v36 = vrot.slane %v7776_v30, 4  ;;  %v13310_v33 = vld [vmem:[%s11195_s8 + $0xc0] sm:$0xf]  ;;  %v13319_v30 = vld [vmem:[%s11195_s8 + $0xcc] sm:$0xf] }
 0x367   : > { %14160 = vst [vmem:[#allocation26_spill] sm:$0xff] %v13261_v2  ;;  %v13273_v35 = vadd.f32 %v13008_v46, %v4746_v4  ;;  %v7765_v26 = vshrl.u32 %v9431_v13, 16  ;;  %10624 = vmatmul.mubr.msk.bf16.gmra.mxu0 %vm307_vm0, %v9387_v27  ;;  %v7183_v46 = vor.u32 %v7182_v18, %v7179_v38  ;;  %v7768_v9 = vshll.u32 %v9431_v13, 16  ;;  %v11108_v2 = vld [vmem:[%s11195_s8 + $0xbc] sm:$0xff]  }
 0x368   : > { %v13281_v31 = vpop.f32.mrf.mxu1  ;;  %v13293_v53 = vsel %vm416_vm1, %v7165_v50, %v7174_v29  ;;  %v7775_v50 = vrot.slane %v7773_v37, 3  ;;  %v7782_v38 = vshrl.u32 %v9433_v5, 16  ;;  %v7785_v18 = vshll.u32 %v9433_v5, 16  ;;  %v13316_v37 = vld [vmem:[%s11195_s8 + $0xc8] sm:$0xf] }
 0x369   : > { %14164 = vst [vmem:[#allocation20_spill] sm:$0xff] %v13273_v35  ;;  %14166 = vst [vmem:[#allocation51_spill] sm:$0xff] %v13281_v31  ;;  %v7767_v20 = vrot.slane %v7765_v26, 3  ;;  %v13299_v0 = vsel %vm416_vm1, %v7174_v29, %v7183_v46  ;;  %v7770_v27 = vrot.slane %v7768_v9, 4  ;;  %v13307_v29 = vpop.f32.mrf.mxu0  ;;  %10654 = vmatpush3.bf16.msra.mxu0 %v11081_v16  ;;  %v13313_v35 = vld [vmem:[%s11195_s8 + $0xc4] sm:$0xf] }
 0x36a   : > { %v13288_v4 = vpop.f32.mrf.mxu1  ;;  %14168 = vst [vmem:[#allocation21_spill] sm:$0xff] %v13293_v53  ;;  %14169 = vst [vmem:[#allocation34_spill] sm:$0xff] %v13299_v0  ;;  %v7779_v46 = vor.u32 %v7778_v36, %v7775_v50  ;;  %v7784_v9 = vrot.slane %v7782_v38, 3  ;;  %v7787_v0 = vrot.slane %v7785_v18, 4  ;;  %v9434_v36 = vcombine.low %v13310_v33, %v13313_v35 }
 0x36b   : > { %v7771_v53 = vor.u32 %v7770_v27, %v7767_v20  ;;  %14170 = vst [vmem:[#allocation36_spill] sm:$0xff] %v13307_v29  ;;  %v13327_v16 = vpop.f32.mrf.mxu0  ;;  %v9435_v38 = vcombine.low %v13316_v37, %v13319_v30 }
 0x36c   : > { %v13301_v13 = vpop.f32.mrf.mxu1  ;;  %v7788_v27 = vor.u32 %v7787_v0, %v7784_v9  ;;  %14171 = vst [vmem:[#allocation38_spill] sm:$0xff] %v13327_v16  ;;  %v11091_v0 = vld [vmem:[%s13923_s2 + $0x118] sm:$0xff]   ;;  %v7791_v18 = vshrl.u32 %v9434_v36, 16  ;;  %v7794_v9 = vshll.u32 %v9434_v36, 16 }
 0x36d   : > { %v7780_v20 = vsel %vm416_vm1, %v7771_v53, %v7779_v46  ;;  %10687 = vmatprep.subr.bf16.mxu0 %v11091_v0  ;;  %v13342_v17 = vpop.f32.mrf.mxu0 }
 0x36e   : > { %v13305_v57 = vpop.f32.mrf.mxu1  ;;  %10655 = vmatprep.mubr.msk.bf16.mxu0 %vm307_vm0, %v7780_v20  ;;  %v7789_v50 = vsel %vm416_vm1, %v7779_v46, %v7788_v27  ;;  %v7800_v46 = vshrl.u32 %v9435_v38, 16  ;;  %v7803_v20 = vshll.u32 %v9435_v38, 16  ;;  %14173 = vst [vmem:[#allocation40_spill] sm:$0xff] %v13342_v17  ;;  %v7793_v16 = vrot.slane %v7791_v18, 3 }
 0x36f   : > { %10656 = vmatmul.mubr.msk.bf16.vlgmr.msra.gmra.mxu0 %vm307_vm0, %v7789_v50  ;;  %v7796_v50 = vrot.slane %v7794_v9, 4  ;;  %v13357_v1 = vpop.f32.mrf.mxu0  ;;  %v11097_v9 = vld [vmem:[%s13923_s2 + $0x110] sm:$0xff]  }
 0x370   : > { %v13321_v5 = vpop.f32.mrf.mxu1  ;;  %10688 = vmatpush3.bf16.msra.mxu0 %v11091_v0  ;;  %v7802_v29 = vrot.slane %v7800_v46, 3  ;;  %v7805_v22 = vrot.slane %v7803_v20, 4  ;;  %14176 = vst [vmem:[#allocation2_spill] sm:$0xff] %v13357_v1  ;;  %v9436_v46 = vcombine.low %v13345_v32, %v13348_v34  ;;  %v9437_v20 = vcombine.low %v13353_v8, %v13353_v8 }
 0x371   : > { %v7797_v36 = vor.u32 %v7796_v50, %v7793_v16  ;;  %10689 = vmatprep.subr.bf16.mxu0 %v11097_v9 }
 0x372   : > { %v13325_v26 = vpop.f32.mrf.mxu1  ;;  %v7806_v31 = vor.u32 %v7805_v22, %v7802_v29  ;;  %v11101_v22 = vld [vmem:[%s13923_s2 + $0x108] sm:$0xff]   ;;  %v7812_v16 = vshll.u32 %v9436_v46, 16  ;;  %v7818_v1 = vshrl.u32 %v9437_v20, 16 }
 0x373   : > { %v7798_v0 = vsel %vm416_vm1, %v7788_v27, %v7797_v36  ;;  %v7809_v27 = vshrl.u32 %v9436_v46, 16 }
 0x374   : > { %v13338_v53 = vpop.f32.mrf.mxu1  ;;  %v7807_v18 = vsel %vm416_vm1, %v7797_v36, %v7806_v31  ;;  %10659 = vmatprep.mubr.msk.bf16.mxu0 %vm307_vm0, %v7798_v0  ;;  %10690 = vmatpush3.bf16.msra.mxu0 %v11097_v9  ;;  %v13377_v36 = vpop.f32.mrf.mxu0  ;;  %v7814_v17 = vrot.slane %v7812_v16, 4  ;;  %v7820_v11 = vrot.slane %v7818_v1, 3  ;;  %v11104_v16 = vld [vmem:[%s13923_s2 + $0x100] sm:$0xff]  }
 0x375   : > { %14179 = vst [vmem:[#allocation5_spill] sm:$0xff] %v13377_v36  ;;  %v7811_v0 = vrot.slane %v7809_v27, 3  ;;  %10691 = vmatprep.subr.bf16.mxu0 %v11101_v22 }
 0x376   : > { %v13340_v6 = vpop.f32.mrf.mxu1  ;;  %v13386_v9 = vpop.f32.mrf.mxu0 }
 0x377   : > { %14172 = vst [vmem:[#allocation29_spill] sm:$0xff] %v13340_v6  ;;  %10660 = vmatmul.mubr.msk.bf16.gmra.mxu0 %vm307_vm0, %v7807_v18  ;;  %v7815_v3 = vor.u32 %v7814_v17, %v7811_v0  ;;  %14181 = vst [vmem:[#allocation11_spill] sm:$0xff] %v13386_v9  ;;  %v8180_v9 = vshll.u32 %v11108_v2, 16 }
 0x378   : > { %v13350_v19 = vpop.f32.mrf.mxu1  ;;  %10692 = vmatpush3.bf16.msra.mxu0 %v11101_v22 }
 0x379   : > { %14174 = vst [vmem:[#allocation43_spill] sm:$0xff] %v13350_v19  ;;  %v11107_v19 = vld [vmem:[%s11195_s8 + $0xb4] sm:$0xff]   ;;  %v7816_v36 = vsel %vm416_vm1, %v7806_v31, %v7815_v3  ;;  %10693 = vmatprep.subr.bf16.mxu0 %v11104_v16 }
 0x37a   : > { %v13355_v38 = vpop.f32.mrf.mxu1  ;;  %10663 = vmatprep.mubr.msk.bf16.mxu0 %vm307_vm0, %v7816_v36  ;;  %v8172_v22 = vshll.u32 %v11107_v19, 16  ;;  %v8176_v0 = vshrl.u32 %v11107_v19, 16 }
 0x37b   : > { %14175 = vst [vmem:[#allocation45_spill] sm:$0xff] %v13355_v38  ;;  %v7821_v38 = vshll.u32 %v9437_v20, 16 }
 0x37c   : > { %v13370_v29 = vpop.f32.mrf.mxu1  ;;  %10694 = vmatpush3.bf16.msra.mxu0 %v11104_v16  ;;  %v8174_v36 = vrot.slane %v8172_v22, 1  ;;  %v8184_v16 = vshrl.u32 %v11108_v2, 16 }
 0x37d   : > { %14177 = vst [vmem:[#allocation15_spill] sm:$0xff] %v13370_v29  ;;  %v11106_v29 = vld [vmem:[%s11195_s8 + $0xac] sm:$0xff]   ;;  %v7823_v46 = vrot.slane %v7821_v38, 4 }
 0x37e   : > { %v13375_v50 = vpop.f32.mrf.mxu1  ;;  %v8165_v20 = vshrl.u32 %v11106_v29, 16  ;;  %v8167_v17 = vshll.u32 %v11106_v29, 16  ;;  %v8182_v29 = vrot.slane %v8180_v9, 1  ;;  %v8178_v19 = vor.u32 %v8176_v0, %v8174_v36 }
 0x37f   : > { %14178 = vst [vmem:[#allocation27_spill] sm:$0xff] %v13375_v50  ;;  %v7824_v27 = vor.u32 %v7823_v46, %v7820_v11  ;;  %v13399_v46 = vpop.f32.mrf.mxu0  ;;  %v4722_v0 = vadd.f32 %v13177_v49, %v12924_v42 }
 0x380   : > { %v13380_v18 = vpop.f32.mrf.mxu1  ;;  %v8169_v31 = vrot.slane %v8167_v17, 1  ;;  %v8183_v9 = vsel %vm657_vm2, %v8178_v19, %v8182_v29 }
 0x381   : > { %14180 = vst [vmem:[#allocation8_spill] sm:$0xff] %v13380_v18  ;;  %v7825_v38 = vsel %vm416_vm1, %v7815_v3, %v7824_v27  ;;  %v11110_v3 = vld [vmem:[%s11195_s8 + $0xc4] sm:$0xff]   ;;  %v13410_v12 = vpop.f32.mrf.mxu0  ;;  %v8186_v18 = vor.u32 %v8184_v16, %v8182_v29  ;;  %v4717_v29 = vadd.f32 %v13204_v60, %v12942_v21  ;;  %v4991_v19 = vadd.f32 %v12987_v15, %v4722_v0  ;;  %v11114_v16 = vld [vmem:[%s11195_s8 + $0xd4] sm:$0xff]  }
 0x382   : > { %v13384_v7 = vpop.f32.mrf.mxu1  ;;  %10664 = vmatmul.mubr.msk.bf16.gmra.mxu0 %vm307_vm0, %v7825_v38  ;;  %v8170_v50 = vor.u32 %v8169_v31, %v8165_v20  ;;  %v8188_v6 = vshll.u32 %v11110_v3, 16  ;;  %v11111_v38 = vld [vmem:[%s11195_s8 + $0xcc] sm:$0xff]   ;;  %v8192_v22 = vshrl.u32 %v11110_v3, 16  ;;  %v9458_v20 = vcombine.low %v13279_v54, %v13310_v33 }
 0x383   : > { %v8196_v31 = vshll.u32 %v11111_v38, 16  ;;  %v13427_v3 = vpop.f32.mrf.mxu0  ;;  %v8200_v15 = vshrl.u32 %v11111_v38, 16  ;;  %v8208_v60 = vshrl.u32 %v11114_v16, 16  ;;  %v9460_v0 = vcombine.low %v13319_v30, %v13345_v32 }
 0x384   : > { %v13393_v1 = vpop.f32.mrf.mxu1  ;;  %v8175_v52 = vsel %vm657_vm2, %v8170_v50, %v8174_v36  ;;  %v8190_v50 = vrot.slane %v8188_v6, 1  ;;  %v4741_v38 = vadd.f32 %v13225_v40, %v12963_v55 }
 0x385   : > { %10695 = vmatprep.mubr.msk.bf16.mxu0 %vm307_vm0, %v8175_v52  ;;  %v4725_v52 = vadd.f32 %v13197_v43, %v12935_v41  ;;  %v8198_v6 = vrot.slane %v8196_v31, 1  ;;  %v5242_v43 = vadd.f32 %v13288_v4, %v4991_v19  ;;  %v13444_v31 = vpop.f32.mrf.mxu0 }
 0x386   : > { %v13397_v11 = vpop.f32.mrf.mxu1  ;;  %v8191_v42 = vsel %vm657_vm2, %v8186_v18, %v8190_v50  ;;  %v8194_v49 = vor.u32 %v8192_v22, %v8190_v50  ;;  %v8204_v18 = vshll.u32 %v11114_v16, 16  ;;  %v11115_v22 = vld [vmem:[%s11195_s8 + $0xdc] ss:$0 sps:$4 sm:$0x11]   ;;  %v4733_v16 = vadd.f32 %v13233_v24, %v12969_v48 }
 0x387   : > { %v4992_v62 = vadd.f32 %v12991_v10, %v4725_v52  ;;  %v4738_v10 = vadd.f32 %v13209_v14, %v12948_v61  ;;  %v8202_v19 = vor.u32 %v8200_v15, %v8198_v6  ;;  %v5391_v61 = vadd.f32 %v13027_v56, %v5242_v43 }
 0x388   : > { %v13404_v27 = vpop.f32.mrf.mxu1  ;;  %v8199_v21 = vsel %vm657_vm2, %v8194_v49, %v8198_v6  ;;  %v9461_v49 = vcombine.low %v13348_v34, %v13353_v8  ;;  %v5244_v56 = vadd.f32 %v13338_v53, %v13231_v28  ;;  %v14184_v53 = vld [vmem:[#allocation9_spill] sm:$0xff] }
 0x389   : > { %v5243_v4 = vadd.f32 %v13305_v57, %v4992_v62  ;;  %v13467_v57 = vpop.f32.mrf.mxu0  ;;  %v5632_v40 = vadd.f32 %v13384_v7, %v5391_v61  ;;  %v14192_v61 = vld [vmem:[#allocation51_spill] sm:$0xff] }
 0x38a   : > { %v13408_v17 = vpop.f32.mrf.mxu1  ;;  %10696 = vmatmul.mubr.msk.bf16.vlgmr.msra.gmra.mxu0 %vm307_vm0, %v8183_v9  ;;  %v5240_v9 = vadd.f32 %v13301_v13, %v13202_v58  ;;  %v8206_v58 = vrot.slane %v8204_v18, 1  ;;  %v8212_v13 = vshll.u32 %v11115_v22, 16  ;;  %v14182_v22 = vld [vmem:[#allocation41_spill] sm:$0xff] }
 0x38b   : > { %10699 = vmatprep.mubr.msk.bf16.mxu0 %vm307_vm0, %v8191_v42  ;;  %v4990_v42 = vadd.f32 %v12993_v45, %v4717_v29  ;;  %v5392_v48 = vadd.f32 %v13039_v59, %v5243_v4  ;;  %v4754_v59 = vadd.f32 %v13238_v63, %v12975_v44  ;;  %v13486_v7 = vpop.f32.mrf.mxu0  ;;  %v14185_v4 = vld [vmem:[#allocation31_spill] sm:$0xff]  ;;  %v14188_v63 = vld [vmem:[#allocation48_spill] sm:$0xff] }
 0x38c   : > { %v13418_v36 = vpop.f32.mrf.mxu1  ;;  %v5389_v45 = vadd.f32 %v13031_v25, %v5240_v9  ;;  %v8207_v6 = vsel %vm657_vm2, %v8202_v19, %v8206_v58  ;;  %v8210_v29 = vor.u32 %v8208_v60, %v8206_v58  ;;  %v8214_v18 = vrot.slane %v8212_v13, 1  ;;  %v14183_v60 = vld [vmem:[#allocation29_spill] sm:$0xff]  ;;  %v14187_v58 = vld [vmem:[#allocation43_spill] sm:$0xff] }
 0x38d   : > { %v5241_v62 = vadd.f32 %v13321_v5, %v4990_v42  ;;  %v4995_v25 = vadd.f32 %v12995_v23, %v4738_v10  ;;  %v4996_v5 = vadd.f32 %v12999_v39, %v4741_v38  ;;  %v5633_v43 = vadd.f32 %v13397_v11, %v5392_v48  ;;  %v14189_v10 = vld [vmem:[#allocation32_spill] sm:$0xff] }
 0x38e   : > { %v13425_v2 = vpop.f32.mrf.mxu1  ;;  %v5630_v55 = vadd.f32 %v13393_v1, %v5389_v45  ;;  %v4994_v23 = vadd.f32 %v14182_v22, %v4733_v16  ;;  %v8215_v15 = vsel %vm657_vm2, %v8210_v29, %v8214_v18  ;;  %v5393_v19 = vadd.f32 %v14189_v10, %v5244_v56  ;;  %v14190_v16 = vld [vmem:[#allocation25_spill] sm:$0xff]  ;;  %v14191_v45 = vld [vmem:[#allocation19_spill] sm:$0xff] }
 0x38f   : > { %v5390_v9 = vadd.f32 %v13049_v47, %v5241_v62  ;;  %v5246_v1 = vadd.f32 %v13325_v26, %v4995_v25  ;;  %v5247_v28 = vadd.f32 %v14183_v60, %v4996_v5  ;;  %v14186_v47 = vld [vmem:[#allocation26_spill] sm:$0xff]  ;;  %v5883_v26 = vadd.f32 %v14188_v63, %v5632_v40  ;;  %v14194_v18 = vld [vmem:[#allocation39_spill] sm:$0xff]  ;;  %v10506_v5 = vpop.f32.mrf.mxu0 }
 0x390   : > { %v13435_v41 = vpop.f32.mrf.mxu1  ;;  %v5881_v11 = vadd.f32 %v14184_v53, %v5630_v55  ;;  %v4757_v42 = vadd.f32 %v14186_v47, %v14185_v4  ;;  %v5245_v44 = vadd.f32 %v14187_v58, %v4994_v23  ;;  %v5884_v62 = vadd.f32 %v14190_v16, %v5633_v43  ;;  %v14196_v23 = vld [vmem:[#allocation4_spill] sm:$0xff]  ;;  %v14198_v53 = vld [vmem:[#allocation15_spill] sm:$0xff] }
 0x391   : > { %v5631_v39 = vadd.f32 %v13404_v27, %v5390_v9  ;;  %v4749_v27 = vadd.f32 %v14192_v61, %v14191_v45  ;;  %v5395_v55 = vadd.f32 %v14194_v18, %v5246_v1  ;;  %v5634_v40 = vadd.f32 %v13418_v36, %v5393_v19  ;;  %v14195_v9 = vld [vmem:[#allocation42_spill] sm:$0xff]  ;;  %v14197_v43 = vld [vmem:[#allocation20_spill] sm:$0xff] }
 0x392   : > { %v13442_v50 = vpop.f32.mrf.mxu1  ;;  %10700 = vmatmul.mubr.msk.bf16.gmra.mxu0 %vm307_vm0, %v8199_v21  ;;  %v5396_v22 = vadd.f32 %v14195_v9, %v5247_v28  ;;  %v14203_v19 = vld [vmem:[#allocation22_spill] sm:$0xff] }
 0x393   : > { %10703 = vmatprep.mubr.msk.bf16.mxu0 %vm307_vm0, %v8207_v6  ;;  %v14193_v6 = vld [vmem:[#allocation6_spill] sm:$0xff]  ;;  %v5882_v60 = vadd.f32 %v14196_v23, %v5631_v39  ;;  %v5636_v47 = vadd.f32 %v13408_v17, %v5395_v55  ;;  %v14202_v39 = vld [vmem:[#allocation27_spill] sm:$0xff]  ;;  %v4998_v16 = vadd.f32 %v14203_v19, %v4749_v27  ;;  %v6243_v17 = vpop.f32.mrf.mxu0 }
 0x394   : > { %v13453_v52 = vpop.f32.mrf.mxu1  ;;  %v4999_v29 = vadd.f32 %v14193_v6, %v4754_v59  ;;  %v14200_v59 = vld [vmem:[#allocation14_spill] sm:$0xff] }
 0x395   : > { %v5394_v58 = vadd.f32 %v14200_v59, %v5245_v44  ;;  %v14211_v59 = vld [vmem:[#allocation38_spill] sm:$0xff] }
 0x396   : > { %v13465_v14 = vpop.f32.mrf.mxu1 }
 0x397   : > { %v5635_v44 = vadd.f32 %v13435_v41, %v5394_v58  ;;  %v14210_v41 = vld [vmem:[#allocation47_spill] sm:$0xff] }
 0x398   : > { %v13475_v24 = vpop.f32.mrf.mxu1 }
 0x39a   : > { %v10481_v21 = vpop.f32.mrf.mxu1  ;;  %10704 = vmatmul.mubr.msk.bf16.gmra.mxu0 %vm307_vm0, %v8215_v15  ;;  %v5248_v15 = vadd.f32 %v14198_v53, %v14197_v43  ;;  %v10509_v53 = vpop.f32.mrf.mxu0 }
 0x39b   : > { %v6032_v48 = vadd.f32 %v10481_v21, %v5883_v26  ;;  %v5637_v21 = vadd.f32 %v13425_v2, %v5396_v22  ;;  %v14201_v26 = vld [vmem:[#allocation45_spill] sm:$0xff]  ;;  %v14204_v2 = vld [vmem:[#allocation18_spill] sm:$0xff] }
 0x39c   : > { %v5983_v13 = vpop.f32.mrf.mxu1  ;;  %v5885_v61 = vadd.f32 %v14204_v2, %v5634_v40  ;;  %v6256_v19 = vpop.f32.mrf.mxu0 }
 0x39d   : > { %v6030_v38 = vadd.f32 %v5983_v13, %v5881_v11  ;;  %v14199_v11 = vld [vmem:[#allocation3_spill] sm:$0xff]  ;;  %v5250_v13 = vadd.f32 %v14201_v26, %v4999_v29  ;;  %v14207_v29 = vld [vmem:[#allocation17_spill] sm:$0xff] }
 0x39e   : > { %v10482_v25 = vpop.f32.mrf.mxu1  ;;  %v5000_v4 = vadd.f32 %v14199_v11, %v4757_v42  ;;  %v6273_v42 = vadd.f32 %v13399_v46, %v6032_v48  ;;  %v5887_v55 = vadd.f32 %v14207_v29, %v5636_v47  ;;  %v14208_v46 = vld [vmem:[#allocation36_spill] sm:$0xff]  ;;  %v5886_v47 = vadd.f32 %v14211_v59, %v5635_v44 }
 0x39f   : > { %v6033_v56 = vadd.f32 %v10482_v25, %v5884_v62  ;;  %v6271_v63 = vadd.f32 %v13410_v12, %v6030_v38  ;;  %v14205_v12 = vld [vmem:[#allocation8_spill] sm:$0xff]  ;;  %v5888_v48 = vadd.f32 %v14208_v46, %v5637_v21 }
 0x3a0   : > { %v5986_v1 = vpop.f32.mrf.mxu1  ;;  %v5251_v10 = vadd.f32 %v14202_v39, %v5000_v4  ;;  %v5249_v38 = vadd.f32 %v14205_v12, %v4998_v16  ;;  %v14214_v44 = vld [vmem:[#allocation40_spill] sm:$0xff] }
 0x3a1   : > { %v6274_v36 = vadd.f32 %v13427_v3, %v6033_v56  ;;  %v6031_v28 = vadd.f32 %v5986_v1, %v5882_v60  ;;  %v14206_v3 = vld [vmem:[#allocation35_spill] sm:$0xff]  ;;  %v6283_v9 = vmax.f32 %v6271_v63, 0.0 }
 0x3a2   : > { %v10485_v62 = vpop.f32.mrf.mxu1  ;;  %v5397_v6 = vadd.f32 %v14206_v3, %v5248_v15  ;;  %v14209_v56 = vld [vmem:[#allocation23_spill] sm:$0xff]  ;;  %v5400_v60 = vadd.f32 %v14210_v41, %v5251_v10 }
 0x3a3   : > { %v6272_v45 = vadd.f32 %v13444_v31, %v6031_v28  ;;  %v6286_v18 = vmax.f32 %v6274_v36, 0.0  ;;  %v5399_v23 = vadd.f32 %v14209_v56, %v5250_v13  ;;  %v6285_v31 = vmax.f32 %v6273_v42, 0.0  ;;  %v14212_v1 = vld [vmem:[#allocation7_spill] sm:$0xff]  ;;  %v11036_v28 = vld [vmem:[%s13923_s2 + $0x10] sm:$0xff]  }
 0x3a4   : > { %v5999_v25 = vpop.f32.mrf.mxu1  ;;  %v6036_v43 = vadd.f32 %v10485_v62, %v5887_v55  ;;  %v5638_v11 = vadd.f32 %v13453_v52, %v5397_v6  ;;  %v5398_v63 = vadd.f32 %v14212_v1, %v5249_v38  ;;  %v5641_v26 = vadd.f32 %v13465_v14, %v5400_v60  ;;  %v11124_v62 = vld [vmem:[%s13923_s2 + $0x18] sm:$0xff]   ;;  %v14213_v14 = vld [vmem:[#allocation2_spill] sm:$0xff]  ;;  %v11054_v1 = vld [vmem:[%s13923_s2 + $0x70] sm:$0xff]  }
 0x3a5   : > { %v6284_v27 = vmax.f32 %v6272_v45, 0.0  ;;  %v6034_v22 = vadd.f32 %v5999_v25, %v5885_v61  ;;  %v5640_v58 = vadd.f32 %v13442_v50, %v5399_v23  ;;  %v6296_v36 = vpack.c.bf16 %v6286_v18, %v6285_v31  ;;  %v10510_v18 = vpop.f32.mrf.mxu0 }
 0x3a6   : > { %v10486_v40 = vpop.f32.mrf.mxu1  ;;  %v6277_v10 = vadd.f32 %v13467_v57, %v6036_v43  ;;  %v5639_v16 = vadd.f32 %v13475_v24, %v5398_v63  ;;  %v11043_v57 = vld [vmem:[%s13923_s2 + $0x8] sm:$0xff]   ;;  %v14218_v63 = vld [vmem:[#allocation33_spill] sm:$0xff] }
 0x3a7   : > { %v6295_v15 = vpack.c.bf16 %v6284_v27, %v6283_v9  ;;  %v6037_v4 = vadd.f32 %v10486_v40, %v5888_v48  ;;  %v6275_v13 = vadd.f32 %v13486_v7, %v6034_v22  ;;  %v5889_v7 = vadd.f32 %v14213_v14, %v5638_v11  ;;  %v14216_v9 = vld [vmem:[#allocation11_spill] sm:$0xff]  ;;  %v11046_v48 = vld [vmem:[%s13923_s2] sm:$0xff]   ;;  %v6259_v31 = vpop.f32.mrf.mxu0  ;;  %v11050_v11 = vld [vmem:[%s13923_s2 + $0x78] sm:$0xff]  }
 0x3a8   : > { %v6002_v21 = vpop.f32.mrf.mxu1  ;;  %v5891_v45 = vadd.f32 %v14214_v44, %v5640_v58  ;;  %v6289_v3 = vmax.f32 %v6277_v10, 0.0  ;;  %v5890_v27 = vadd.f32 %v14216_v9, %v5639_v16  ;;  %v14223_v10 = vld [vmem:[#allocation13_spill] sm:$0xff]  ;;  %v14224_v16 = vld [vmem:[#allocation50_spill] sm:$0xff]  ;;  %v11088_v14 = vld [vmem:[%s11195_s8 + $0xa8] sm:$0xff]  }
 0x3a9   : > { %v6278_v39 = vadd.f32 %v10506_v5, %v6037_v4  ;;  %v6035_v52 = vadd.f32 %v6002_v21, %v5886_v47  ;;  %10515 = vmatprep.mubr.msk.bf16.mxu1 %vm2163_vm3, %v6295_v15  ;;  %v6287_v61 = vmax.f32 %v6275_v13, 0.0  ;;  %v11057_v21 = vld [vmem:[%s13923_s2 + $0x68] sm:$0xff]   ;;  %v14221_v13 = vld [vmem:[#allocation16_spill] sm:$0xff]  ;;  %v14228_v9 = vld [vmem:[#allocation34_spill] sm:$0xff] }
 0x3aa   : > { %v10489_v50 = vpop.f32.mrf.mxu1  ;;  %10516 = vmatmul.mubr.msk.bf16.vlgmr.msra.gmra.mxu1 %vm2163_vm3, %v6296_v36  ;;  %v14219_v36 = vld [vmem:[#allocation44_spill] sm:$0xff] }
 0x3ab   : > { %v6276_v42 = vadd.f32 %v6243_v17, %v6035_v52  ;;  %10548 = vmatpush3.bf16.msra.mxu1 %v11124_v62  ;;  %v6290_v5 = vmax.f32 %v6278_v39, 0.0  ;;  %v14215_v17 = vld [vmem:[#allocation5_spill] sm:$0xff]  ;;  %v6040_v6 = vadd.f32 %v10489_v50, %v5891_v45  ;;  %v14222_v52 = vld [vmem:[#allocation30_spill] sm:$0xff]  ;;  %v11079_v62 = vld [vmem:[%s13923_s2 + $0xa8] sm:$0xff]  }
 0x3ac   : > { %v6015_v2 = vpop.f32.mrf.mxu1  ;;  %10549 = vmatprep.subr.bf16.mxu1 %v11036_v28  ;;  %v5892_v38 = vadd.f32 %v14215_v17, %v5641_v26  ;;  %v14220_v26 = vld [vmem:[#allocation10_spill] sm:$0xff]  ;;  %v11067_v39 = vld [vmem:[%s13923_s2 + $0xb8] sm:$0xff]  }
 0x3ad   : > { %v6288_v12 = vmax.f32 %v6276_v42, 0.0  ;;  %v6038_v24 = vadd.f32 %v6015_v2, %v5889_v7  ;;  %v6298_v22 = vpack.c.bf16 %v6290_v5, %v6289_v3  ;;  %v6281_v60 = vadd.f32 %v10509_v53, %v6040_v6  ;;  %v14217_v53 = vld [vmem:[#allocation12_spill] sm:$0xff]  ;;  %v11087_v50 = vld [vmem:[%s11195_s8 + $0xa0] sm:$0xff]   ;;  %v11095_v3 = vld [vmem:[%s11195_s8 + $0xb8] sm:$0xff]  }
 0x3ae   : > { %v10490_v29 = vpop.f32.mrf.mxu1  ;;  %v14225_v42 = vld [vmem:[#allocation28_spill] sm:$0xff]  ;;  %v7526_v7 = vshll.u32 %v11087_v50, 16  ;;  %v11082_v5 = vld [vmem:[%s13923_s2 + $0xa0] sm:$0xff]   ;;  %v7524_v44 = vshrl.u32 %v11087_v50, 16  ;;  %v7531_v2 = vshll.u32 %v11088_v14, 16 }
 0x3af   : > { %v6297_v55 = vpack.c.bf16 %v6288_v12, %v6287_v61  ;;  %v6041_v25 = vadd.f32 %v10490_v29, %v5892_v38  ;;  %10550 = vmatpush3.bf16.msra.mxu1 %v11036_v28  ;;  %v6279_v56 = vadd.f32 %v6256_v19, %v6038_v24  ;;  %v6293_v59 = vmax.f32 %v6281_v60, 0.0  ;;  %v11061_v28 = vld [vmem:[%s13923_s2 + $0x60] sm:$0xff]   ;;  %v11073_v19 = vld [vmem:[%s13923_s2 + $0xb0] sm:$0xff]   ;;  %v14227_v12 = vld [vmem:[#allocation21_spill] sm:$0xff] }
 0x3b0   : > { %v6018_v46 = vpop.f32.mrf.mxu1  ;;  %10551 = vmatprep.subr.bf16.mxu1 %v11043_v57  ;;  %v7528_v45 = vrot.slane %v7526_v7, 1  ;;  %v11089_v61 = vld [vmem:[%s11195_s8 + $0xb0] sm:$0xff]   ;;  %v7533_v17 = vrot.slane %v7531_v2, 1  ;;  %v11090_v38 = vld [vmem:[%s13923_s2 + $0xf8] sm:$0xff]  }
 0x3b1   : > { %v6282_v23 = vadd.f32 %v10510_v18, %v6041_v25  ;;  %v6039_v41 = vadd.f32 %v6018_v46, %v5890_v27  ;;  %10519 = vmatprep.mubr.msk.bf16.mxu1 %vm2163_vm3, %v6297_v55  ;;  %v6291_v15 = vmax.f32 %v6279_v56, 0.0  ;;  %v7539_v6 = vshll.u32 %v11089_v61, 16 }
 0x3b2   : > { %10520 = vmatmul.mubr.msk.bf16.gmra.mxu1 %vm2163_vm3, %v6298_v22  ;;  %v7529_v24 = vor.u32 %v7528_v45, %v7524_v44  ;;  %v7535_v18 = vshrl.u32 %v11088_v14, 16  ;;  %v7543_v55 = vshrl.u32 %v11089_v61, 16  ;;  %v7547_v25 = vshll.u32 %v11095_v3, 16  ;;  %v11096_v22 = vld [vmem:[%s11195_s8 + $0xc0] sm:$0xff]   ;;  %v14232_v44 = vld [vmem:[#allocation49_spill] sm:$0xff] }
 0x3b3   : > { %v6280_v43 = vadd.f32 %v6259_v31, %v6039_v41  ;;  %10552 = vmatpush3.bf16.msra.mxu1 %v11043_v57  ;;  %v6294_v40 = vmax.f32 %v6282_v23, 0.0  ;;  %v14226_v57 = vld [vmem:[#allocation24_spill] sm:$0xff]  ;;  %v7541_v27 = vrot.slane %v7539_v6, 1  ;;  %v11102_v23 = vld [vmem:[%s11195_s8 + $0xc8] sm:$0xff]   ;;  %v7555_v41 = vshll.u32 %v11096_v22, 16 }
 0x3b4   : > { %10553 = vmatprep.subr.bf16.mxu1 %v11046_v48  ;;  %v7534_v29 = vsel %vm657_vm2, %v7529_v24, %v7533_v17  ;;  %v7537_v46 = vor.u32 %v7535_v18, %v7533_v17  ;;  %v7549_v56 = vrot.slane %v7547_v25, 1  ;;  %v7551_v31 = vshrl.u32 %v11095_v3, 16 }
 0x3b5   : > { %v6292_v4 = vmax.f32 %v6280_v43, 0.0  ;;  %v6300_v58 = vpack.c.bf16 %v6294_v40, %v6293_v59  ;;  %v11094_v43 = vld [vmem:[%s13923_s2 + $0xf0] sm:$0xff]   ;;  %v14234_v61 = vcombine.low %v13313_v35, %v13316_v37 }
 0x3b6   : > { %v7542_v60 = vsel %vm657_vm2, %v7537_v46, %v7541_v27  ;;  %v7553_v59 = vor.u32 %v7551_v31, %v7549_v56 }
 0x3b7   : > { %v6299_v47 = vpack.c.bf16 %v6292_v4, %v6291_v15  ;;  %10554 = vmatpush3.bf16.msra.mxu1 %v11046_v48  ;;  %v7545_v48 = vor.u32 %v7543_v55, %v7541_v27  ;;  %v7563_v15 = vshll.u32 %v11102_v23, 16  ;;  %v7557_v4 = vrot.slane %v7555_v41, 1 }
 0x3b8   : > { %10587 = vmatprep.subr.bf16.mxu1 %v11050_v11 }
 0x3b9   : > { %10523 = vmatprep.mubr.msk.bf16.mxu1 %vm2163_vm3, %v6299_v47  ;;  %v7550_v40 = vsel %vm657_vm2, %v7545_v48, %v7549_v56  ;;  %v11103_v47 = vld [vmem:[%s11195_s8 + $0xd0] ss:$0 sps:$4 sm:$0x11]  }
 0x3ba   : > { %10524 = vmatmul.mubr.msk.bf16.gmra.mxu1 %vm2163_vm3, %v6300_v58  ;;  %v11099_v58 = vld [vmem:[%s13923_s2 + $0xe8] sm:$0xff]   ;;  %v6410_v56 = vld [vmem:[%s12359_s6 + $0x90] sm:$0xff] }
 0x3bb   : > { %10555 = vmatprep.mubr.msk.bf16.mxu1 %vm307_vm0, %v14217_v53 }
 0x3c2   : > { %10556 = vmatmul.mubr.msk.bf16.vlgmr.msra.gmra.mxu1 %vm307_vm0, %v14218_v63  ;;  %v13627_v63 = vpop.f32.mrf.mxu0 }
 0x3c3   : > { %10588 = vmatpush3.bf16.msra.mxu1 %v11050_v11  ;;  %10559 = vmatprep.mubr.msk.bf16.mxu1 %vm307_vm0, %v14219_v36  ;;  %v7559_v11 = vshrl.u32 %v11096_v22, 16  ;;  %v7558_v36 = vsel %vm657_vm2, %v7553_v59, %v7557_v4  ;;  %v6396_v22 = vld [vmem:[%s12359_s6 + $0x80] sm:$0xff] }
 0x3c4   : > { %10589 = vmatprep.subr.bf16.mxu1 %v11054_v1 }
 0x3c5   : > { %v7561_v53 = vor.u32 %v7559_v11, %v7557_v4 }
 0x3c7   : > { %10590 = vmatpush3.bf16.msra.mxu1 %v11054_v1  ;;  %v7565_v1 = vrot.slane %v7563_v15, 1  ;;  %v6424_v15 = vld [vmem:[%s12359_s6 + $0xa0] sm:$0xff] }
 0x3c8   : > { %10591 = vmatprep.subr.bf16.mxu1 %v11057_v21 }
 0x3ca   : > { %10560 = vmatmul.mubr.msk.bf16.gmra.mxu1 %vm307_vm0, %v14220_v26  ;;  %v7566_v26 = vsel %vm657_vm2, %v7561_v53, %v7565_v1 }
 0x3cb   : > { %10592 = vmatpush3.bf16.msra.mxu1 %v11057_v21  ;;  %10563 = vmatprep.mubr.msk.bf16.mxu1 %vm307_vm0, %v14221_v13  ;;  %v7567_v21 = vshrl.u32 %v11102_v23, 16  ;;  %v11105_v13 = vld [vmem:[%s13923_s2 + $0xe0] sm:$0xff]  }
 0x3cc   : > { %10593 = vmatprep.subr.bf16.mxu1 %v11061_v28 }
 0x3cf   : > { %10594 = vmatpush3.bf16.msra.mxu1 %v11061_v28  ;;  %v7571_v28 = vshll.u32 %v11103_v47, 16 }
 0x3d0   : > { %10627 = vmatprep.subr.bf16.mxu1 %v11067_v39 }
 0x3d2   : > { %10564 = vmatmul.mubr.msk.bf16.gmra.mxu1 %vm307_vm0, %v14222_v52  ;;  %v7569_v52 = vor.u32 %v7567_v21, %v7565_v1 }
 0x3d3   : > { %10595 = vmatprep.mubr.msk.bf16.mxu1 %vm307_vm0, %v14223_v10  ;;  %v7573_v10 = vrot.slane %v7571_v28, 1  ;;  %v6425_v28 = vld [vmem:[%s12359_s6 + $0xa8] sm:$0xff] }
 0x3d5   : > { %v7574_v50 = vsel %vm657_vm2, %v7569_v52, %v7573_v10 }
 0x3da   : > { %10596 = vmatmul.mubr.msk.bf16.vlgmr.msra.gmra.mxu1 %vm307_vm0, %v14224_v16  ;;  %v11125_v16 = vld [vmem:[%s13924_s3 + $0x8] sm:$0xff]  }
 0x3db   : > { %10628 = vmatpush3.bf16.msra.mxu1 %v11067_v39  ;;  %10599 = vmatprep.mubr.msk.bf16.mxu1 %vm307_vm0, %v14225_v42  ;;  %v13635_v39 = vpop.f32.mrf.mxu0 }
 0x3dc   : > { %10629 = vmatprep.subr.bf16.mxu1 %v11073_v19 }
 0x3df   : > { %10630 = vmatpush3.bf16.msra.mxu1 %v11073_v19  ;;  %v13638_v19 = vpop.f32.mrf.mxu0 }
 0x3e0   : > { %10631 = vmatprep.subr.bf16.mxu1 %v11079_v62 }
 0x3e1   : > { %v13645_v42 = vpop.f32.mrf.mxu0 }
 0x3e2   : > { %10600 = vmatmul.mubr.msk.bf16.gmra.mxu1 %vm307_vm0, %v14226_v57 }
 0x3e3   : > { %10632 = vmatpush3.bf16.msra.mxu1 %v11079_v62  ;;  %10603 = vmatprep.mubr.msk.bf16.mxu1 %vm307_vm0, %v14227_v12  ;;  %v14229_v62 = vld [vmem:[#allocation37_spill] sm:$0xff]  ;;  %v13651_v7 = vpop.f32.mrf.mxu0 }
 0x3e4   : > { %10633 = vmatprep.subr.bf16.mxu1 %v11082_v5  ;;  %v14230_v14 = vcombine.low %v13259_v51, %v14229_v62  ;;  %v11126_v51 = vld [vmem:[%s13924_s3] sm:$0xff]  }
 0x3e5   : > { %v13657_v2 = vpop.f32.mrf.mxu0 }
 0x3e7   : > { %10634 = vmatpush3.bf16.msra.mxu1 %v11082_v5  ;;  %v14231_v5 = vld [vmem:[#allocation46_spill] sm:$0xff]  ;;  %v13666_v57 = vpop.f32.mrf.mxu0 }
 0x3e8   : > { %10667 = vmatprep.subr.bf16.mxu1 %v11090_v38  ;;  %v14233_v45 = vcombine.low %v14231_v5, %v14232_v44 }
 0x3e9   : > { %v13672_v12 = vpop.f32.mrf.mxu0 }
 0x3ea   : > { %10604 = vmatmul.mubr.msk.bf16.gmra.mxu1 %vm307_vm0, %v14228_v9 }
 0x3eb   : > { %10635 = vmatprep.mubr.msk.bf16.mxu1 %vm307_vm0, %v7534_v29  ;;  %v13678_v54 = vpop.f32.mrf.mxu0 }
 0x3ed   : > { %v13684_v33 = vpop.f32.mrf.mxu0 }
 0x3f2   : > { %10636 = vmatmul.mubr.msk.bf16.vlgmr.msra.gmra.mxu1 %vm307_vm0, %v7542_v60  ;;  %v6397_v60 = vld [vmem:[%s12359_s6 + $0x88] sm:$0xff] }
 0x3f3   : > { %10668 = vmatpush3.bf16.msra.mxu1 %v11090_v38  ;;  %10639 = vmatprep.mubr.msk.bf16.mxu1 %vm307_vm0, %v7550_v40 }
 0x3f4   : > { %10669 = vmatprep.subr.bf16.mxu1 %v11094_v43 }
 0x3f7   : > { %10670 = vmatpush3.bf16.msra.mxu1 %v11094_v43 }
 0x3f8   : > { %10671 = vmatprep.subr.bf16.mxu1 %v11099_v58 }
 0x3fa   : > { %10640 = vmatmul.mubr.msk.bf16.gmra.mxu1 %vm307_vm0, %v7558_v36 }
 0x3fb   : > { %10672 = vmatpush3.bf16.msra.mxu1 %v11099_v58  ;;  %10643 = vmatprep.mubr.msk.bf16.mxu1 %vm307_vm0, %v7566_v26  ;;  %v6411_v58 = vld [vmem:[%s12359_s6 + $0x98] sm:$0xff] }
 0x3fc   : > { %10673 = vmatprep.subr.bf16.mxu1 %v11105_v13 }
 0x3ff   : > { %10674 = vmatpush3.bf16.msra.mxu1 %v11105_v13 }
 0x400   : > { %10707 = vmatprep.subr.bf16.mxu1 %v11125_v16 }
 0x402   : > { %10644 = vmatmul.mubr.msk.bf16.gmra.mxu1 %vm307_vm0, %v7574_v50 }
 0x403   : > { %10675 = vmatprep.mubr.msk.bf16.mxu1 %vm307_vm0, %v14230_v14  ;;  %v6439_v14 = vld [vmem:[%s12359_s6 + $0xb8] sm:$0xff] }
 0x40a   : > { %10676 = vmatmul.mubr.msk.bf16.vlgmr.msra.gmra.mxu1 %vm307_vm0, %v14233_v45 }
 0x40b   : > { %10679 = vmatprep.mubr.msk.bf16.mxu1 %vm307_vm0, %v9458_v20  ;;  %10708 = vmatpush3.bf16.msra.mxu1 %v11125_v16  ;;  %v13686_v20 = vpop.f32.mrf.mxu0 }
 0x40c   : > { %10709 = vmatprep.subr.bf16.mxu1 %v11126_v51 }
 0x40d   : > { %v13688_v35 = vpop.f32.mrf.mxu0 }
 0x40f   : > { %10710 = vmatpush3.bf16.msra.mxu1 %v11126_v51  ;;  %v13690_v37 = vpop.f32.mrf.mxu0 }
 0x411   : > { %v13692_v24 = vpop.f32.mrf.mxu0 }
 0x412   : > { %10680 = vmatmul.mubr.msk.bf16.gmra.mxu1 %vm307_vm0, %v14234_v61 }
 0x413   : > { %10683 = vmatprep.mubr.msk.bf16.mxu1 %vm307_vm0, %v9460_v0  ;;  %v13694_v32 = vpop.f32.mrf.mxu0 }
 0x415   : > { %v13696_v30 = vpop.f32.mrf.mxu0 }
 0x417   : > { %v13698_v0 = vpop.f32.mrf.mxu0 }
 0x419   : > { %v13700_v8 = vpop.f32.mrf.mxu0 }
 0x41a   : > { %10684 = vmatmul.mubr.msk.bf16.gmra.mxu1 %vm307_vm0, %v9461_v49 }
 0x41b   : > { %v13702_v34 = vpop.f32.mrf.mxu0 }
 0x41d   : > { %v13704_v49 = vpop.f32.mrf.mxu0 }
 0x41f   : > { %v13706_v17 = vpop.f32.mrf.mxu0 }
 0x421   : > { %v13708_v38 = vpop.f32.mrf.mxu0 }
 0x423   : > { %v13710_v3 = vpop.f32.mrf.mxu0 }
 0x424   : > { %14235 = vst [vmem:[#allocation41_spill] sm:$0xff] %v13710_v3 }
 0x425   : > { %v13712_v6 = vpop.f32.mrf.mxu0 }
 0x426   : > { %14236 = vst [vmem:[#allocation29_spill] sm:$0xff] %v13712_v6 }
 0x427   : > { %v13714_v18 = vpop.f32.mrf.mxu0 }
 0x429   : > { %v13716_v29 = vpop.f32.mrf.mxu0 }
 0x42b   : > { %v13718_v55 = vpop.f32.mrf.mxu0 }
 0x42d   : > { %v13720_v25 = vpop.f32.mrf.mxu0 }
 0x42f   : > { %v13722_v9 = vpop.f32.mrf.mxu0 }
 0x431   : > { %v13725_v46 = vpop.f32.mrf.mxu0 }
 0x433   : > { %v13729_v31 = vpop.f32.mrf.mxu0 }
 0x435   : > { %v13735_v53 = vpop.f32.mrf.mxu0 }
 0x436   : > { %14237 = vst [vmem:[#allocation9_spill] sm:$0xff] %v13735_v53 }
 0x437   : > { %v13742_v10 = vpop.f32.mrf.mxu0 }
 0x438   : > { %14238 = vst [vmem:[#allocation31_spill] sm:$0xff] %v13742_v10 }
 0x439   : > { %v13749_v45 = vpop.f32.mrf.mxu0 }
 0x43a   : > { %14239 = vst [vmem:[#allocation26_spill] sm:$0xff] %v13749_v45 }
 0x46a   : > { %v10517_v27 = vpop.f32.mrf.mxu1 }
 0x46c   : > { %v6353_v48 = vpop.f32.mrf.mxu1 }
 0x46d   : > { %v6398_v23 = vadd.f32 %v6396_v22, %v6353_v48  ;;  %v6438_v48 = vld [vmem:[%s12359_s6 + $0xb0] sm:$0xff] }
 0x46e   : > { %v10518_v41 = vpop.f32.mrf.mxu1 }
 0x46f   : > { %v9531_v43 = vpack.c.bf16 %v6398_v23, %v6398_v23  ;;  %v6412_v40 = vadd.f32 %v10518_v41, %v6410_v56  ;;  %v13754_v56 = vpop.f32.mrf.mxu0 }
 0x470   : > { %v6356_v11 = vpop.f32.mrf.mxu1  ;;  %14240 = vst [vmem:[#allocation43_spill] sm:$0xff] %v13754_v56 }
 0x471   : > { %6408 = vst.msk [vmem:[%s12389_s12 + $0x40] sm:$0xf] %vm2271_vm4, %v9531_v43  ;;  %v9533_v4 = vpack.c.bf16 %v6412_v40, %v6412_v40  ;;  %v6399_v59 = vadd.f32 %v6397_v60, %v6356_v11  ;;  %v13758_v43 = vpop.f32.mrf.mxu0 }
 0x472   : > { %v10521_v47 = vpop.f32.mrf.mxu1  ;;  %14241 = vst [vmem:[#allocation48_spill] sm:$0xff] %v13758_v43 }
 0x473   : > { %6422 = vst.msk [vmem:[%s12389_s12 + $0x48] sm:$0xf] %vm2271_vm4, %v9533_v4  ;;  %v9532_v1 = vpack.c.bf16 %v6399_v59, %v6399_v59  ;;  %v6426_v36 = vadd.f32 %v10521_v47, %v6424_v15  ;;  %v13763_v59 = vpop.f32.mrf.mxu0 }
 0x474   : > { %v6368_v21 = vpop.f32.mrf.mxu1 }
 0x475   : > { %6409 = vst.msk [vmem:[%s12389_s12 + $0x44] sm:$0xf] %vm2271_vm4, %v9532_v1  ;;  %v9535_v26 = vpack.c.bf16 %v6426_v36, %v6426_v36  ;;  %v6413_v13 = vadd.f32 %v6411_v58, %v6368_v21  ;;  %v13766_v36 = vpop.f32.mrf.mxu0 }
 0x476   : > { %v10522_v52 = vpop.f32.mrf.mxu1 }
 0x477   : > { %6436 = vst.msk [vmem:[%s12389_s12 + $0x50] sm:$0xf] %vm2271_vm4, %v9535_v26  ;;  %v9534_v50 = vpack.c.bf16 %v6413_v13, %v6413_v13  ;;  %v6427_v16 = vadd.f32 %v10522_v52, %v6425_v28  ;;  %v13769_v13 = vpop.f32.mrf.mxu0 }
 0x478   : > { %v6371_v62 = vpop.f32.mrf.mxu1 }
 0x479   : > { %6423 = vst.msk [vmem:[%s12389_s12 + $0x4c] sm:$0xf] %vm2271_vm4, %v9534_v50  ;;  %v9536_v5 = vpack.c.bf16 %v6427_v16, %v6427_v16  ;;  %v13776_v16 = vpop.f32.mrf.mxu0 }
 0x47a   : > { %v10525_v44 = vpop.f32.mrf.mxu1  ;;  %14242 = vst [vmem:[#allocation32_spill] sm:$0xff] %v13776_v16 }
 0x47b   : > { %6437 = vst.msk [vmem:[%s12389_s12 + $0x54] sm:$0xf] %vm2271_vm4, %v9536_v5  ;;  %v6441_v51 = vadd.f32 %v10525_v44, %v6439_v14  ;;  %v13781_v5 = vpop.f32.mrf.mxu0 }
 0x47c   : > { %v6383_v61 = vpop.f32.mrf.mxu1  ;;  %14243 = vst [vmem:[#allocation25_spill] sm:$0xff] %v13781_v5 }
 0x47d   : > { %v9538_v27 = vpack.c.bf16 %v6441_v51, %v6441_v51 }
 0x47e   : > { %v10526_v22 = vpop.f32.mrf.mxu1 }
 0x47f   : > { %6451 = vst.msk [vmem:[%s12389_s12 + $0x5c] sm:$0xf] %vm2271_vm4, %v9538_v27 }
 0x480   : > { %v6385_v23 = vpop.f32.mrf.mxu1 }
 0x481   : > { %v6440_v41 = vadd.f32 %v6438_v48, %v6385_v23 }
 0x482   : > { %v10557_v60 = vpop.f32.mrf.mxu1 }
 0x483   : > { %v9537_v40 = vpack.c.bf16 %v6440_v41, %v6440_v41 }
 0x484   : > { %v6781_v11 = vpop.f32.mrf.mxu1 }
 0x485   : > { %6450 = vst.msk [vmem:[%s12389_s12 + $0x58] sm:$0xf] %vm2271_vm4, %v9537_v40  ;;  %v6782_v15 = vadd.f32 %v6781_v11, %v13635_v39 }
 0x486   : > { %v10558_v4 = vpop.f32.mrf.mxu1 }
 0x487   : > { %v7057_v47 = vadd.f32 %v13692_v24, %v6782_v15 }
 0x488   : > { %v6784_v58 = vpop.f32.mrf.mxu1 }
 0x48a   : > { %v10561_v1 = vpop.f32.mrf.mxu1 }
 0x48c   : > { %v6797_v21 = vpop.f32.mrf.mxu1 }
 0x48d   : > { %v6798_v28 = vadd.f32 %v6797_v21, %v13657_v2 }
 0x48e   : > { %v10562_v26 = vpop.f32.mrf.mxu1 }
 0x48f   : > { %v13772_v52 = vadd.f32 %v13700_v8, %v6798_v28  ;;  %v13788_v8 = vpop.f32.mrf.mxu0 }
 0x490   : > { %v6800_v50 = vpop.f32.mrf.mxu1  ;;  %14245 = vst [vmem:[#allocation51_spill] sm:$0xff] %v13788_v8 }
 0x491   : > { %v13790_v22 = vpop.f32.mrf.mxu0 }
 0x492   : > { %v13774_v39 = vpop.f32.mrf.mxu1  ;;  %14246 = vst [vmem:[#allocation6_spill] sm:$0xff] %v13790_v22 }
 0x493   : > { %v13792_v41 = vpop.f32.mrf.mxu0 }
 0x494   : > { %v6813_v62 = vpop.f32.mrf.mxu1  ;;  %14247 = vst [vmem:[#allocation39_spill] sm:$0xff] %v13792_v41 }
 0x495   : > { %v6814_v24 = vadd.f32 %v6813_v62, %v13684_v33  ;;  %v13794_v11 = vpop.f32.mrf.mxu0 }
 0x496   : > { %v13779_v14 = vpop.f32.mrf.mxu1  ;;  %14248 = vst [vmem:[#allocation42_spill] sm:$0xff] %v13794_v11 }
 0x497   : > { %v13784_v2 = vadd.f32 %v13708_v38, %v6814_v24  ;;  %v13798_v21 = vpop.f32.mrf.mxu0 }
 0x498   : > { %v13786_v44 = vpop.f32.mrf.mxu1  ;;  %14250 = vst [vmem:[#allocation20_spill] sm:$0xff] %v13798_v21  ;;  %v6790_v21 = vadd.f32 %v10557_v60, %v13627_v63 }
 0x499   : > { %14244 = vst [vmem:[#allocation19_spill] sm:$0xff] %v13784_v2  ;;  %v13804_v24 = vpop.f32.mrf.mxu0 }
 0x49a   : > { %v10597_v51 = vpop.f32.mrf.mxu1  ;;  %14253 = vst [vmem:[#allocation14_spill] sm:$0xff] %v13804_v24  ;;  %v7059_v53 = vadd.f32 %v13690_v37, %v6790_v21 }
 0x49b   : > { %v13808_v10 = vpop.f32.mrf.mxu0 }
 0x49c   : > { %v7261_v61 = vpop.f32.mrf.mxu1  ;;  %14255 = vst [vmem:[#allocation27_spill] sm:$0xff] %v13808_v10 }
 0x49d   : > { %v13810_v5 = vpop.f32.mrf.mxu0  ;;  %v7308_v3 = vadd.f32 %v7261_v61, %v7057_v47  ;;  %v6801_v47 = vadd.f32 %v6800_v50, %v13672_v12 }
 0x49e   : > { %v10598_v27 = vpop.f32.mrf.mxu1  ;;  %14256 = vst [vmem:[#allocation22_spill] sm:$0xff] %v13810_v5 }
 0x49f   : > { %v13812_v8 = vpop.f32.mrf.mxu0  ;;  %v7457_v37 = vadd.f32 %v13716_v29, %v7308_v3  ;;  %v7062_v50 = vadd.f32 %v13704_v49, %v6801_v47  ;;  %v6817_v49 = vadd.f32 %v13786_v44, %v13688_v35  ;;  %v14262_v35 = vld [vmem:[#allocation9_spill] sm:$0xff] }
 0x4a0   : > { %v7264_v48 = vpop.f32.mrf.mxu1  ;;  %14257 = vst [vmem:[#allocation18_spill] sm:$0xff] %v13812_v8  ;;  %v14266_v47 = vld [vmem:[#allocation29_spill] sm:$0xff] }
 0x4a1   : > { %v10698_v24 = vpop.f32.mrf.mxu0 }
 0x4a2   : > { %v10601_v23 = vpop.f32.mrf.mxu1 }
 0x4a3   : > { %v8295_v8 = vpop.f32.mrf.mxu0 }
 0x4a4   : > { %v7277_v33 = vpop.f32.mrf.mxu1 }
 0x4a6   : > { %v10602_v40 = vpop.f32.mrf.mxu1 }
 0x4a8   : > { %v7280_v15 = vpop.f32.mrf.mxu1 }
 0x4aa   : > { %v13796_v38 = vpop.f32.mrf.mxu1 }
 0x4ab   : > { %14249 = vst [vmem:[#allocation4_spill] sm:$0xff] %v13796_v38 }
 0x4ac   : > { %v13800_v28 = vpop.f32.mrf.mxu1 }
 0x4ad   : > { %14251 = vst [vmem:[#allocation15_spill] sm:$0xff] %v13800_v28  ;;  %v7310_v28 = vadd.f32 %v10597_v51, %v7059_v53 }
 0x4ae   : > { %v13802_v62 = vpop.f32.mrf.mxu1 }
 0x4af   : > { %14252 = vst [vmem:[#allocation3_spill] sm:$0xff] %v13802_v62  ;;  %v6793_v62 = vadd.f32 %v10558_v4, %v13638_v19  ;;  %v6806_v19 = vadd.f32 %v10561_v1, %v13651_v7 }
 0x4b0   : > { %v13806_v43 = vpop.f32.mrf.mxu1 }
 0x4b1   : > { %14254 = vst [vmem:[#allocation45_spill] sm:$0xff] %v13806_v43  ;;  %v6785_v43 = vadd.f32 %v6784_v58, %v13645_v42  ;;  %v7060_v5 = vadd.f32 %v13694_v32, %v6793_v62  ;;  %v6809_v42 = vadd.f32 %v10562_v26, %v13666_v57  ;;  %v7459_v32 = vadd.f32 %v13714_v18, %v7310_v28  ;;  %v13833_v58 = vpop.f32.mrf.mxu0 }
 0x4b2   : > { %v10637_v56 = vpop.f32.mrf.mxu1  ;;  %v7063_v7 = vadd.f32 %v13698_v0, %v6806_v19  ;;  %v7312_v57 = vadd.f32 %v7277_v33, %v13772_v52  ;;  %v6822_v18 = vadd.f32 %v13774_v39, %v13678_v54  ;;  %v6825_v52 = vadd.f32 %v13779_v14, %v13686_v20  ;;  %v14258_v33 = vld [vmem:[#allocation32_spill] sm:$0xff] }
 0x4b3   : > { %v7311_v16 = vadd.f32 %v10598_v27, %v7060_v5  ;;  %v7058_v63 = vadd.f32 %v13696_v30, %v6785_v43  ;;  %v7700_v43 = vadd.f32 %v10637_v56, %v7459_v32  ;;  %v7064_v3 = vadd.f32 %v13702_v34, %v6809_v42 }
 0x4b4   : > { %v7651_v41 = vpop.f32.mrf.mxu1  ;;  %v7314_v26 = vadd.f32 %v10601_v23, %v7063_v7  ;;  %v7313_v34 = vadd.f32 %v7280_v15, %v7062_v50  ;;  %v7461_v27 = vadd.f32 %v13725_v46, %v7312_v57  ;;  %v14259_v46 = vld [vmem:[#allocation19_spill] sm:$0xff]  ;;  %v7066_v32 = vadd.f32 %v14266_v47, %v6817_v49  ;;  %v14271_v50 = vld [vmem:[#allocation25_spill] sm:$0xff] }
 0x4b5   : > { %v7309_v4 = vadd.f32 %v7264_v48, %v7058_v63  ;;  %v7698_v5 = vadd.f32 %v7651_v41, %v7457_v37  ;;  %v7460_v30 = vadd.f32 %v13718_v55, %v7311_v16  ;;  %v13845_v55 = vpop.f32.mrf.mxu0  ;;  %v7315_v0 = vadd.f32 %v10602_v40, %v7064_v3  ;;  %v14268_v3 = vld [vmem:[#allocation51_spill] sm:$0xff] }
 0x4b6   : > { %v10638_v22 = vpop.f32.mrf.mxu1  ;;  %v7951_v61 = vadd.f32 %v13763_v59, %v7700_v43  ;;  %v7463_v48 = vadd.f32 %v13722_v9, %v7314_v26  ;;  %v7462_v44 = vadd.f32 %v14262_v35, %v7313_v34  ;;  %v14263_v9 = vld [vmem:[#allocation18_spill] sm:$0xff] }
 0x4b7   : > { %v7701_v29 = vadd.f32 %v10638_v22, %v7460_v30  ;;  %v7458_v12 = vadd.f32 %v13720_v25, %v7309_v4  ;;  %v7949_v16 = vadd.f32 %v13766_v36, %v7698_v5  ;;  %v7067_v22 = vadd.f32 %v13706_v17, %v6822_v18  ;;  %v10702_v41 = vpop.f32.mrf.mxu0  ;;  %v14267_v5 = vld [vmem:[#allocation22_spill] sm:$0xff] }
 0x4b8   : > { %v7654_v11 = vpop.f32.mrf.mxu1  ;;  %v7464_v14 = vadd.f32 %v13729_v31, %v7315_v0  ;;  %v14265_v31 = vld [vmem:[#allocation3_spill] sm:$0xff]  ;;  %v14270_v18 = vld [vmem:[#allocation26_spill] sm:$0xff] }
 0x4b9   : > { %v7699_v56 = vadd.f32 %v7654_v11, %v7458_v12  ;;  %v7952_v39 = vadd.f32 %v13769_v13, %v7701_v29  ;;  %v14260_v11 = vld [vmem:[#allocation15_spill] sm:$0xff]  ;;  %v14261_v13 = vld [vmem:[#allocation41_spill] sm:$0xff]  ;;  %v8311_v43 = vpop.f32.mrf.mxu0  ;;  %v14272_v34 = vld [vmem:[#allocation6_spill] sm:$0xff] }
 0x4ba   : > { %v10641_v45 = vpop.f32.mrf.mxu1  ;;  %v7316_v15 = vadd.f32 %v14260_v11, %v14259_v46  ;;  %v7068_v21 = vadd.f32 %v14261_v13, %v6825_v52 }
 0x4bb   : > { %v7950_v40 = vadd.f32 %v14258_v33, %v7699_v56  ;;  %v7704_v28 = vadd.f32 %v10641_v45, %v7463_v48  ;;  %v14276_v33 = vld [vmem:[#allocation48_spill] sm:$0xff] }
 0x4bc   : > { %v7667_v6 = vpop.f32.mrf.mxu1  ;;  %v7319_v37 = vadd.f32 %v14265_v31, %v7068_v21 }
 0x4bd   : > { %v7702_v20 = vadd.f32 %v7667_v6, %v7461_v27  ;;  %v14264_v6 = vld [vmem:[#allocation4_spill] sm:$0xff] }
 0x4be   : > { %v10642_v38 = vpop.f32.mrf.mxu1  ;;  %v7318_v4 = vadd.f32 %v14264_v6, %v7067_v22  ;;  %v10705_v22 = vpop.f32.mrf.mxu0 }
 0x4bf   : > { %v7705_v62 = vadd.f32 %v10642_v38, %v7464_v14  ;;  %v7953_v29 = vadd.f32 %v14268_v3, %v7702_v20  ;;  %v14269_v38 = vld [vmem:[#allocation45_spill] sm:$0xff]  ;;  %v14275_v20 = vld [vmem:[#allocation39_spill] sm:$0xff] }
 0x4c0   : > { %v13818_v10 = vpop.f32.mrf.mxu1  ;;  %v7317_v12 = vadd.f32 %v14269_v38, %v7066_v32  ;;  %v8324_v35 = vpop.f32.mrf.mxu0 }
 0x4c1   : > { %v7703_v45 = vadd.f32 %v13818_v10, %v7462_v44 }
 0x4c2   : > { %v13821_v2 = vpop.f32.mrf.mxu1  ;;  %v10706_v47 = vpop.f32.mrf.mxu0 }
 0x4c3   : > { %v7954_v14 = vadd.f32 %v14275_v20, %v7703_v45 }
 0x4c4   : > { %v13825_v60 = vpop.f32.mrf.mxu1 }
 0x4c6   : > { %v13831_v53 = vpop.f32.mrf.mxu1 }
 0x4c8   : > { %v13837_v1 = vpop.f32.mrf.mxu1 }
 0x4ca   : > { %v10677_v51 = vpop.f32.mrf.mxu1 }
 0x4cb   : > { %v8100_v36 = vadd.f32 %v10677_v51, %v7951_v61  ;;  %v7955_v51 = vadd.f32 %v14271_v50, %v7704_v28  ;;  %v7956_v61 = vadd.f32 %v14272_v34, %v7705_v62  ;;  %v14277_v62 = vld [vmem:[#allocation20_spill] sm:$0xff] }
 0x4cc   : > { %v8051_v25 = vpop.f32.mrf.mxu1 }
 0x4cd   : > { %v8098_v54 = vadd.f32 %v8051_v25, %v7949_v16  ;;  %v8341_v30 = vadd.f32 %v14267_v5, %v8100_v36  ;;  %v14273_v25 = vld [vmem:[#allocation31_spill] sm:$0xff] }
 0x4ce   : > { %v10678_v23 = vpop.f32.mrf.mxu1  ;;  %v7467_v27 = vadd.f32 %v14273_v25, %v7318_v4  ;;  %v14279_v4 = vld [vmem:[#allocation14_spill] sm:$0xff] }
 0x4cf   : > { %v8101_v59 = vadd.f32 %v10678_v23, %v7952_v39  ;;  %v8339_v63 = vadd.f32 %v14263_v9, %v8098_v54  ;;  %v14274_v54 = vld [vmem:[#allocation43_spill] sm:$0xff] }
 0x4d0   : > { %v8054_v17 = vpop.f32.mrf.mxu1  ;;  %v7468_v10 = vadd.f32 %v14274_v54, %v7319_v37  ;;  %v8465_v54 = vld [vmem:[%s12359_s6 + $0xc8] sm:$0xff] }
 0x4d1   : > { %v8342_v19 = vadd.f32 %v10698_v24, %v8101_v59  ;;  %v8099_v42 = vadd.f32 %v8054_v17, %v7950_v40  ;;  %v7465_v24 = vadd.f32 %v14270_v18, %v7316_v15  ;;  %v8351_v56 = vmax.f32 %v8339_v63, 0.0 }
 0x4d2   : > { %v10681_v7 = vpop.f32.mrf.mxu1  ;;  %v7708_v59 = vadd.f32 %v13821_v2, %v7467_v27  ;;  %v7466_v40 = vadd.f32 %v14276_v33, %v7317_v12  ;;  %v7709_v15 = vadd.f32 %v13831_v53, %v7468_v10  ;;  %v8327_v12 = vpop.f32.mrf.mxu0  ;;  %v8493_v33 = vld [vmem:[%s12359_s6 + $0xe8] sm:$0xff] }
 0x4d3   : > { %v8340_v57 = vadd.f32 %v8295_v8, %v8099_v42  ;;  %v8354_v26 = vmax.f32 %v8342_v19, 0.0  ;;  %v8353_v8 = vmax.f32 %v8341_v30, 0.0  ;;  %v8104_v39 = vadd.f32 %v10681_v7, %v7955_v51  ;;  %v14278_v19 = vld [vmem:[#allocation42_spill] sm:$0xff]  ;;  %v14280_v7 = vld [vmem:[#allocation27_spill] sm:$0xff] }
 0x4d4   : > { %v8067_v0 = vpop.f32.mrf.mxu1  ;;  %v7706_v48 = vadd.f32 %v13825_v60, %v7465_v24  ;;  %v7707_v2 = vadd.f32 %v13837_v1, %v7466_v40  ;;  %v7959_v53 = vadd.f32 %v14278_v19, %v7708_v59  ;;  %v7960_v31 = vadd.f32 %v14279_v4, %v7709_v15 }
 0x4d5   : > { %v8352_v16 = vmax.f32 %v8340_v57, 0.0  ;;  %v8102_v52 = vadd.f32 %v8067_v0, %v7953_v29  ;;  %v8364_v46 = vpack.c.bf16 %v8354_v26, %v8353_v8  ;;  %v8345_v60 = vadd.f32 %v13833_v58, %v8104_v39 }
 0x4d6   : > { %v10682_v49 = vpop.f32.mrf.mxu1  ;;  %v7957_v9 = vadd.f32 %v14277_v62, %v7706_v48  ;;  %v7958_v1 = vadd.f32 %v14280_v7, %v7707_v2 }
 0x4d7   : > { %v8363_v36 = vpack.c.bf16 %v8352_v16, %v8351_v56  ;;  %v8105_v23 = vadd.f32 %v10682_v49, %v7956_v61  ;;  %v8343_v13 = vadd.f32 %v13845_v55, %v8102_v52  ;;  %v8357_v37 = vmax.f32 %v8345_v60, 0.0  ;;  %v8464_v52 = vld [vmem:[%s12359_s6 + $0xc0] sm:$0xff]  ;;  %v8478_v61 = vld [vmem:[%s12359_s6 + $0xd0] sm:$0xff] }
 0x4d8   : > { %v8070_v11 = vpop.f32.mrf.mxu1  ;;  %v8492_v49 = vld [vmem:[%s12359_s6 + $0xe0] sm:$0xff] }
 0x4d9   : > { %v8346_v21 = vadd.f32 %v10702_v41, %v8105_v23  ;;  %v8103_v28 = vadd.f32 %v8070_v11, %v7954_v14  ;;  %10711 = vmatprep.mubr.msk.bf16.mxu1 %vm2163_vm3, %v8363_v36  ;;  %v8355_v55 = vmax.f32 %v8343_v13, 0.0  ;;  %v8479_v23 = vld [vmem:[%s12359_s6 + $0xd8] sm:$0xff] }
 0x4da   : > { %v10685_v44 = vpop.f32.mrf.mxu1  ;;  %10712 = vmatmul.mubr.msk.bf16.vlgmr.msra.gmra.mxu1 %vm2163_vm3, %v8364_v46 }
 0x4db   : > { %v8344_v17 = vadd.f32 %v8311_v43, %v8103_v28  ;;  %v8358_v63 = vmax.f32 %v8346_v21, 0.0  ;;  %v8108_v58 = vadd.f32 %v10685_v44, %v7959_v53  ;;  %v8507_v28 = vld [vmem:[%s12359_s6 + $0xf8] sm:$0xff] }
 0x4dc   : > { %v8083_v42 = vpop.f32.mrf.mxu1 }
 0x4dd   : > { %v8356_v41 = vmax.f32 %v8344_v17, 0.0  ;;  %v8106_v6 = vadd.f32 %v8083_v42, %v7957_v9  ;;  %v8366_v43 = vpack.c.bf16 %v8358_v63, %v8357_v37  ;;  %v8349_v38 = vadd.f32 %v10705_v22, %v8108_v58  ;;  %v8506_v9 = vld [vmem:[%s12359_s6 + $0xf0] sm:$0xff] }
 0x4de   : > { %v10686_v32 = vpop.f32.mrf.mxu1 }
 0x4df   : > { %v8365_v5 = vpack.c.bf16 %v8356_v41, %v8355_v55  ;;  %v8109_v30 = vadd.f32 %v10686_v32, %v7960_v31  ;;  %v8347_v57 = vadd.f32 %v8324_v35, %v8106_v6  ;;  %v8361_v51 = vmax.f32 %v8349_v38, 0.0 }
 0x4e0   : > { %v8086_v45 = vpop.f32.mrf.mxu1 }
 0x4e1   : > { %v8350_v3 = vadd.f32 %v10706_v47, %v8109_v30  ;;  %v8107_v29 = vadd.f32 %v8086_v45, %v7958_v1  ;;  %10715 = vmatprep.mubr.msk.bf16.mxu1 %vm2163_vm3, %v8365_v5  ;;  %v8359_v26 = vmax.f32 %v8347_v57, 0.0 }
 0x4e2   : > { %10716 = vmatmul.mubr.msk.bf16.gmra.mxu1 %vm2163_vm3, %v8366_v43 }
 0x4e3   : > { %v8348_v18 = vadd.f32 %v8327_v12, %v8107_v29  ;;  %v8362_v24 = vmax.f32 %v8350_v3, 0.0 }
 0x4e5   : > { %v8360_v50 = vmax.f32 %v8348_v18, 0.0  ;;  %v8368_v56 = vpack.c.bf16 %v8362_v24, %v8361_v51 }
 0x4e7   : > { %v8367_v0 = vpack.c.bf16 %v8360_v50, %v8359_v26 }
 0x4e9   : > { %10719 = vmatprep.mubr.msk.bf16.mxu1 %vm2163_vm3, %v8367_v0 }
 0x4ea   : > { %10720 = vmatmul.mubr.msk.bf16.gmra.mxu1 %vm2163_vm3, %v8368_v56 }
 0x59a   : > { %v10713_v16 = vpop.f32.mrf.mxu1 }
 0x59c   : > { %v8421_v34 = vpop.f32.mrf.mxu1 }
 0x59d   : > { %v8466_v25 = vadd.f32 %v8464_v52, %v8421_v34 }
 0x59e   : > { %v10714_v27 = vpop.f32.mrf.mxu1 }
 0x59f   : > { %v9539_v10 = vpack.c.bf16 %v8466_v25, %v8466_v25  ;;  %v8480_v8 = vadd.f32 %v10714_v27, %v8478_v61 }
 0x5a0   : > { %v8424_v39 = vpop.f32.mrf.mxu1 }
 0x5a1   : > { %8476 = vst.msk [vmem:[%s12389_s12 + $0x60] sm:$0xf] %vm2271_vm4, %v9539_v10  ;;  %v9541_v22 = vpack.c.bf16 %v8480_v8, %v8480_v8  ;;  %v8467_v48 = vadd.f32 %v8465_v54, %v8424_v39 }
 0x5a2   : > { %v10717_v36 = vpop.f32.mrf.mxu1 }
 0x5a3   : > { %8490 = vst.msk [vmem:[%s12389_s12 + $0x68] sm:$0xf] %vm2271_vm4, %v9541_v22  ;;  %v9540_v20 = vpack.c.bf16 %v8467_v48, %v8467_v48  ;;  %v8494_v14 = vadd.f32 %v10717_v36, %v8492_v49 }
 0x5a4   : > { %v8436_v59 = vpop.f32.mrf.mxu1 }
 0x5a5   : > { %8477 = vst.msk [vmem:[%s12389_s12 + $0x64] sm:$0xf] %vm2271_vm4, %v9540_v20  ;;  %v9543_v40 = vpack.c.bf16 %v8494_v14, %v8494_v14  ;;  %v8481_v46 = vadd.f32 %v8479_v23, %v8436_v59 }
 0x5a6   : > { %v10718_v11 = vpop.f32.mrf.mxu1 }
 0x5a7   : > { %8504 = vst.msk [vmem:[%s12389_s12 + $0x70] sm:$0xf] %vm2271_vm4, %v9543_v40  ;;  %v9542_v15 = vpack.c.bf16 %v8481_v46, %v8481_v46  ;;  %v8495_v13 = vadd.f32 %v10718_v11, %v8493_v33 }
 0x5a8   : > { %v8439_v21 = vpop.f32.mrf.mxu1 }
 0x5a9   : > { %8491 = vst.msk [vmem:[%s12389_s12 + $0x6c] sm:$0xf] %vm2271_vm4, %v9542_v15  ;;  %v9544_v60 = vpack.c.bf16 %v8495_v13, %v8495_v13 }
 0x5aa   : > { %v10721_v35 = vpop.f32.mrf.mxu1 }
 0x5ab   : > { %8505 = vst.msk [vmem:[%s12389_s12 + $0x74] sm:$0xf] %vm2271_vm4, %v9544_v60  ;;  %v8509_v44 = vadd.f32 %v10721_v35, %v8507_v28 }
 0x5ac   : > { %v8451_v2 = vpop.f32.mrf.mxu1 }
 0x5ad   : > { %v9546_v17 = vpack.c.bf16 %v8509_v44, %v8509_v44 }
 0x5ae   : > { %v10722_v62 = vpop.f32.mrf.mxu1 }
 0x5af   : > { %8519 = vst.msk [vmem:[%s12389_s12 + $0x7c] sm:$0xf] %vm2271_vm4, %v9546_v17 }
 0x5b0   : > { %v8453_v63 = vpop.f32.mrf.mxu1 }
 0x5b1   : > { %v8508_v19 = vadd.f32 %v8506_v9, %v8453_v63 }
 0x5b3   : > { %v9545_v53 = vpack.c.bf16 %v8508_v19, %v8508_v19 }
 0x5b5   : > { %8518 = vst.msk [vmem:[%s12389_s12 + $0x78] sm:$0xf] %vm2271_vm4, %v9545_v53 }
 0x5b6 PF: > { %s14_s15 = sadd.s32 1, %s11133_s15  }
 0x5b7   : > { %p11_p4 = scmp.ge.s32.totalorder %s14_s15, 4  }
 0x5b9   :  { %13 = sbr.rel (!%p11_p4) target bundleno = 1 (0x1), region = 77 }

</bundles_post_ra>
